<compile_context>
chip_gen: v7x
topology: tpu7x:2x2x1
jax: 0.10.0
libtpu: 0.0.40
codegen_flags: <defaults>
</compile_context>

<pallas_src>
import numpy as np

import jax
import jax.numpy as jnp
from jax import lax
from jax.experimental import pallas as pl
from jax.experimental.pallas import tpu as pltpu

# ----------------------------- config (scaled-down) -------------------------
VOCAB = 100
SEQ = 8
HIDDEN = 32            # "bert hidden size" (real: 768)
N_LAYERS = 2           # unfrozen encoder layers in the reference module
N_HEADS = 4
HEAD_DIM = HIDDEN // N_HEADS
FFN = 4 * HIDDEN
IMG_SIZE = 16
RESNET_OUT = 64        # "resnet.fc.in_features" (real: 2048)
FUSION_HIDDEN = 512
NUM_CLASSES = 3
LOGIT_PAD = 128        # lane-dense padded logits width
FUSION_ROWS = 8        # fusion features broadcast to 8 rows (full sublane group)
BATCH = 2

# vision trunk geometry (per image)
COLS1 = 7 * 7 * 3      # im2col width of conv1
COLS_PAD = 256         # conv1 im2col width padded to a multiple of 128
STEM_HW = 64           # 8*8 spatial positions after conv1
POOL_HW = 16           # 4*4 after maxpool / bottleneck block 1
OUT_HW = 4             # 2*2 after bottleneck block 2
C_STEM = 16
C_B1_MID = 8
C_B1_OUT = 32
C_B2_MID = 16

_BF16 = jnp.bfloat16
_F32 = jnp.float32


# ----------------------------- in-kernel helpers -----------------------------
def _ln(x, g, b, eps=1e-12):
    mu = jnp.mean(x, axis=-1, keepdims=True)
    var = jnp.mean(jnp.square(x - mu), axis=-1, keepdims=True)
    return (x - mu) * lax.rsqrt(var + eps) * g + b


def _const_spec(a):
    # Whole-array block, constant block index -> DMA'd once, VMEM resident.
    nd = a.ndim
    return pl.BlockSpec(a.shape, lambda b: (0,) * nd)


# ----------------------------- fused forward kernel --------------------------
def _damage_kernel(x_ref, abias_ref, cols_ref,
                   bvec_ref, blkmask_ref, wqkv_ref, bqkv_ref, wo_ref, w1_ref, w2_ref,
                   c1w_ref, pool_ref, sel16_ref, convw_ref, vbias_ref,
                   fw1_ref, fbias_ref, fw2_ref, o_ref):
    # ---------------- BERT encoder (embedding LN + 2 transformer layers) -----
    bv = bvec_ref[...]                                        # (16, 128) packed vectors
    x = _ln(x_ref[...], bv[0:1, :HIDDEN], bv[1:2, :HIDDEN])   # (SEQ, H) f32
    blkmask = blkmask_ref[...]                                # (32, 128) kron(I_heads) mask
    attn_bias = abias_ref[0]                                  # (32, 32) blockdiag + key mask
    scale = 1.0 / (HEAD_DIM ** 0.5)

    for l in range(N_LAYERS):
        r = 2 + 7 * l
        # head-stacked fused QKV: kron(I_heads, x) (32,128) @ W_stk (128, 3D)
        x_rep = jnp.concatenate([x] * N_HEADS, axis=0)                 # (NH*S, H)
        x_rep = jnp.concatenate([x_rep] * N_HEADS, axis=1)             # (NH*S, NH*H)
        x_blk = (x_rep * blkmask).astype(_BF16)
        qkv = (jnp.dot(x_blk, wqkv_ref[l], preferred_element_type=_F32)
               + bqkv_ref[l])                                          # (32, 3D) f32
        q = (qkv[:, 0:HEAD_DIM] * scale).astype(_BF16)                 # (32, D) head-stacked
        k = qkv[:, HEAD_DIM:2 * HEAD_DIM].astype(_BF16)
        v = qkv[:, 2 * HEAD_DIM:3 * HEAD_DIM].astype(_BF16)
        # one score matmul + ONE softmax for all heads (off-block entries masked -1e9)
        s = lax.dot_general(q, k, (((1,), (1,)), ((), ())),
                            preferred_element_type=_F32)               # (32, 32)
        s = s + attn_bias
        s = s - jnp.max(s, axis=-1, keepdims=True)
        p = jnp.exp(s)
        p = p * pl.reciprocal(jnp.sum(p, axis=-1, keepdims=True), approx=True)
        ctx = jnp.dot(p.astype(_BF16), v, preferred_element_type=_F32)  # (32, D)
        ctx_cat = jnp.concatenate(
            [ctx[h * SEQ:(h + 1) * SEQ, :] for h in range(N_HEADS)], axis=1)  # (S, H)
        attn = (jnp.dot(ctx_cat.astype(_BF16), wo_ref[l], preferred_element_type=_F32)
                + bv[r:r + 1, :HIDDEN])
        x = _ln(x + attn, bv[r + 1:r + 2, :HIDDEN], bv[r + 2:r + 3, :HIDDEN])

        # FFN
        hmid = (jnp.dot(x.astype(_BF16), w1_ref[l], preferred_element_type=_F32)
                + bv[r + 3:r + 4, :FFN])
        # TODO(synk): HF BERT uses exact erf GELU; tanh approximation used here.
        hmid = jax.nn.gelu(hmid, approximate=True)
        hout = (jnp.dot(hmid.astype(_BF16), w2_ref[l], preferred_element_type=_F32)
                + bv[r + 4:r + 5, :HIDDEN])
        x = _ln(x + hout, bv[r + 5:r + 6, :HIDDEN], bv[r + 6:r + 7, :HIDDEN])

    cls = x[0:1, :]                                           # (1, H) [CLS] row

    # ---------------- vision trunk (conv1 / maxpool / 2 bottlenecks) ---------
    vb = vbias_ref[...]                                       # (8, 128) packed biases
    cw = convw_ref[...]                                       # (336, 64) packed conv weights
    sel = sel16_ref[...]                                      # (192, 16) packed selectors

    # conv1 (7x7/2, BN folded) + ReLU; im2col patches arrive pre-gathered, padded to 256.
    x0 = jnp.maximum(jnp.dot(cols_ref[...], c1w_ref[...], preferred_element_type=_F32)
                     + vb[0:1, :C_STEM], 0.0)                 # (64, 16)
    # 3x3/2 maxpool: ONE stacked-selector GEMM + 8 VPU maxes (x0>=0 so 0-padding exact)
    g = jnp.dot(pool_ref[...], x0.astype(_BF16), preferred_element_type=_F32)  # (144, 16)
    pooled = g[0:POOL_HW, :]
    for t in range(1, 9):
        pooled = jnp.maximum(pooled, g[t * POOL_HW:(t + 1) * POOL_HW, :])
    pooled_b = pooled.astype(_BF16)                           # (16, 16)

    # bottleneck block 1 (stride 1)
    y = jnp.maximum(jnp.dot(pooled_b, cw[0:16, 0:C_B1_MID], preferred_element_type=_F32)
                    + vb[1:2, :C_B1_MID], 0.0).astype(_BF16)                  # (16, 8)
    g1 = jnp.dot(sel[0:144, :], y, preferred_element_type=_F32)               # (144, 8)
    im1 = jnp.concatenate(
        [g1[t * POOL_HW:(t + 1) * POOL_HW, :] for t in range(9)], axis=1)     # (16, 72)
    y = jnp.maximum(jnp.dot(im1.astype(_BF16), cw[16:88, 0:C_B1_MID],
                            preferred_element_type=_F32) + vb[2:3, :C_B1_MID], 0.0)
    lhs1 = jnp.concatenate([y, pooled], axis=1).astype(_BF16)                 # (16, 24)
    xb1 = jnp.maximum(jnp.dot(lhs1, cw[88:112, 0:C_B1_OUT], preferred_element_type=_F32)
                      + vb[3:4, :C_B1_OUT], 0.0)                              # (16, 32)
    xb1_b = xb1.astype(_BF16)

    # bottleneck block 2 (stride 2)
    y = jnp.maximum(jnp.dot(xb1_b, cw[112:144, 0:C_B2_MID], preferred_element_type=_F32)
                    + vb[4:5, :C_B2_MID], 0.0).astype(_BF16)                  # (16, 16)
    g2 = jnp.dot(sel[144:184, :], y, preferred_element_type=_F32)             # (40, 16)
    im2 = jnp.concatenate(
        [g2[t * OUT_HW:(t + 1) * OUT_HW, :] for t in range(9)], axis=1)       # (4, 144)
    y = jnp.maximum(jnp.dot(im2.astype(_BF16), cw[144:288, 0:C_B2_MID],
                            preferred_element_type=_F32) + vb[5:6, :C_B2_MID], 0.0)
    ds = jnp.dot(sel[184:192, :], xb1_b,
                 preferred_element_type=_F32)[0:OUT_HW, :]                    # (4, 32)
    lhs2 = jnp.concatenate([y, ds], axis=1).astype(_BF16)                     # (4, 48)
    x2 = jnp.maximum(jnp.dot(lhs2, cw[288:336, 0:RESNET_OUT], preferred_element_type=_F32)
                     + vb[6:7, :RESNET_OUT], 0.0)                             # (4, 64)

    # ---------------- global average pool + fusion MLP ------------------------
    img_feat = jnp.broadcast_to(jnp.mean(x2, axis=0, keepdims=True),
                                (FUSION_ROWS, RESNET_OUT))
    txt_feat = jnp.broadcast_to(cls, (FUSION_ROWS, HIDDEN))
    feat = jnp.concatenate([txt_feat, img_feat], axis=1).astype(_BF16)        # (8, 96)
    fb = fbias_ref[...]                                                       # (2, 512)
    hid = jnp.maximum(jnp.dot(feat, fw1_ref[...], preferred_element_type=_F32)
                      + fb[0:1, :], 0.0)
    # TODO(synk): training-mode Dropout(0.5) not implemented; eval semantics (identity).
    logits = (jnp.dot(hid.astype(_BF16), fw2_ref[...], preferred_element_type=_F32)
              + fb[1:2, 0:LOGIT_PAD])
    o_ref[0] = logits                                                         # (8, 128)


def damage_fused(packed, x_emb, attn_bias, cols, batch):
    pb, pv, pf = packed["bert"], packed["vision"], packed["fusion"]
    consts = [pb["bvec"], packed["blkmask"], pb["wqkv"], pb["bqkv"], pb["wo"],
              pb["w1"], pb["w2"],
              pv["c1_w"], pv["pool"], pv["sel16"], pv["convw"], pv["vbias"],
              pf["w1"], pf["bias"], pf["w2"]]
    in_specs = ([pl.BlockSpec((SEQ, HIDDEN), lambda b: (b, 0)),
                 pl.BlockSpec((1, N_HEADS * SEQ, N_HEADS * SEQ), lambda b: (b, 0, 0)),
                 pl.BlockSpec((STEM_HW, COLS_PAD), lambda b: (b, 0))]
                + [_const_spec(a) for a in consts])
    out = pl.pallas_call(
        _damage_kernel,
        out_shape=jax.ShapeDtypeStruct((batch, FUSION_ROWS, LOGIT_PAD), _F32),
        grid=(batch,),
        in_specs=in_specs,
        out_specs=pl.BlockSpec((1, FUSION_ROWS, LOGIT_PAD), lambda b: (b, 0, 0)),
        compiler_params=pltpu.CompilerParams(dimension_semantics=("parallel",)),
    )(x_emb, attn_bias, cols, *consts)
    return out[:, 0, :]                                       # (B, 128)


# ----------------------------- wrapper-side helpers --------------------------
def im2col(x, kh, kw, stride, pad):
    # x: NHWC kernel *input*; plain XLA ops (single fused gather), no extra launches.
    x = jnp.pad(x, ((0, 0), (pad, pad), (pad, pad), (0, 0)))
    n, h, w, c = x.shape
    oh = (h - kh) // stride + 1
    ow = (w - kw) // stride + 1
    patches = []
    for i in range(kh):
        for j in range(kw):
            patches.append(x[:, i:i + stride * oh:stride, j:j + stride * ow:stride, :])
    cols = jnp.concatenate(patches, axis=-1)                            # (N, oh, ow, kh*kw*C)
    return cols.reshape(n * oh * ow, kh * kw * c)


def _shift_selectors(H, W, K, stride, pad):
    # 0/1 matrices S[t] with (S[t] @ x_flat)[o] = x[pos(o, tap t)] (0 for padding).
    OH = (H + 2 * pad - K) // stride + 1
    OW = (W + 2 * pad - K) // stride + 1
    S = np.zeros((K * K, OH * OW, H * W), np.float32)
    for i in range(OH):
        for j in range(OW):
            o = i * OW + j
            for di in range(K):
                for dj in range(K):
                    ii = i * stride + di - pad
                    jj = j * stride + dj - pad
                    if 0 <= ii < H and 0 <= jj < W:
                        S[di * K + dj, o, ii * W + jj] = 1.0
    return S


def build_selectors():
    return {
        "pool": _shift_selectors(8, 8, 3, 2, 1),     # (9, 16, 64)
        "s33_1": _shift_selectors(4, 4, 3, 1, 1),    # (9, 16, 16)
        "s33_2": _shift_selectors(4, 4, 3, 2, 1),    # (9, 4, 16)
        "sub": _shift_selectors(4, 4, 1, 2, 0)[0],   # (4, 16)
    }


def build_qkv_blkmask():
    m = np.zeros((N_HEADS * SEQ, N_HEADS * HIDDEN), np.float32)
    for h in range(N_HEADS):
        m[h * SEQ:(h + 1) * SEQ, h * HIDDEN:(h + 1) * HIDDEN] = 1.0
    return jnp.asarray(m)


def build_attn_block_bias():
    m = np.full((N_HEADS * SEQ, N_HEADS * SEQ), -1e9, np.float32)
    for h in range(N_HEADS):
        m[h * SEQ:(h + 1) * SEQ, h * SEQ:(h + 1) * SEQ] = 0.0
    return m


_ATTN_BLOCK_BIAS = build_attn_block_bias()


# ----------------------------- parameter init --------------------------------
def _dense_init(key, shape, scale=0.02):
    return scale * jax.random.normal(key, shape, dtype=jnp.float32)


def make_conv_bn(key, kh, kw, cin, cout):
    k1, k2, k3, k4, k5 = jax.random.split(key, 5)
    w = _dense_init(k1, (kh, kw, cin, cout), scale=0.1)
    gamma = 1.0 + 0.1 * jax.random.normal(k2, (cout,), dtype=jnp.float32)
    beta = 0.1 * jax.random.normal(k3, (cout,), dtype=jnp.float32)
    mean = 0.1 * jax.random.normal(k4, (cout,), dtype=jnp.float32)
    var = jnp.abs(1.0 + 0.1 * jax.random.normal(k5, (cout,), dtype=jnp.float32))
    scale = gamma * lax.rsqrt(var + 1e-5)
    return {"w": w * scale, "b": beta - mean * scale}   # BN folded (eval mode)


def init_bert_params(key):
    keys = jax.random.split(key, 3 + N_LAYERS)
    params = {
        "word_emb": _dense_init(keys[0], (VOCAB, HIDDEN)),
        "pos_emb": _dense_init(keys[1], (SEQ, HIDDEN)),
        "type_emb": _dense_init(keys[2], (2, HIDDEN)),
        "emb_ln_g": jnp.ones((HIDDEN,), jnp.float32),
        "emb_ln_b": jnp.zeros((HIDDEN,), jnp.float32),
        "layers": [],
    }
    for l in range(N_LAYERS):
        lk = jax.random.split(keys[3 + l], 6)
        params["layers"].append({
            "wq": _dense_init(lk[0], (HIDDEN, HIDDEN)), "bq": jnp.zeros((HIDDEN,), jnp.float32),
            "wk": _dense_init(lk[1], (HIDDEN, HIDDEN)), "bk": jnp.zeros((HIDDEN,), jnp.float32),
            "wv": _dense_init(lk[2], (HIDDEN, HIDDEN)), "bv": jnp.zeros((HIDDEN,), jnp.float32),
            "wo": _dense_init(lk[3], (HIDDEN, HIDDEN)), "bo": jnp.zeros((HIDDEN,), jnp.float32),
            "ln1_g": jnp.ones((HIDDEN,), jnp.float32), "ln1_b": jnp.zeros((HIDDEN,), jnp.float32),
            "w1": _dense_init(lk[4], (HIDDEN, FFN)), "b1": jnp.zeros((FFN,), jnp.float32),
            "w2": _dense_init(lk[5], (FFN, HIDDEN)), "b2": jnp.zeros((HIDDEN,), jnp.float32),
            "ln2_g": jnp.ones((HIDDEN,), jnp.float32), "ln2_b": jnp.zeros((HIDDEN,), jnp.float32),
        })
    return params


def init_resnet_params(key):
    ks = jax.random.split(key, 9)
    return {
        "conv1": make_conv_bn(ks[0], 7, 7, 3, C_STEM),
        "b1_c1": make_conv_bn(ks[1], 1, 1, C_STEM, C_B1_MID),
        "b1_c2": make_conv_bn(ks[2], 3, 3, C_B1_MID, C_B1_MID),
        "b1_c3": make_conv_bn(ks[3], 1, 1, C_B1_MID, C_B1_OUT),
        "b1_ds": make_conv_bn(ks[4], 1, 1, C_STEM, C_B1_OUT),
        "b2_c1": make_conv_bn(ks[5], 1, 1, C_B1_OUT, C_B2_MID),
        "b2_c2": make_conv_bn(ks[6], 3, 3, C_B2_MID, C_B2_MID),
        "b2_c3": make_conv_bn(ks[7], 1, 1, C_B2_MID, RESNET_OUT),
        "b2_ds": make_conv_bn(ks[8], 1, 1, C_B1_OUT, RESNET_OUT),
    }


def init_fusion_params(key):
    k1, k2 = jax.random.split(key)
    return {
        "w1": _dense_init(k1, (HIDDEN + RESNET_OUT, FUSION_HIDDEN)),
        "b1": jnp.zeros((FUSION_HIDDEN,), jnp.float32),
        "w2": _dense_init(k2, (FUSION_HIDDEN, NUM_CLASSES)),
        "b2": jnp.zeros((NUM_CLASSES,), jnp.float32),
    }


# ----------------------------- param packing ---------------------------------
def _pad_row128(v, width=128):
    row = jnp.zeros((1, width), jnp.float32)
    return row.at[0, :v.shape[0]].set(v.astype(jnp.float32))


def pack_bert(p):
    layers = p["layers"]

    def head_stack_cols(w):  # (H, H) -> (NH*H, D); rows h*H:(h+1)*H = w[:, h*D:(h+1)*D]
        return jnp.concatenate(
            [w[:, h * HEAD_DIM:(h + 1) * HEAD_DIM] for h in range(N_HEADS)], axis=0)

    def head_stack_bias(b):  # (H,) -> (NH*SEQ, D)
        return jnp.concatenate(
            [jnp.broadcast_to(b[h * HEAD_DIM:(h + 1) * HEAD_DIM][None, :], (SEQ, HEAD_DIM))
             for h in range(N_HEADS)], axis=0)

    wqkv = jnp.stack([jnp.concatenate([head_stack_cols(l["wq"]), head_stack_cols(l["wk"]),
                                       head_stack_cols(l["wv"])], axis=1) for l in layers])
    bqkv = jnp.stack([jnp.concatenate([head_stack_bias(l["bq"]), head_stack_bias(l["bk"]),
                                       head_stack_bias(l["bv"])], axis=1) for l in layers])
    rows = [_pad_row128(p["emb_ln_g"]), _pad_row128(p["emb_ln_b"])]
    for l in layers:
        rows += [_pad_row128(l["bo"]), _pad_row128(l["ln1_g"]), _pad_row128(l["ln1_b"]),
                 _pad_row128(l["b1"]), _pad_row128(l["b2"]),
                 _pad_row128(l["ln2_g"]), _pad_row128(l["ln2_b"])]
    return {
        "word_emb": p["word_emb"], "pos_emb": p["pos_emb"], "type_emb": p["type_emb"],
        "bvec": jnp.concatenate(rows, axis=0),                  # (16, 128) f32
        "wqkv": wqkv.astype(_BF16),                             # (L, 128, 24)
        "bqkv": bqkv,                                           # (L, 32, 24) f32
        "wo": jnp.stack([l["wo"] for l in layers]).astype(_BF16),
        "w1": jnp.stack([l["w1"] for l in layers]).astype(_BF16),
        "w2": jnp.stack([l["w2"] for l in layers]).astype(_BF16),
    }


def pack_vision(p, sels):
    def w1x1(cp):
        _, _, cin, cout = cp["w"].shape
        return cp["w"].reshape(cin, cout)

    def w3x3(cp):
        kh, kw, cin, cout = cp["w"].shape
        return cp["w"].reshape(kh * kw * cin, cout)

    def padlane(w, lanes=64):
        out = jnp.zeros((w.shape[0], lanes), jnp.float32)
        return out.at[:, :w.shape[1]].set(w)

    c1_w = jnp.zeros((COLS_PAD, C_STEM), jnp.float32).at[:COLS1, :].set(
        p["conv1"]["w"].reshape(COLS1, C_STEM)).astype(_BF16)

    b1cat_w = jnp.concatenate([w1x1(p["b1_c3"]), w1x1(p["b1_ds"])], axis=0)   # (24, 32)
    b2cat_w = jnp.concatenate([w1x1(p["b2_c3"]), w1x1(p["b2_ds"])], axis=0)   # (48, 64)
    convw = jnp.concatenate([
        padlane(w1x1(p["b1_c1"])),     # rows   0: 16
        padlane(w3x3(p["b1_c2"])),     # rows  16: 88
        padlane(b1cat_w),              # rows  88:112
        padlane(w1x1(p["b2_c1"])),     # rows 112:144
        padlane(w3x3(p["b2_c2"])),     # rows 144:288
        padlane(b2cat_w),              # rows 288:336
    ], axis=0).astype(_BF16)           # (336, 64)

    vbias = jnp.concatenate([
        _pad_row128(p["conv1"]["b"]),
        _pad_row128(p["b1_c1"]["b"]),
        _pad_row128(p["b1_c2"]["b"]),
        _pad_row128(p["b1_c3"]["b"] + p["b1_ds"]["b"]),
        _pad_row128(p["b2_c1"]["b"]),
        _pad_row128(p["b2_c2"]["b"]),
        _pad_row128(p["b2_c3"]["b"] + p["b2_ds"]["b"]),
        jnp.zeros((1, 128), jnp.float32),
    ], axis=0)                         # (8, 128)

    pool = jnp.asarray(sels["pool"]).reshape(9 * POOL_HW, STEM_HW).astype(_BF16)   # (144, 64)
    sel1 = jnp.asarray(sels["s33_1"]).reshape(9 * POOL_HW, POOL_HW)                # (144, 16)
    sel2 = jnp.zeros((40, POOL_HW), jnp.float32).at[:9 * OUT_HW, :].set(
        jnp.asarray(sels["s33_2"]).reshape(9 * OUT_HW, POOL_HW))                   # (40, 16)
    sub = jnp.zeros((8, POOL_HW), jnp.float32).at[:OUT_HW, :].set(
        jnp.asarray(sels["sub"]))                                                  # (8, 16)
    sel16 = jnp.concatenate([sel1, sel2, sub], axis=0).astype(_BF16)               # (192, 16)

    return {"c1_w": c1_w, "pool": pool, "sel16": sel16, "convw": convw, "vbias": vbias}


def pack_fusion(p):
    # lane-dense padded classifier: (512, 128), real logits in columns [:3]
    w2p = jnp.zeros((FUSION_HIDDEN, LOGIT_PAD), jnp.float32).at[:, :NUM_CLASSES].set(p["w2"])
    fb = jnp.zeros((2, FUSION_HIDDEN), jnp.float32)
    fb = fb.at[0, :].set(p["b1"]).at[1, :NUM_CLASSES].set(p["b2"])
    return {"w1": p["w1"].astype(_BF16),       # (96, 512) [text rows | image rows]
            "w2": w2p.astype(_BF16),           # (512, 128)
            "bias": fb}                        # (2, 512): row0 = fb1, row1[:128] = fb2 padded


# ----------------------------- forward ---------------------------------------
def damage_net_forward(packed, input_ids, attention_mask, image):
    B, S = input_ids.shape
    pb = packed["bert"]
    # embeddings (XLA gather + adds), LN is done in-kernel
    # TODO(synk): token_type_ids assumed all-zero (type_emb[0]).
    x_emb = (jnp.take(pb["word_emb"], input_ids, axis=0)
             + pb["pos_emb"][None, :, :]
             + pb["type_emb"][0][None, None, :]).reshape(B * S, HIDDEN)
    # per-batch additive attention bias: block-diagonal head mask + key padding mask
    key_bias = (1.0 - attention_mask.astype(_F32)) * -1e9                  # (B, S)
    attn_bias = (jnp.asarray(_ATTN_BLOCK_BIAS)[None, :, :]
                 + jnp.tile(key_bias, (1, N_HEADS))[:, None, :])           # (B, 32, 32)

    # layout: input is NCHW (PyTorch convention); compute in NHWC.
    img = jnp.transpose(image, (0, 2, 3, 1))                               # (B, 16, 16, 3)
    cols = im2col(img, 7, 7, 2, 3)                                         # (B*64, 147)
    cols = jnp.pad(cols, ((0, 0), (0, COLS_PAD - COLS1))).astype(_BF16)    # (B*64, 256)

    logits_pad = damage_fused(packed, x_emb, attn_bias, cols, B)           # (B, 128)
    return logits_pad[:, :NUM_CLASSES]


# ----------------------------- main ------------------------------------------
if __name__ == "__main__":
    key = jax.random.PRNGKey(0)
    kb, kr, kf, ki, kimg = jax.random.split(key, 5)
    raw = {
        "bert": init_bert_params(kb),
        "resnet": init_resnet_params(kr),
        "fusion": init_fusion_params(kf),
    }
    packed = {
        "bert": pack_bert(raw["bert"]),
        "vision": pack_vision(raw["resnet"], build_selectors()),
        "fusion": pack_fusion(raw["fusion"]),
        "blkmask": build_qkv_blkmask(),
    }
    input_ids = jax.random.randint(ki, (BATCH, SEQ), 0, VOCAB, dtype=jnp.int32)
    attention_mask = jnp.ones((BATCH, SEQ), dtype=jnp.int32).at[1, SEQ - 2:].set(0)
    image = jax.random.normal(kimg, (BATCH, 3, IMG_SIZE, IMG_SIZE), dtype=jnp.float32)

    out = jax.jit(damage_net_forward)(packed, input_ids, attention_mask, image)
    out = jax.block_until_ready(out)
    assert out.shape == (BATCH, NUM_CLASSES) and out.dtype == jnp.float32
    print("KERNEL_OK")
</pallas_src>

<mosaic_0001>
module attributes {stable_mosaic.version = 11 : i64} {
  func.func @_damage_kernel(%arg0: i32, %arg1: memref<8x32xf32, #tpu.memory_space<vmem>>, %arg2: memref<1x32x32xf32, #tpu.memory_space<vmem>>, %arg3: memref<64x256xbf16, #tpu.memory_space<vmem>>, %arg4: memref<16x128xf32, #tpu.memory_space<vmem>>, %arg5: memref<32x128xf32, #tpu.memory_space<vmem>>, %arg6: memref<2x128x24xbf16, #tpu.memory_space<vmem>>, %arg7: memref<2x32x24xf32, #tpu.memory_space<vmem>>, %arg8: memref<2x32x32xbf16, #tpu.memory_space<vmem>>, %arg9: memref<2x32x128xbf16, #tpu.memory_space<vmem>>, %arg10: memref<2x128x32xbf16, #tpu.memory_space<vmem>>, %arg11: memref<256x16xbf16, #tpu.memory_space<vmem>>, %arg12: memref<144x64xbf16, #tpu.memory_space<vmem>>, %arg13: memref<192x16xbf16, #tpu.memory_space<vmem>>, %arg14: memref<336x64xbf16, #tpu.memory_space<vmem>>, %arg15: memref<8x128xf32, #tpu.memory_space<vmem>>, %arg16: memref<96x512xbf16, #tpu.memory_space<vmem>>, %arg17: memref<2x512xf32, #tpu.memory_space<vmem>>, %arg18: memref<512x128xbf16, #tpu.memory_space<vmem>>, %arg19: memref<1x8x128xf32, #tpu.memory_space<vmem>>) attributes {dimension_semantics = [#tpu.dimension_semantics<parallel>], iteration_bounds = array<i64: 2>, scalar_prefetch = 0 : i64, scratch_operands = 0 : i64, tpu.core_type = #tpu.core_type<tc>, window_params = [{transform_indices = @transform_0, window_bounds = array<i64: 8, 32>}, {transform_indices = @transform_1, window_bounds = array<i64: 1, 32, 32>}, {transform_indices = @transform_2, window_bounds = array<i64: 64, 256>}, {pipeline_mode = #tpu.pipeline_mode<synchronous>, transform_indices = @transform_3, window_bounds = array<i64: 16, 128>}, {pipeline_mode = #tpu.pipeline_mode<synchronous>, transform_indices = @transform_4, window_bounds = array<i64: 32, 128>}, {pipeline_mode = #tpu.pipeline_mode<synchronous>, transform_indices = @transform_5, window_bounds = array<i64: 2, 128, 24>}, {pipeline_mode = #tpu.pipeline_mode<synchronous>, transform_indices = @transform_6, window_bounds = array<i64: 2, 32, 24>}, {pipeline_mode = #tpu.pipeline_mode<synchronous>, transform_indices = @transform_7, window_bounds = array<i64: 2, 32, 32>}, {pipeline_mode = #tpu.pipeline_mode<synchronous>, transform_indices = @transform_8, window_bounds = array<i64: 2, 32, 128>}, {pipeline_mode = #tpu.pipeline_mode<synchronous>, transform_indices = @transform_9, window_bounds = array<i64: 2, 128, 32>}, {pipeline_mode = #tpu.pipeline_mode<synchronous>, transform_indices = @transform_10, window_bounds = array<i64: 256, 16>}, {pipeline_mode = #tpu.pipeline_mode<synchronous>, transform_indices = @transform_11, window_bounds = array<i64: 144, 64>}, {pipeline_mode = #tpu.pipeline_mode<synchronous>, transform_indices = @transform_12, window_bounds = array<i64: 192, 16>}, {pipeline_mode = #tpu.pipeline_mode<synchronous>, transform_indices = @transform_13, window_bounds = array<i64: 336, 64>}, {pipeline_mode = #tpu.pipeline_mode<synchronous>, transform_indices = @transform_14, window_bounds = array<i64: 8, 128>}, {pipeline_mode = #tpu.pipeline_mode<synchronous>, transform_indices = @transform_15, window_bounds = array<i64: 96, 512>}, {pipeline_mode = #tpu.pipeline_mode<synchronous>, transform_indices = @transform_16, window_bounds = array<i64: 2, 512>}, {pipeline_mode = #tpu.pipeline_mode<synchronous>, transform_indices = @transform_17, window_bounds = array<i64: 512, 128>}, {transform_indices = @transform_18, window_bounds = array<i64: 1, 8, 128>}]} {
    %c0 = arith.constant 0 : index
    %c0_0 = arith.constant 0 : index
    %0 = vector.load %arg4[%c0, %c0_0] : memref<16x128xf32, #tpu.memory_space<vmem>>, vector<16x128xf32>
    %c0_1 = arith.constant 0 : index
    %c0_2 = arith.constant 0 : index
    %1 = vector.load %arg1[%c0_1, %c0_2] : memref<8x32xf32, #tpu.memory_space<vmem>>, vector<8x32xf32>
    %2 = vector.extract_strided_slice %0 {offsets = [0, 0], sizes = [1, 32], strides = [1, 1]} : vector<16x128xf32> to vector<1x32xf32>
    %3 = vector.extract_strided_slice %0 {offsets = [1, 0], sizes = [1, 32], strides = [1, 1]} : vector<16x128xf32> to vector<1x32xf32>
    %cst = arith.constant dense<0.000000e+00> : vector<8xf32>
    %4 = vector.multi_reduction <add>, %1, %cst [1] : vector<8x32xf32> to vector<8xf32>
    %5 = vector.shape_cast %4 : vector<8xf32> to vector<8x1xf32>
    %cst_3 = arith.constant 3.200000e+01 : f32
    %6 = vector.broadcast %cst_3 : f32 to vector<8x1xf32>
    %7 = arith.divf %5, %6 : vector<8x1xf32>
    %8 = vector.broadcast %7 : vector<8x1xf32> to vector<8x32xf32>
    %9 = arith.subf %1, %8 : vector<8x32xf32>
    %10 = arith.mulf %9, %9 : vector<8x32xf32>
    %cst_4 = arith.constant dense<0.000000e+00> : vector<8xf32>
    %11 = vector.multi_reduction <add>, %10, %cst_4 [1] : vector<8x32xf32> to vector<8xf32>
    %12 = vector.shape_cast %11 : vector<8xf32> to vector<8x1xf32>
    %cst_5 = arith.constant 3.200000e+01 : f32
    %13 = vector.broadcast %cst_5 : f32 to vector<8x1xf32>
    %14 = arith.divf %12, %13 : vector<8x1xf32>
    %15 = vector.broadcast %7 : vector<8x1xf32> to vector<8x32xf32>
    %16 = arith.subf %1, %15 : vector<8x32xf32>
    %cst_6 = arith.constant 9.99999996E-13 : f32
    %17 = vector.broadcast %cst_6 : f32 to vector<8x1xf32>
    %18 = arith.addf %14, %17 : vector<8x1xf32>
    %19 = math.rsqrt %18 : vector<8x1xf32>
    %20 = vector.broadcast %19 : vector<8x1xf32> to vector<8x32xf32>
    %21 = arith.mulf %16, %20 : vector<8x32xf32>
    %22 = vector.broadcast %2 : vector<1x32xf32> to vector<8x32xf32>
    %23 = arith.mulf %21, %22 : vector<8x32xf32>
    %24 = vector.broadcast %3 : vector<1x32xf32> to vector<8x32xf32>
    %25 = arith.addf %23, %24 : vector<8x32xf32>
    %c0_7 = arith.constant 0 : index
    %c0_8 = arith.constant 0 : index
    %26 = vector.load %arg5[%c0_7, %c0_8] : memref<32x128xf32, #tpu.memory_space<vmem>>, vector<32x128xf32>
    %c0_9 = arith.constant 0 : index
    %c0_10 = arith.constant 0 : index
    %c0_11 = arith.constant 0 : index
    %27 = vector.load %arg2[%c0_9, %c0_10, %c0_11] : memref<1x32x32xf32, #tpu.memory_space<vmem>>, vector<1x32x32xf32>
    %28 = vector.shape_cast %27 : vector<1x32x32xf32> to vector<32x32xf32>
    %29 = tpu.concatenate %25, %25, %25, %25 in 0 : vector<8x32xf32>, vector<8x32xf32>, vector<8x32xf32>, vector<8x32xf32> -> vector<32x32xf32>
    %30 = tpu.concatenate %29, %29, %29, %29 in 1 : vector<32x32xf32>, vector<32x32xf32>, vector<32x32xf32>, vector<32x32xf32> -> vector<32x128xf32>
    %31 = arith.mulf %30, %26 : vector<32x128xf32>
    %32 = arith.truncf %31 : vector<32x128xf32> to vector<32x128xbf16>
    %c0_12 = arith.constant 0 : index
    %c0_13 = arith.constant 0 : index
    %c0_14 = arith.constant 0 : index
    %33 = vector.load %arg6[%c0_12, %c0_13, %c0_14] : memref<2x128x24xbf16, #tpu.memory_space<vmem>>, vector<1x128x24xbf16>
    %34 = vector.shape_cast %33 : vector<1x128x24xbf16> to vector<128x24xbf16>
    %cst_15 = arith.constant dense<0.000000e+00> : vector<32x24xf32>
    %35 = tpu.matmul %32, %34, %cst_15 {dimension_numbers = #tpu.dot_dimension_numbers<[1], [0], [0], [1], [0, 0, 1, 1], [], []>} : vector<32x128xbf16>, vector<128x24xbf16>, vector<32x24xf32> -> vector<32x24xf32>
    %c0_16 = arith.constant 0 : index
    %c0_17 = arith.constant 0 : index
    %c0_18 = arith.constant 0 : index
    %36 = vector.load %arg7[%c0_16, %c0_17, %c0_18] : memref<2x32x24xf32, #tpu.memory_space<vmem>>, vector<1x32x24xf32>
    %37 = vector.shape_cast %36 : vector<1x32x24xf32> to vector<32x24xf32>
    %38 = arith.addf %35, %37 : vector<32x24xf32>
    %39 = vector.extract_strided_slice %38 {offsets = [0, 0], sizes = [32, 8], strides = [1, 1]} : vector<32x24xf32> to vector<32x8xf32>
    %cst_19 = arith.constant 0.353553385 : f32
    %40 = vector.broadcast %cst_19 : f32 to vector<32x8xf32>
    %41 = arith.mulf %39, %40 : vector<32x8xf32>
    %42 = arith.truncf %41 : vector<32x8xf32> to vector<32x8xbf16>
    %43 = vector.extract_strided_slice %38 {offsets = [0, 8], sizes = [32, 8], strides = [1, 1]} : vector<32x24xf32> to vector<32x8xf32>
    %44 = arith.truncf %43 : vector<32x8xf32> to vector<32x8xbf16>
    %45 = vector.extract_strided_slice %38 {offsets = [0, 16], sizes = [32, 8], strides = [1, 1]} : vector<32x24xf32> to vector<32x8xf32>
    %46 = arith.truncf %45 : vector<32x8xf32> to vector<32x8xbf16>
    %cst_20 = arith.constant dense<0.000000e+00> : vector<32x32xf32>
    %47 = tpu.matmul %42, %44, %cst_20 {dimension_numbers = #tpu.dot_dimension_numbers<[1], [1], [0], [0], [0, 0, 1, 0], [], []>} : vector<32x8xbf16>, vector<32x8xbf16>, vector<32x32xf32> -> vector<32x32xf32>
    %48 = arith.addf %47, %28 : vector<32x32xf32>
    %cst_21 = arith.constant dense<0xFF800000> : vector<32xf32>
    %49 = vector.multi_reduction <maximumf>, %48, %cst_21 [1] : vector<32x32xf32> to vector<32xf32>
    %50 = vector.shape_cast %49 : vector<32xf32> to vector<32x1xf32>
    %51 = vector.broadcast %50 : vector<32x1xf32> to vector<32x32xf32>
    %52 = arith.subf %48, %51 : vector<32x32xf32>
    %53 = math.exp %52 : vector<32x32xf32>
    %cst_22 = arith.constant dense<0.000000e+00> : vector<32xf32>
    %54 = vector.multi_reduction <add>, %53, %cst_22 [1] : vector<32x32xf32> to vector<32xf32>
    %55 = vector.shape_cast %54 : vector<32xf32> to vector<32x1xf32>
    %56 = tpu.reciprocal %55 {approx = true} : vector<32x1xf32> -> vector<32x1xf32>
    %57 = vector.broadcast %56 : vector<32x1xf32> to vector<32x32xf32>
    %58 = arith.mulf %53, %57 : vector<32x32xf32>
    %59 = arith.truncf %58 : vector<32x32xf32> to vector<32x32xbf16>
    %cst_23 = arith.constant dense<0.000000e+00> : vector<32x8xf32>
    %60 = tpu.matmul %59, %46, %cst_23 {dimension_numbers = #tpu.dot_dimension_numbers<[1], [0], [0], [1], [0, 0, 1, 1], [], []>} : vector<32x32xbf16>, vector<32x8xbf16>, vector<32x8xf32> -> vector<32x8xf32>
    %61 = vector.extract_strided_slice %60 {offsets = [0, 0], sizes = [8, 8], strides = [1, 1]} : vector<32x8xf32> to vector<8x8xf32>
    %62 = vector.extract_strided_slice %60 {offsets = [8, 0], sizes = [8, 8], strides = [1, 1]} : vector<32x8xf32> to vector<8x8xf32>
    %63 = vector.extract_strided_slice %60 {offsets = [16, 0], sizes = [8, 8], strides = [1, 1]} : vector<32x8xf32> to vector<8x8xf32>
    %64 = vector.extract_strided_slice %60 {offsets = [24, 0], sizes = [8, 8], strides = [1, 1]} : vector<32x8xf32> to vector<8x8xf32>
    %65 = tpu.concatenate %61, %62, %63, %64 in 1 : vector<8x8xf32>, vector<8x8xf32>, vector<8x8xf32>, vector<8x8xf32> -> vector<8x32xf32>
    %66 = arith.truncf %65 : vector<8x32xf32> to vector<8x32xbf16>
    %c0_24 = arith.constant 0 : index
    %c0_25 = arith.constant 0 : index
    %c0_26 = arith.constant 0 : index
    %67 = vector.load %arg8[%c0_24, %c0_25, %c0_26] : memref<2x32x32xbf16, #tpu.memory_space<vmem>>, vector<1x32x32xbf16>
    %68 = vector.shape_cast %67 : vector<1x32x32xbf16> to vector<32x32xbf16>
    %cst_27 = arith.constant dense<0.000000e+00> : vector<8x32xf32>
    %69 = tpu.matmul %66, %68, %cst_27 {dimension_numbers = #tpu.dot_dimension_numbers<[1], [0], [0], [1], [0, 0, 1, 1], [], []>} : vector<8x32xbf16>, vector<32x32xbf16>, vector<8x32xf32> -> vector<8x32xf32>
    %70 = vector.extract_strided_slice %0 {offsets = [2, 0], sizes = [1, 32], strides = [1, 1]} : vector<16x128xf32> to vector<1x32xf32>
    %71 = vector.broadcast %70 : vector<1x32xf32> to vector<8x32xf32>
    %72 = arith.addf %69, %71 : vector<8x32xf32>
    %73 = arith.addf %25, %72 : vector<8x32xf32>
    %74 = vector.extract_strided_slice %0 {offsets = [3, 0], sizes = [1, 32], strides = [1, 1]} : vector<16x128xf32> to vector<1x32xf32>
    %75 = vector.extract_strided_slice %0 {offsets = [4, 0], sizes = [1, 32], strides = [1, 1]} : vector<16x128xf32> to vector<1x32xf32>
    %cst_28 = arith.constant dense<0.000000e+00> : vector<8xf32>
    %76 = vector.multi_reduction <add>, %73, %cst_28 [1] : vector<8x32xf32> to vector<8xf32>
    %77 = vector.shape_cast %76 : vector<8xf32> to vector<8x1xf32>
    %cst_29 = arith.constant 3.200000e+01 : f32
    %78 = vector.broadcast %cst_29 : f32 to vector<8x1xf32>
    %79 = arith.divf %77, %78 : vector<8x1xf32>
    %80 = vector.broadcast %79 : vector<8x1xf32> to vector<8x32xf32>
    %81 = arith.subf %73, %80 : vector<8x32xf32>
    %82 = arith.mulf %81, %81 : vector<8x32xf32>
    %cst_30 = arith.constant dense<0.000000e+00> : vector<8xf32>
    %83 = vector.multi_reduction <add>, %82, %cst_30 [1] : vector<8x32xf32> to vector<8xf32>
    %84 = vector.shape_cast %83 : vector<8xf32> to vector<8x1xf32>
    %cst_31 = arith.constant 3.200000e+01 : f32
    %85 = vector.broadcast %cst_31 : f32 to vector<8x1xf32>
    %86 = arith.divf %84, %85 : vector<8x1xf32>
    %87 = vector.broadcast %79 : vector<8x1xf32> to vector<8x32xf32>
    %88 = arith.subf %73, %87 : vector<8x32xf32>
    %cst_32 = arith.constant 9.99999996E-13 : f32
    %89 = vector.broadcast %cst_32 : f32 to vector<8x1xf32>
    %90 = arith.addf %86, %89 : vector<8x1xf32>
    %91 = math.rsqrt %90 : vector<8x1xf32>
    %92 = vector.broadcast %91 : vector<8x1xf32> to vector<8x32xf32>
    %93 = arith.mulf %88, %92 : vector<8x32xf32>
    %94 = vector.broadcast %74 : vector<1x32xf32> to vector<8x32xf32>
    %95 = arith.mulf %93, %94 : vector<8x32xf32>
    %96 = vector.broadcast %75 : vector<1x32xf32> to vector<8x32xf32>
    %97 = arith.addf %95, %96 : vector<8x32xf32>
    %98 = arith.truncf %97 : vector<8x32xf32> to vector<8x32xbf16>
    %c0_33 = arith.constant 0 : index
    %c0_34 = arith.constant 0 : index
    %c0_35 = arith.constant 0 : index
    %99 = vector.load %arg9[%c0_33, %c0_34, %c0_35] : memref<2x32x128xbf16, #tpu.memory_space<vmem>>, vector<1x32x128xbf16>
    %100 = vector.shape_cast %99 : vector<1x32x128xbf16> to vector<32x128xbf16>
    %cst_36 = arith.constant dense<0.000000e+00> : vector<8x128xf32>
    %101 = tpu.matmul %98, %100, %cst_36 {dimension_numbers = #tpu.dot_dimension_numbers<[1], [0], [0], [1], [0, 0, 1, 1], [], []>} : vector<8x32xbf16>, vector<32x128xbf16>, vector<8x128xf32> -> vector<8x128xf32>
    %102 = vector.extract_strided_slice %0 {offsets = [5, 0], sizes = [1, 128], strides = [1, 1]} : vector<16x128xf32> to vector<1x128xf32>
    %103 = vector.broadcast %102 : vector<1x128xf32> to vector<8x128xf32>
    %104 = arith.addf %101, %103 : vector<8x128xf32>
    %105 = arith.mulf %104, %104 : vector<8x128xf32>
    %106 = arith.mulf %104, %105 : vector<8x128xf32>
    %cst_37 = arith.constant 4.471500e-02 : f32
    %107 = vector.broadcast %cst_37 : f32 to vector<8x128xf32>
    %108 = arith.mulf %107, %106 : vector<8x128xf32>
    %109 = arith.addf %104, %108 : vector<8x128xf32>
    %cst_38 = arith.constant 0.797884583 : f32
    %110 = vector.broadcast %cst_38 : f32 to vector<8x128xf32>
    %111 = arith.mulf %110, %109 : vector<8x128xf32>
    %112 = math.tanh %111 : vector<8x128xf32>
    %cst_39 = arith.constant 1.000000e+00 : f32
    %113 = vector.broadcast %cst_39 : f32 to vector<8x128xf32>
    %114 = arith.addf %113, %112 : vector<8x128xf32>
    %cst_40 = arith.constant 5.000000e-01 : f32
    %115 = vector.broadcast %cst_40 : f32 to vector<8x128xf32>
    %116 = arith.mulf %115, %114 : vector<8x128xf32>
    %117 = arith.mulf %104, %116 : vector<8x128xf32>
    %118 = arith.truncf %117 : vector<8x128xf32> to vector<8x128xbf16>
    %c0_41 = arith.constant 0 : index
    %c0_42 = arith.constant 0 : index
    %c0_43 = arith.constant 0 : index
    %119 = vector.load %arg10[%c0_41, %c0_42, %c0_43] : memref<2x128x32xbf16, #tpu.memory_space<vmem>>, vector<1x128x32xbf16>
    %120 = vector.shape_cast %119 : vector<1x128x32xbf16> to vector<128x32xbf16>
    %cst_44 = arith.constant dense<0.000000e+00> : vector<8x32xf32>
    %121 = tpu.matmul %118, %120, %cst_44 {dimension_numbers = #tpu.dot_dimension_numbers<[1], [0], [0], [1], [0, 0, 1, 1], [], []>} : vector<8x128xbf16>, vector<128x32xbf16>, vector<8x32xf32> -> vector<8x32xf32>
    %122 = vector.extract_strided_slice %0 {offsets = [6, 0], sizes = [1, 32], strides = [1, 1]} : vector<16x128xf32> to vector<1x32xf32>
    %123 = vector.broadcast %122 : vector<1x32xf32> to vector<8x32xf32>
    %124 = arith.addf %121, %123 : vector<8x32xf32>
    %125 = arith.addf %97, %124 : vector<8x32xf32>
    %126 = vector.extract_strided_slice %0 {offsets = [7, 0], sizes = [1, 32], strides = [1, 1]} : vector<16x128xf32> to vector<1x32xf32>
    %127 = vector.extract_strided_slice %0 {offsets = [8, 0], sizes = [1, 32], strides = [1, 1]} : vector<16x128xf32> to vector<1x32xf32>
    %cst_45 = arith.constant dense<0.000000e+00> : vector<8xf32>
    %128 = vector.multi_reduction <add>, %125, %cst_45 [1] : vector<8x32xf32> to vector<8xf32>
    %129 = vector.shape_cast %128 : vector<8xf32> to vector<8x1xf32>
    %cst_46 = arith.constant 3.200000e+01 : f32
    %130 = vector.broadcast %cst_46 : f32 to vector<8x1xf32>
    %131 = arith.divf %129, %130 : vector<8x1xf32>
    %132 = vector.broadcast %131 : vector<8x1xf32> to vector<8x32xf32>
    %133 = arith.subf %125, %132 : vector<8x32xf32>
    %134 = arith.mulf %133, %133 : vector<8x32xf32>
    %cst_47 = arith.constant dense<0.000000e+00> : vector<8xf32>
    %135 = vector.multi_reduction <add>, %134, %cst_47 [1] : vector<8x32xf32> to vector<8xf32>
    %136 = vector.shape_cast %135 : vector<8xf32> to vector<8x1xf32>
    %cst_48 = arith.constant 3.200000e+01 : f32
    %137 = vector.broadcast %cst_48 : f32 to vector<8x1xf32>
    %138 = arith.divf %136, %137 : vector<8x1xf32>
    %139 = vector.broadcast %131 : vector<8x1xf32> to vector<8x32xf32>
    %140 = arith.subf %125, %139 : vector<8x32xf32>
    %cst_49 = arith.constant 9.99999996E-13 : f32
    %141 = vector.broadcast %cst_49 : f32 to vector<8x1xf32>
    %142 = arith.addf %138, %141 : vector<8x1xf32>
    %143 = math.rsqrt %142 : vector<8x1xf32>
    %144 = vector.broadcast %143 : vector<8x1xf32> to vector<8x32xf32>
    %145 = arith.mulf %140, %144 : vector<8x32xf32>
    %146 = vector.broadcast %126 : vector<1x32xf32> to vector<8x32xf32>
    %147 = arith.mulf %145, %146 : vector<8x32xf32>
    %148 = vector.broadcast %127 : vector<1x32xf32> to vector<8x32xf32>
    %149 = arith.addf %147, %148 : vector<8x32xf32>
    %150 = tpu.concatenate %149, %149, %149, %149 in 0 : vector<8x32xf32>, vector<8x32xf32>, vector<8x32xf32>, vector<8x32xf32> -> vector<32x32xf32>
    %151 = tpu.concatenate %150, %150, %150, %150 in 1 : vector<32x32xf32>, vector<32x32xf32>, vector<32x32xf32>, vector<32x32xf32> -> vector<32x128xf32>
    %152 = arith.mulf %151, %26 : vector<32x128xf32>
    %153 = arith.truncf %152 : vector<32x128xf32> to vector<32x128xbf16>
    %c1 = arith.constant 1 : index
    %c0_50 = arith.constant 0 : index
    %c0_51 = arith.constant 0 : index
    %154 = vector.load %arg6[%c1, %c0_50, %c0_51] : memref<2x128x24xbf16, #tpu.memory_space<vmem>>, vector<1x128x24xbf16>
    %155 = vector.shape_cast %154 : vector<1x128x24xbf16> to vector<128x24xbf16>
    %cst_52 = arith.constant dense<0.000000e+00> : vector<32x24xf32>
    %156 = tpu.matmul %153, %155, %cst_52 {dimension_numbers = #tpu.dot_dimension_numbers<[1], [0], [0], [1], [0, 0, 1, 1], [], []>} : vector<32x128xbf16>, vector<128x24xbf16>, vector<32x24xf32> -> vector<32x24xf32>
    %c1_53 = arith.constant 1 : index
    %c0_54 = arith.constant 0 : index
    %c0_55 = arith.constant 0 : index
    %157 = vector.load %arg7[%c1_53, %c0_54, %c0_55] : memref<2x32x24xf32, #tpu.memory_space<vmem>>, vector<1x32x24xf32>
    %158 = vector.shape_cast %157 : vector<1x32x24xf32> to vector<32x24xf32>
    %159 = arith.addf %156, %158 : vector<32x24xf32>
    %160 = vector.extract_strided_slice %159 {offsets = [0, 0], sizes = [32, 8], strides = [1, 1]} : vector<32x24xf32> to vector<32x8xf32>
    %cst_56 = arith.constant 0.353553385 : f32
    %161 = vector.broadcast %cst_56 : f32 to vector<32x8xf32>
    %162 = arith.mulf %160, %161 : vector<32x8xf32>
    %163 = arith.truncf %162 : vector<32x8xf32> to vector<32x8xbf16>
    %164 = vector.extract_strided_slice %159 {offsets = [0, 8], sizes = [32, 8], strides = [1, 1]} : vector<32x24xf32> to vector<32x8xf32>
    %165 = arith.truncf %164 : vector<32x8xf32> to vector<32x8xbf16>
    %166 = vector.extract_strided_slice %159 {offsets = [0, 16], sizes = [32, 8], strides = [1, 1]} : vector<32x24xf32> to vector<32x8xf32>
    %167 = arith.truncf %166 : vector<32x8xf32> to vector<32x8xbf16>
    %cst_57 = arith.constant dense<0.000000e+00> : vector<32x32xf32>
    %168 = tpu.matmul %163, %165, %cst_57 {dimension_numbers = #tpu.dot_dimension_numbers<[1], [1], [0], [0], [0, 0, 1, 0], [], []>} : vector<32x8xbf16>, vector<32x8xbf16>, vector<32x32xf32> -> vector<32x32xf32>
    %169 = arith.addf %168, %28 : vector<32x32xf32>
    %cst_58 = arith.constant dense<0xFF800000> : vector<32xf32>
    %170 = vector.multi_reduction <maximumf>, %169, %cst_58 [1] : vector<32x32xf32> to vector<32xf32>
    %171 = vector.shape_cast %170 : vector<32xf32> to vector<32x1xf32>
    %172 = vector.broadcast %171 : vector<32x1xf32> to vector<32x32xf32>
    %173 = arith.subf %169, %172 : vector<32x32xf32>
    %174 = math.exp %173 : vector<32x32xf32>
    %cst_59 = arith.constant dense<0.000000e+00> : vector<32xf32>
    %175 = vector.multi_reduction <add>, %174, %cst_59 [1] : vector<32x32xf32> to vector<32xf32>
    %176 = vector.shape_cast %175 : vector<32xf32> to vector<32x1xf32>
    %177 = tpu.reciprocal %176 {approx = true} : vector<32x1xf32> -> vector<32x1xf32>
    %178 = vector.broadcast %177 : vector<32x1xf32> to vector<32x32xf32>
    %179 = arith.mulf %174, %178 : vector<32x32xf32>
    %180 = arith.truncf %179 : vector<32x32xf32> to vector<32x32xbf16>
    %cst_60 = arith.constant dense<0.000000e+00> : vector<32x8xf32>
    %181 = tpu.matmul %180, %167, %cst_60 {dimension_numbers = #tpu.dot_dimension_numbers<[1], [0], [0], [1], [0, 0, 1, 1], [], []>} : vector<32x32xbf16>, vector<32x8xbf16>, vector<32x8xf32> -> vector<32x8xf32>
    %182 = vector.extract_strided_slice %181 {offsets = [0, 0], sizes = [8, 8], strides = [1, 1]} : vector<32x8xf32> to vector<8x8xf32>
    %183 = vector.extract_strided_slice %181 {offsets = [8, 0], sizes = [8, 8], strides = [1, 1]} : vector<32x8xf32> to vector<8x8xf32>
    %184 = vector.extract_strided_slice %181 {offsets = [16, 0], sizes = [8, 8], strides = [1, 1]} : vector<32x8xf32> to vector<8x8xf32>
    %185 = vector.extract_strided_slice %181 {offsets = [24, 0], sizes = [8, 8], strides = [1, 1]} : vector<32x8xf32> to vector<8x8xf32>
    %186 = tpu.concatenate %182, %183, %184, %185 in 1 : vector<8x8xf32>, vector<8x8xf32>, vector<8x8xf32>, vector<8x8xf32> -> vector<8x32xf32>
    %187 = arith.truncf %186 : vector<8x32xf32> to vector<8x32xbf16>
    %c1_61 = arith.constant 1 : index
    %c0_62 = arith.constant 0 : index
    %c0_63 = arith.constant 0 : index
    %188 = vector.load %arg8[%c1_61, %c0_62, %c0_63] : memref<2x32x32xbf16, #tpu.memory_space<vmem>>, vector<1x32x32xbf16>
    %189 = vector.shape_cast %188 : vector<1x32x32xbf16> to vector<32x32xbf16>
    %cst_64 = arith.constant dense<0.000000e+00> : vector<8x32xf32>
    %190 = tpu.matmul %187, %189, %cst_64 {dimension_numbers = #tpu.dot_dimension_numbers<[1], [0], [0], [1], [0, 0, 1, 1], [], []>} : vector<8x32xbf16>, vector<32x32xbf16>, vector<8x32xf32> -> vector<8x32xf32>
    %191 = vector.extract_strided_slice %0 {offsets = [9, 0], sizes = [1, 32], strides = [1, 1]} : vector<16x128xf32> to vector<1x32xf32>
    %192 = vector.broadcast %191 : vector<1x32xf32> to vector<8x32xf32>
    %193 = arith.addf %190, %192 : vector<8x32xf32>
    %194 = arith.addf %149, %193 : vector<8x32xf32>
    %195 = vector.extract_strided_slice %0 {offsets = [10, 0], sizes = [1, 32], strides = [1, 1]} : vector<16x128xf32> to vector<1x32xf32>
    %196 = vector.extract_strided_slice %0 {offsets = [11, 0], sizes = [1, 32], strides = [1, 1]} : vector<16x128xf32> to vector<1x32xf32>
    %cst_65 = arith.constant dense<0.000000e+00> : vector<8xf32>
    %197 = vector.multi_reduction <add>, %194, %cst_65 [1] : vector<8x32xf32> to vector<8xf32>
    %198 = vector.shape_cast %197 : vector<8xf32> to vector<8x1xf32>
    %cst_66 = arith.constant 3.200000e+01 : f32
    %199 = vector.broadcast %cst_66 : f32 to vector<8x1xf32>
    %200 = arith.divf %198, %199 : vector<8x1xf32>
    %201 = vector.broadcast %200 : vector<8x1xf32> to vector<8x32xf32>
    %202 = arith.subf %194, %201 : vector<8x32xf32>
    %203 = arith.mulf %202, %202 : vector<8x32xf32>
    %cst_67 = arith.constant dense<0.000000e+00> : vector<8xf32>
    %204 = vector.multi_reduction <add>, %203, %cst_67 [1] : vector<8x32xf32> to vector<8xf32>
    %205 = vector.shape_cast %204 : vector<8xf32> to vector<8x1xf32>
    %cst_68 = arith.constant 3.200000e+01 : f32
    %206 = vector.broadcast %cst_68 : f32 to vector<8x1xf32>
    %207 = arith.divf %205, %206 : vector<8x1xf32>
    %208 = vector.broadcast %200 : vector<8x1xf32> to vector<8x32xf32>
    %209 = arith.subf %194, %208 : vector<8x32xf32>
    %cst_69 = arith.constant 9.99999996E-13 : f32
    %210 = vector.broadcast %cst_69 : f32 to vector<8x1xf32>
    %211 = arith.addf %207, %210 : vector<8x1xf32>
    %212 = math.rsqrt %211 : vector<8x1xf32>
    %213 = vector.broadcast %212 : vector<8x1xf32> to vector<8x32xf32>
    %214 = arith.mulf %209, %213 : vector<8x32xf32>
    %215 = vector.broadcast %195 : vector<1x32xf32> to vector<8x32xf32>
    %216 = arith.mulf %214, %215 : vector<8x32xf32>
    %217 = vector.broadcast %196 : vector<1x32xf32> to vector<8x32xf32>
    %218 = arith.addf %216, %217 : vector<8x32xf32>
    %219 = arith.truncf %218 : vector<8x32xf32> to vector<8x32xbf16>
    %c1_70 = arith.constant 1 : index
    %c0_71 = arith.constant 0 : index
    %c0_72 = arith.constant 0 : index
    %220 = vector.load %arg9[%c1_70, %c0_71, %c0_72] : memref<2x32x128xbf16, #tpu.memory_space<vmem>>, vector<1x32x128xbf16>
    %221 = vector.shape_cast %220 : vector<1x32x128xbf16> to vector<32x128xbf16>
    %cst_73 = arith.constant dense<0.000000e+00> : vector<8x128xf32>
    %222 = tpu.matmul %219, %221, %cst_73 {dimension_numbers = #tpu.dot_dimension_numbers<[1], [0], [0], [1], [0, 0, 1, 1], [], []>} : vector<8x32xbf16>, vector<32x128xbf16>, vector<8x128xf32> -> vector<8x128xf32>
    %223 = vector.extract_strided_slice %0 {offsets = [12, 0], sizes = [1, 128], strides = [1, 1]} : vector<16x128xf32> to vector<1x128xf32>
    %224 = vector.broadcast %223 : vector<1x128xf32> to vector<8x128xf32>
    %225 = arith.addf %222, %224 : vector<8x128xf32>
    %226 = arith.mulf %225, %225 : vector<8x128xf32>
    %227 = arith.mulf %225, %226 : vector<8x128xf32>
    %cst_74 = arith.constant 4.471500e-02 : f32
    %228 = vector.broadcast %cst_74 : f32 to vector<8x128xf32>
    %229 = arith.mulf %228, %227 : vector<8x128xf32>
    %230 = arith.addf %225, %229 : vector<8x128xf32>
    %cst_75 = arith.constant 0.797884583 : f32
    %231 = vector.broadcast %cst_75 : f32 to vector<8x128xf32>
    %232 = arith.mulf %231, %230 : vector<8x128xf32>
    %233 = math.tanh %232 : vector<8x128xf32>
    %cst_76 = arith.constant 1.000000e+00 : f32
    %234 = vector.broadcast %cst_76 : f32 to vector<8x128xf32>
    %235 = arith.addf %234, %233 : vector<8x128xf32>
    %cst_77 = arith.constant 5.000000e-01 : f32
    %236 = vector.broadcast %cst_77 : f32 to vector<8x128xf32>
    %237 = arith.mulf %236, %235 : vector<8x128xf32>
    %238 = arith.mulf %225, %237 : vector<8x128xf32>
    %239 = arith.truncf %238 : vector<8x128xf32> to vector<8x128xbf16>
    %c1_78 = arith.constant 1 : index
    %c0_79 = arith.constant 0 : index
    %c0_80 = arith.constant 0 : index
    %240 = vector.load %arg10[%c1_78, %c0_79, %c0_80] : memref<2x128x32xbf16, #tpu.memory_space<vmem>>, vector<1x128x32xbf16>
    %241 = vector.shape_cast %240 : vector<1x128x32xbf16> to vector<128x32xbf16>
    %cst_81 = arith.constant dense<0.000000e+00> : vector<8x32xf32>
    %242 = tpu.matmul %239, %241, %cst_81 {dimension_numbers = #tpu.dot_dimension_numbers<[1], [0], [0], [1], [0, 0, 1, 1], [], []>} : vector<8x128xbf16>, vector<128x32xbf16>, vector<8x32xf32> -> vector<8x32xf32>
    %243 = vector.extract_strided_slice %0 {offsets = [13, 0], sizes = [1, 32], strides = [1, 1]} : vector<16x128xf32> to vector<1x32xf32>
    %244 = vector.broadcast %243 : vector<1x32xf32> to vector<8x32xf32>
    %245 = arith.addf %242, %244 : vector<8x32xf32>
    %246 = arith.addf %218, %245 : vector<8x32xf32>
    %247 = vector.extract_strided_slice %0 {offsets = [14, 0], sizes = [1, 32], strides = [1, 1]} : vector<16x128xf32> to vector<1x32xf32>
    %248 = vector.extract_strided_slice %0 {offsets = [15, 0], sizes = [1, 32], strides = [1, 1]} : vector<16x128xf32> to vector<1x32xf32>
    %cst_82 = arith.constant dense<0.000000e+00> : vector<8xf32>
    %249 = vector.multi_reduction <add>, %246, %cst_82 [1] : vector<8x32xf32> to vector<8xf32>
    %250 = vector.shape_cast %249 : vector<8xf32> to vector<8x1xf32>
    %cst_83 = arith.constant 3.200000e+01 : f32
    %251 = vector.broadcast %cst_83 : f32 to vector<8x1xf32>
    %252 = arith.divf %250, %251 : vector<8x1xf32>
    %253 = vector.broadcast %252 : vector<8x1xf32> to vector<8x32xf32>
    %254 = arith.subf %246, %253 : vector<8x32xf32>
    %255 = arith.mulf %254, %254 : vector<8x32xf32>
    %cst_84 = arith.constant dense<0.000000e+00> : vector<8xf32>
    %256 = vector.multi_reduction <add>, %255, %cst_84 [1] : vector<8x32xf32> to vector<8xf32>
    %257 = vector.shape_cast %256 : vector<8xf32> to vector<8x1xf32>
    %cst_85 = arith.constant 3.200000e+01 : f32
    %258 = vector.broadcast %cst_85 : f32 to vector<8x1xf32>
    %259 = arith.divf %257, %258 : vector<8x1xf32>
    %260 = vector.broadcast %252 : vector<8x1xf32> to vector<8x32xf32>
    %261 = arith.subf %246, %260 : vector<8x32xf32>
    %cst_86 = arith.constant 9.99999996E-13 : f32
    %262 = vector.broadcast %cst_86 : f32 to vector<8x1xf32>
    %263 = arith.addf %259, %262 : vector<8x1xf32>
    %264 = math.rsqrt %263 : vector<8x1xf32>
    %265 = vector.broadcast %264 : vector<8x1xf32> to vector<8x32xf32>
    %266 = arith.mulf %261, %265 : vector<8x32xf32>
    %267 = vector.broadcast %247 : vector<1x32xf32> to vector<8x32xf32>
    %268 = arith.mulf %266, %267 : vector<8x32xf32>
    %269 = vector.broadcast %248 : vector<1x32xf32> to vector<8x32xf32>
    %270 = arith.addf %268, %269 : vector<8x32xf32>
    %271 = vector.extract_strided_slice %270 {offsets = [0, 0], sizes = [1, 32], strides = [1, 1]} : vector<8x32xf32> to vector<1x32xf32>
    %c0_87 = arith.constant 0 : index
    %c0_88 = arith.constant 0 : index
    %272 = vector.load %arg15[%c0_87, %c0_88] : memref<8x128xf32, #tpu.memory_space<vmem>>, vector<8x128xf32>
    %c0_89 = arith.constant 0 : index
    %c0_90 = arith.constant 0 : index
    %273 = vector.load %arg14[%c0_89, %c0_90] : memref<336x64xbf16, #tpu.memory_space<vmem>>, vector<336x64xbf16>
    %c0_91 = arith.constant 0 : index
    %c0_92 = arith.constant 0 : index
    %274 = vector.load %arg13[%c0_91, %c0_92] : memref<192x16xbf16, #tpu.memory_space<vmem>>, vector<192x16xbf16>
    %c0_93 = arith.constant 0 : index
    %c0_94 = arith.constant 0 : index
    %275 = vector.load %arg3[%c0_93, %c0_94] : memref<64x256xbf16, #tpu.memory_space<vmem>>, vector<64x256xbf16>
    %c0_95 = arith.constant 0 : index
    %c0_96 = arith.constant 0 : index
    %276 = vector.load %arg11[%c0_95, %c0_96] : memref<256x16xbf16, #tpu.memory_space<vmem>>, vector<256x16xbf16>
    %cst_97 = arith.constant dense<0.000000e+00> : vector<64x16xf32>
    %277 = tpu.matmul %275, %276, %cst_97 {dimension_numbers = #tpu.dot_dimension_numbers<[1], [0], [0], [1], [0, 0, 1, 1], [], []>} : vector<64x256xbf16>, vector<256x16xbf16>, vector<64x16xf32> -> vector<64x16xf32>
    %278 = vector.extract_strided_slice %272 {offsets = [0, 0], sizes = [1, 16], strides = [1, 1]} : vector<8x128xf32> to vector<1x16xf32>
    %279 = vector.broadcast %278 : vector<1x16xf32> to vector<64x16xf32>
    %280 = arith.addf %277, %279 : vector<64x16xf32>
    %cst_98 = arith.constant 0.000000e+00 : f32
    %281 = vector.broadcast %cst_98 : f32 to vector<64x16xf32>
    %282 = arith.maximumf %280, %281 : vector<64x16xf32>
    %c0_99 = arith.constant 0 : index
    %c0_100 = arith.constant 0 : index
    %283 = vector.load %arg12[%c0_99, %c0_100] : memref<144x64xbf16, #tpu.memory_space<vmem>>, vector<144x64xbf16>
    %284 = arith.truncf %282 : vector<64x16xf32> to vector<64x16xbf16>
    %cst_101 = arith.constant dense<0.000000e+00> : vector<144x16xf32>
    %285 = tpu.matmul %283, %284, %cst_101 {dimension_numbers = #tpu.dot_dimension_numbers<[1], [0], [0], [1], [0, 0, 1, 1], [], []>} : vector<144x64xbf16>, vector<64x16xbf16>, vector<144x16xf32> -> vector<144x16xf32>
    %286 = vector.extract_strided_slice %285 {offsets = [0, 0], sizes = [16, 16], strides = [1, 1]} : vector<144x16xf32> to vector<16x16xf32>
    %287 = vector.extract_strided_slice %285 {offsets = [16, 0], sizes = [16, 16], strides = [1, 1]} : vector<144x16xf32> to vector<16x16xf32>
    %288 = arith.maximumf %286, %287 : vector<16x16xf32>
    %289 = vector.extract_strided_slice %285 {offsets = [32, 0], sizes = [16, 16], strides = [1, 1]} : vector<144x16xf32> to vector<16x16xf32>
    %290 = arith.maximumf %288, %289 : vector<16x16xf32>
    %291 = vector.extract_strided_slice %285 {offsets = [48, 0], sizes = [16, 16], strides = [1, 1]} : vector<144x16xf32> to vector<16x16xf32>
    %292 = arith.maximumf %290, %291 : vector<16x16xf32>
    %293 = vector.extract_strided_slice %285 {offsets = [64, 0], sizes = [16, 16], strides = [1, 1]} : vector<144x16xf32> to vector<16x16xf32>
    %294 = arith.maximumf %292, %293 : vector<16x16xf32>
    %295 = vector.extract_strided_slice %285 {offsets = [80, 0], sizes = [16, 16], strides = [1, 1]} : vector<144x16xf32> to vector<16x16xf32>
    %296 = arith.maximumf %294, %295 : vector<16x16xf32>
    %297 = vector.extract_strided_slice %285 {offsets = [96, 0], sizes = [16, 16], strides = [1, 1]} : vector<144x16xf32> to vector<16x16xf32>
    %298 = arith.maximumf %296, %297 : vector<16x16xf32>
    %299 = vector.extract_strided_slice %285 {offsets = [112, 0], sizes = [16, 16], strides = [1, 1]} : vector<144x16xf32> to vector<16x16xf32>
    %300 = arith.maximumf %298, %299 : vector<16x16xf32>
    %301 = vector.extract_strided_slice %285 {offsets = [128, 0], sizes = [16, 16], strides = [1, 1]} : vector<144x16xf32> to vector<16x16xf32>
    %302 = arith.maximumf %300, %301 : vector<16x16xf32>
    %303 = arith.truncf %302 : vector<16x16xf32> to vector<16x16xbf16>
    %304 = vector.extract_strided_slice %273 {offsets = [0, 0], sizes = [16, 8], strides = [1, 1]} : vector<336x64xbf16> to vector<16x8xbf16>
    %cst_102 = arith.constant dense<0.000000e+00> : vector<16x8xf32>
    %305 = tpu.matmul %303, %304, %cst_102 {dimension_numbers = #tpu.dot_dimension_numbers<[1], [0], [0], [1], [0, 0, 1, 1], [], []>} : vector<16x16xbf16>, vector<16x8xbf16>, vector<16x8xf32> -> vector<16x8xf32>
    %306 = vector.extract_strided_slice %272 {offsets = [1, 0], sizes = [1, 8], strides = [1, 1]} : vector<8x128xf32> to vector<1x8xf32>
    %307 = vector.broadcast %306 : vector<1x8xf32> to vector<16x8xf32>
    %308 = arith.addf %305, %307 : vector<16x8xf32>
    %cst_103 = arith.constant 0.000000e+00 : f32
    %309 = vector.broadcast %cst_103 : f32 to vector<16x8xf32>
    %310 = arith.maximumf %308, %309 : vector<16x8xf32>
    %311 = arith.truncf %310 : vector<16x8xf32> to vector<16x8xbf16>
    %312 = vector.extract_strided_slice %274 {offsets = [0, 0], sizes = [144, 16], strides = [1, 1]} : vector<192x16xbf16> to vector<144x16xbf16>
    %cst_104 = arith.constant dense<0.000000e+00> : vector<144x8xf32>
    %313 = tpu.matmul %312, %311, %cst_104 {dimension_numbers = #tpu.dot_dimension_numbers<[1], [0], [0], [1], [0, 0, 1, 1], [], []>} : vector<144x16xbf16>, vector<16x8xbf16>, vector<144x8xf32> -> vector<144x8xf32>
    %314 = vector.extract_strided_slice %313 {offsets = [0, 0], sizes = [16, 8], strides = [1, 1]} : vector<144x8xf32> to vector<16x8xf32>
    %315 = vector.extract_strided_slice %313 {offsets = [16, 0], sizes = [16, 8], strides = [1, 1]} : vector<144x8xf32> to vector<16x8xf32>
    %316 = vector.extract_strided_slice %313 {offsets = [32, 0], sizes = [16, 8], strides = [1, 1]} : vector<144x8xf32> to vector<16x8xf32>
    %317 = vector.extract_strided_slice %313 {offsets = [48, 0], sizes = [16, 8], strides = [1, 1]} : vector<144x8xf32> to vector<16x8xf32>
    %318 = vector.extract_strided_slice %313 {offsets = [64, 0], sizes = [16, 8], strides = [1, 1]} : vector<144x8xf32> to vector<16x8xf32>
    %319 = vector.extract_strided_slice %313 {offsets = [80, 0], sizes = [16, 8], strides = [1, 1]} : vector<144x8xf32> to vector<16x8xf32>
    %320 = vector.extract_strided_slice %313 {offsets = [96, 0], sizes = [16, 8], strides = [1, 1]} : vector<144x8xf32> to vector<16x8xf32>
    %321 = vector.extract_strided_slice %313 {offsets = [112, 0], sizes = [16, 8], strides = [1, 1]} : vector<144x8xf32> to vector<16x8xf32>
    %322 = vector.extract_strided_slice %313 {offsets = [128, 0], sizes = [16, 8], strides = [1, 1]} : vector<144x8xf32> to vector<16x8xf32>
    %323 = tpu.concatenate %314, %315, %316, %317, %318, %319, %320, %321, %322 in 1 : vector<16x8xf32>, vector<16x8xf32>, vector<16x8xf32>, vector<16x8xf32>, vector<16x8xf32>, vector<16x8xf32>, vector<16x8xf32>, vector<16x8xf32>, vector<16x8xf32> -> vector<16x72xf32>
    %324 = arith.truncf %323 : vector<16x72xf32> to vector<16x72xbf16>
    %325 = vector.extract_strided_slice %273 {offsets = [16, 0], sizes = [72, 8], strides = [1, 1]} : vector<336x64xbf16> to vector<72x8xbf16>
    %cst_105 = arith.constant dense<0.000000e+00> : vector<16x8xf32>
    %326 = tpu.matmul %324, %325, %cst_105 {dimension_numbers = #tpu.dot_dimension_numbers<[1], [0], [0], [1], [0, 0, 1, 1], [], []>} : vector<16x72xbf16>, vector<72x8xbf16>, vector<16x8xf32> -> vector<16x8xf32>
    %327 = vector.extract_strided_slice %272 {offsets = [2, 0], sizes = [1, 8], strides = [1, 1]} : vector<8x128xf32> to vector<1x8xf32>
    %328 = vector.broadcast %327 : vector<1x8xf32> to vector<16x8xf32>
    %329 = arith.addf %326, %328 : vector<16x8xf32>
    %cst_106 = arith.constant 0.000000e+00 : f32
    %330 = vector.broadcast %cst_106 : f32 to vector<16x8xf32>
    %331 = arith.maximumf %329, %330 : vector<16x8xf32>
    %332 = tpu.concatenate %331, %302 in 1 : vector<16x8xf32>, vector<16x16xf32> -> vector<16x24xf32>
    %333 = arith.truncf %332 : vector<16x24xf32> to vector<16x24xbf16>
    %334 = vector.extract_strided_slice %273 {offsets = [88, 0], sizes = [24, 32], strides = [1, 1]} : vector<336x64xbf16> to vector<24x32xbf16>
    %cst_107 = arith.constant dense<0.000000e+00> : vector<16x32xf32>
    %335 = tpu.matmul %333, %334, %cst_107 {dimension_numbers = #tpu.dot_dimension_numbers<[1], [0], [0], [1], [0, 0, 1, 1], [], []>} : vector<16x24xbf16>, vector<24x32xbf16>, vector<16x32xf32> -> vector<16x32xf32>
    %336 = vector.extract_strided_slice %272 {offsets = [3, 0], sizes = [1, 32], strides = [1, 1]} : vector<8x128xf32> to vector<1x32xf32>
    %337 = vector.broadcast %336 : vector<1x32xf32> to vector<16x32xf32>
    %338 = arith.addf %335, %337 : vector<16x32xf32>
    %cst_108 = arith.constant 0.000000e+00 : f32
    %339 = vector.broadcast %cst_108 : f32 to vector<16x32xf32>
    %340 = arith.maximumf %338, %339 : vector<16x32xf32>
    %341 = arith.truncf %340 : vector<16x32xf32> to vector<16x32xbf16>
    %342 = vector.extract_strided_slice %273 {offsets = [112, 0], sizes = [32, 16], strides = [1, 1]} : vector<336x64xbf16> to vector<32x16xbf16>
    %cst_109 = arith.constant dense<0.000000e+00> : vector<16x16xf32>
    %343 = tpu.matmul %341, %342, %cst_109 {dimension_numbers = #tpu.dot_dimension_numbers<[1], [0], [0], [1], [0, 0, 1, 1], [], []>} : vector<16x32xbf16>, vector<32x16xbf16>, vector<16x16xf32> -> vector<16x16xf32>
    %344 = vector.extract_strided_slice %272 {offsets = [4, 0], sizes = [1, 16], strides = [1, 1]} : vector<8x128xf32> to vector<1x16xf32>
    %345 = vector.broadcast %344 : vector<1x16xf32> to vector<16x16xf32>
    %346 = arith.addf %343, %345 : vector<16x16xf32>
    %cst_110 = arith.constant 0.000000e+00 : f32
    %347 = vector.broadcast %cst_110 : f32 to vector<16x16xf32>
    %348 = arith.maximumf %346, %347 : vector<16x16xf32>
    %349 = arith.truncf %348 : vector<16x16xf32> to vector<16x16xbf16>
    %350 = vector.extract_strided_slice %274 {offsets = [144, 0], sizes = [40, 16], strides = [1, 1]} : vector<192x16xbf16> to vector<40x16xbf16>
    %cst_111 = arith.constant dense<0.000000e+00> : vector<40x16xf32>
    %351 = tpu.matmul %350, %349, %cst_111 {dimension_numbers = #tpu.dot_dimension_numbers<[1], [0], [0], [1], [0, 0, 1, 1], [], []>} : vector<40x16xbf16>, vector<16x16xbf16>, vector<40x16xf32> -> vector<40x16xf32>
    %352 = vector.extract_strided_slice %351 {offsets = [0, 0], sizes = [4, 16], strides = [1, 1]} : vector<40x16xf32> to vector<4x16xf32>
    %353 = vector.extract_strided_slice %351 {offsets = [4, 0], sizes = [4, 16], strides = [1, 1]} : vector<40x16xf32> to vector<4x16xf32>
    %354 = vector.extract_strided_slice %351 {offsets = [8, 0], sizes = [4, 16], strides = [1, 1]} : vector<40x16xf32> to vector<4x16xf32>
    %355 = vector.extract_strided_slice %351 {offsets = [12, 0], sizes = [4, 16], strides = [1, 1]} : vector<40x16xf32> to vector<4x16xf32>
    %356 = vector.extract_strided_slice %351 {offsets = [16, 0], sizes = [4, 16], strides = [1, 1]} : vector<40x16xf32> to vector<4x16xf32>
    %357 = vector.extract_strided_slice %351 {offsets = [20, 0], sizes = [4, 16], strides = [1, 1]} : vector<40x16xf32> to vector<4x16xf32>
    %358 = vector.extract_strided_slice %351 {offsets = [24, 0], sizes = [4, 16], strides = [1, 1]} : vector<40x16xf32> to vector<4x16xf32>
    %359 = vector.extract_strided_slice %351 {offsets = [28, 0], sizes = [4, 16], strides = [1, 1]} : vector<40x16xf32> to vector<4x16xf32>
    %360 = vector.extract_strided_slice %351 {offsets = [32, 0], sizes = [4, 16], strides = [1, 1]} : vector<40x16xf32> to vector<4x16xf32>
    %361 = tpu.concatenate %352, %353, %354, %355, %356, %357, %358, %359, %360 in 1 : vector<4x16xf32>, vector<4x16xf32>, vector<4x16xf32>, vector<4x16xf32>, vector<4x16xf32>, vector<4x16xf32>, vector<4x16xf32>, vector<4x16xf32>, vector<4x16xf32> -> vector<4x144xf32>
    %362 = arith.truncf %361 : vector<4x144xf32> to vector<4x144xbf16>
    %363 = vector.extract_strided_slice %273 {offsets = [144, 0], sizes = [144, 16], strides = [1, 1]} : vector<336x64xbf16> to vector<144x16xbf16>
    %cst_112 = arith.constant dense<0.000000e+00> : vector<4x16xf32>
    %364 = tpu.matmul %362, %363, %cst_112 {dimension_numbers = #tpu.dot_dimension_numbers<[1], [0], [0], [1], [0, 0, 1, 1], [], []>} : vector<4x144xbf16>, vector<144x16xbf16>, vector<4x16xf32> -> vector<4x16xf32>
    %365 = vector.extract_strided_slice %272 {offsets = [5, 0], sizes = [1, 16], strides = [1, 1]} : vector<8x128xf32> to vector<1x16xf32>
    %366 = vector.broadcast %365 : vector<1x16xf32> to vector<4x16xf32>
    %367 = arith.addf %364, %366 : vector<4x16xf32>
    %cst_113 = arith.constant 0.000000e+00 : f32
    %368 = vector.broadcast %cst_113 : f32 to vector<4x16xf32>
    %369 = arith.maximumf %367, %368 : vector<4x16xf32>
    %370 = vector.extract_strided_slice %274 {offsets = [184, 0], sizes = [8, 16], strides = [1, 1]} : vector<192x16xbf16> to vector<8x16xbf16>
    %cst_114 = arith.constant dense<0.000000e+00> : vector<8x32xf32>
    %371 = tpu.matmul %370, %341, %cst_114 {dimension_numbers = #tpu.dot_dimension_numbers<[1], [0], [0], [1], [0, 0, 1, 1], [], []>} : vector<8x16xbf16>, vector<16x32xbf16>, vector<8x32xf32> -> vector<8x32xf32>
    %372 = vector.extract_strided_slice %371 {offsets = [0, 0], sizes = [4, 32], strides = [1, 1]} : vector<8x32xf32> to vector<4x32xf32>
    %373 = tpu.concatenate %369, %372 in 1 : vector<4x16xf32>, vector<4x32xf32> -> vector<4x48xf32>
    %374 = arith.truncf %373 : vector<4x48xf32> to vector<4x48xbf16>
    %375 = vector.extract_strided_slice %273 {offsets = [288, 0], sizes = [48, 64], strides = [1, 1]} : vector<336x64xbf16> to vector<48x64xbf16>
    %cst_115 = arith.constant dense<0.000000e+00> : vector<4x64xf32>
    %376 = tpu.matmul %374, %375, %cst_115 {dimension_numbers = #tpu.dot_dimension_numbers<[1], [0], [0], [1], [0, 0, 1, 1], [], []>} : vector<4x48xbf16>, vector<48x64xbf16>, vector<4x64xf32> -> vector<4x64xf32>
    %377 = vector.extract_strided_slice %272 {offsets = [6, 0], sizes = [1, 64], strides = [1, 1]} : vector<8x128xf32> to vector<1x64xf32>
    %378 = vector.broadcast %377 : vector<1x64xf32> to vector<4x64xf32>
    %379 = arith.addf %376, %378 : vector<4x64xf32>
    %cst_116 = arith.constant 0.000000e+00 : f32
    %380 = vector.broadcast %cst_116 : f32 to vector<4x64xf32>
    %381 = arith.maximumf %379, %380 : vector<4x64xf32>
    %cst_117 = arith.constant dense<0.000000e+00> : vector<64xf32>
    %382 = vector.multi_reduction <add>, %381, %cst_117 [0] : vector<4x64xf32> to vector<64xf32>
    %383 = vector.shape_cast %382 : vector<64xf32> to vector<1x64xf32>
    %cst_118 = arith.constant 4.000000e+00 : f32
    %384 = vector.broadcast %cst_118 : f32 to vector<1x64xf32>
    %385 = arith.divf %383, %384 : vector<1x64xf32>
    %386 = vector.shape_cast %385 : vector<1x64xf32> to vector<1x64xf32>
    %387 = vector.broadcast %386 : vector<1x64xf32> to vector<8x64xf32>
    %388 = vector.shape_cast %271 : vector<1x32xf32> to vector<1x32xf32>
    %389 = vector.broadcast %388 : vector<1x32xf32> to vector<8x32xf32>
    %390 = tpu.concatenate %389, %387 in 1 : vector<8x32xf32>, vector<8x64xf32> -> vector<8x96xf32>
    %391 = arith.truncf %390 : vector<8x96xf32> to vector<8x96xbf16>
    %c0_119 = arith.constant 0 : index
    %c0_120 = arith.constant 0 : index
    %392 = vector.load %arg17[%c0_119, %c0_120] : memref<2x512xf32, #tpu.memory_space<vmem>>, vector<2x512xf32>
    %c0_121 = arith.constant 0 : index
    %c0_122 = arith.constant 0 : index
    %393 = vector.load %arg16[%c0_121, %c0_122] : memref<96x512xbf16, #tpu.memory_space<vmem>>, vector<96x512xbf16>
    %cst_123 = arith.constant dense<0.000000e+00> : vector<8x512xf32>
    %394 = tpu.matmul %391, %393, %cst_123 {dimension_numbers = #tpu.dot_dimension_numbers<[1], [0], [0], [1], [0, 0, 1, 1], [], []>} : vector<8x96xbf16>, vector<96x512xbf16>, vector<8x512xf32> -> vector<8x512xf32>
    %395 = vector.extract_strided_slice %392 {offsets = [0, 0], sizes = [1, 512], strides = [1, 1]} : vector<2x512xf32> to vector<1x512xf32>
    %396 = vector.broadcast %395 : vector<1x512xf32> to vector<8x512xf32>
    %397 = arith.addf %394, %396 : vector<8x512xf32>
    %cst_124 = arith.constant 0.000000e+00 : f32
    %398 = vector.broadcast %cst_124 : f32 to vector<8x512xf32>
    %399 = arith.maximumf %397, %398 : vector<8x512xf32>
    %400 = arith.truncf %399 : vector<8x512xf32> to vector<8x512xbf16>
    %c0_125 = arith.constant 0 : index
    %c0_126 = arith.constant 0 : index
    %401 = vector.load %arg18[%c0_125, %c0_126] : memref<512x128xbf16, #tpu.memory_space<vmem>>, vector<512x128xbf16>
    %cst_127 = arith.constant dense<0.000000e+00> : vector<8x128xf32>
    %402 = tpu.matmul %400, %401, %cst_127 {dimension_numbers = #tpu.dot_dimension_numbers<[1], [0], [0], [1], [0, 0, 1, 1], [], []>} : vector<8x512xbf16>, vector<512x128xbf16>, vector<8x128xf32> -> vector<8x128xf32>
    %403 = vector.extract_strided_slice %392 {offsets = [1, 0], sizes = [1, 128], strides = [1, 1]} : vector<2x512xf32> to vector<1x128xf32>
    %404 = vector.broadcast %403 : vector<1x128xf32> to vector<8x128xf32>
    %405 = arith.addf %402, %404 : vector<8x128xf32>
    %c0_128 = arith.constant 0 : index
    %c0_129 = arith.constant 0 : index
    %c0_130 = arith.constant 0 : index
    %406 = vector.load %arg19[%c0_128, %c0_129, %c0_130] : memref<1x8x128xf32, #tpu.memory_space<vmem>>, vector<1x8x128xf32>
    %407 = vector.shape_cast %406 : vector<1x8x128xf32> to vector<8x128xf32>
    %408 = vector.shape_cast %405 : vector<8x128xf32> to vector<1x8x128xf32>
    tpu.vector_store %arg19[%c0_128, %c0_129, %c0_130], %408 {strides = array<i32>} : memref<1x8x128xf32, #tpu.memory_space<vmem>>, vector<1x8x128xf32>,
    return
  }
  func.func @transform_0(%arg0: i32) -> (i32, i32) {
    %c0_i32 = arith.constant 0 : i32
    %c0_i32_0 = arith.constant 0 : i32
    return %arg0, %c0_i32 : i32, i32
  }
  func.func @transform_1(%arg0: i32) -> (i32, i32, i32) {
    %c0_i32 = arith.constant 0 : i32
    %c0_i32_0 = arith.constant 0 : i32
    %c0_i32_1 = arith.constant 0 : i32
    return %arg0, %c0_i32, %c0_i32_0 : i32, i32, i32
  }
  func.func @transform_2(%arg0: i32) -> (i32, i32) {
    %c0_i32 = arith.constant 0 : i32
    %c0_i32_0 = arith.constant 0 : i32
    return %arg0, %c0_i32 : i32, i32
  }
  func.func @transform_3(%arg0: i32) -> (i32, i32) {
    %c0_i32 = arith.constant 0 : i32
    %c0_i32_0 = arith.constant 0 : i32
    %c0_i32_1 = arith.constant 0 : i32
    return %c0_i32, %c0_i32_0 : i32, i32
  }
  func.func @transform_4(%arg0: i32) -> (i32, i32) {
    %c0_i32 = arith.constant 0 : i32
    %c0_i32_0 = arith.constant 0 : i32
    %c0_i32_1 = arith.constant 0 : i32
    return %c0_i32, %c0_i32_0 : i32, i32
  }
  func.func @transform_5(%arg0: i32) -> (i32, i32, i32) {
    %c0_i32 = arith.constant 0 : i32
    %c0_i32_0 = arith.constant 0 : i32
    %c0_i32_1 = arith.constant 0 : i32
    %c0_i32_2 = arith.constant 0 : i32
    return %c0_i32, %c0_i32_0, %c0_i32_1 : i32, i32, i32
  }
  func.func @transform_6(%arg0: i32) -> (i32, i32, i32) {
    %c0_i32 = arith.constant 0 : i32
    %c0_i32_0 = arith.constant 0 : i32
    %c0_i32_1 = arith.constant 0 : i32
    %c0_i32_2 = arith.constant 0 : i32
    return %c0_i32, %c0_i32_0, %c0_i32_1 : i32, i32, i32
  }
  func.func @transform_7(%arg0: i32) -> (i32, i32, i32) {
    %c0_i32 = arith.constant 0 : i32
    %c0_i32_0 = arith.constant 0 : i32
    %c0_i32_1 = arith.constant 0 : i32
    %c0_i32_2 = arith.constant 0 : i32
    return %c0_i32, %c0_i32_0, %c0_i32_1 : i32, i32, i32
  }
  func.func @transform_8(%arg0: i32) -> (i32, i32, i32) {
    %c0_i32 = arith.constant 0 : i32
    %c0_i32_0 = arith.constant 0 : i32
    %c0_i32_1 = arith.constant 0 : i32
    %c0_i32_2 = arith.constant 0 : i32
    return %c0_i32, %c0_i32_0, %c0_i32_1 : i32, i32, i32
  }
  func.func @transform_9(%arg0: i32) -> (i32, i32, i32) {
    %c0_i32 = arith.constant 0 : i32
    %c0_i32_0 = arith.constant 0 : i32
    %c0_i32_1 = arith.constant 0 : i32
    %c0_i32_2 = arith.constant 0 : i32
    return %c0_i32, %c0_i32_0, %c0_i32_1 : i32, i32, i32
  }
  func.func @transform_10(%arg0: i32) -> (i32, i32) {
    %c0_i32 = arith.constant 0 : i32
    %c0_i32_0 = arith.constant 0 : i32
    %c0_i32_1 = arith.constant 0 : i32
    return %c0_i32, %c0_i32_0 : i32, i32
  }
  func.func @transform_11(%arg0: i32) -> (i32, i32) {
    %c0_i32 = arith.constant 0 : i32
    %c0_i32_0 = arith.constant 0 : i32
    %c0_i32_1 = arith.constant 0 : i32
    return %c0_i32, %c0_i32_0 : i32, i32
  }
  func.func @transform_12(%arg0: i32) -> (i32, i32) {
    %c0_i32 = arith.constant 0 : i32
    %c0_i32_0 = arith.constant 0 : i32
    %c0_i32_1 = arith.constant 0 : i32
    return %c0_i32, %c0_i32_0 : i32, i32
  }
  func.func @transform_13(%arg0: i32) -> (i32, i32) {
    %c0_i32 = arith.constant 0 : i32
    %c0_i32_0 = arith.constant 0 : i32
    %c0_i32_1 = arith.constant 0 : i32
    return %c0_i32, %c0_i32_0 : i32, i32
  }
  func.func @transform_14(%arg0: i32) -> (i32, i32) {
    %c0_i32 = arith.constant 0 : i32
    %c0_i32_0 = arith.constant 0 : i32
    %c0_i32_1 = arith.constant 0 : i32
    return %c0_i32, %c0_i32_0 : i32, i32
  }
  func.func @transform_15(%arg0: i32) -> (i32, i32) {
    %c0_i32 = arith.constant 0 : i32
    %c0_i32_0 = arith.constant 0 : i32
    %c0_i32_1 = arith.constant 0 : i32
    return %c0_i32, %c0_i32_0 : i32, i32
  }
  func.func @transform_16(%arg0: i32) -> (i32, i32) {
    %c0_i32 = arith.constant 0 : i32
    %c0_i32_0 = arith.constant 0 : i32
    %c0_i32_1 = arith.constant 0 : i32
    return %c0_i32, %c0_i32_0 : i32, i32
  }
  func.func @transform_17(%arg0: i32) -> (i32, i32) {
    %c0_i32 = arith.constant 0 : i32
    %c0_i32_0 = arith.constant 0 : i32
    %c0_i32_1 = arith.constant 0 : i32
    return %c0_i32, %c0_i32_0 : i32, i32
  }
  func.func @transform_18(%arg0: i32) -> (i32, i32, i32) {
    %c0_i32 = arith.constant 0 : i32
    %c0_i32_0 = arith.constant 0 : i32
    %c0_i32_1 = arith.constant 0 : i32
    return %arg0, %c0_i32, %c0_i32_0 : i32, i32, i32
  }
}

</mosaic_0001>

<bundles_post_ra>
// kernel: damage_net_forward.1
= control target key start
LH: loop header
LB: loop body
LE: loop exit
PB: predicated region body
PF: predicated region fallthrough
CT: control target
= control target key end

     0   :  { %s5209_s27 = smov 0   ;;  %s6226_s0 = inlined_call_operand.vmem [shape: f32[16,32], index: 0, kind: input, shape index: {}]   ;;  %s6227_s1 = inlined_call_operand.vmem [shape: f32[2,32,32], index: 1, kind: input, shape index: {}]   ;;  %s6228_s2 = inlined_call_operand.vmem [shape: bf16[128,256], index: 2, kind: input, shape index: {}]   ;;  %s6229_s3 = inlined_call_operand.vmem [shape: f32[16,128], index: 3, kind: input, shape index: {}]   ;;  %s6230_s4 = inlined_call_operand.vmem [shape: f32[32,128], index: 4, kind: input, shape index: {}]   ;;  %s6231_s5 = inlined_call_operand.vmem [shape: bf16[2,128,24], index: 5, kind: input, shape index: {}]   ;;  %s6232_s6 = inlined_call_operand.vmem [shape: f32[2,32,24], index: 6, kind: input, shape index: {}]   ;;  %s6233_s7 = inlined_call_operand.vmem [shape: bf16[2,32,32], index: 7, kind: input, shape index: {}]   ;;  %s6234_s8 = inlined_call_operand.vmem [shape: bf16[2,32,128], index: 8, kind: input, shape index: {}]   ;;  %s6235_s9 = inlined_call_operand.vmem [shape: bf16[2,128,32], index: 9, kind: input, shape index: {}]   ;;  %s6236_s10 = inlined_call_operand.vmem [shape: bf16[256,16], index: 10, kind: input, shape index: {}]   ;;  %s6237_s11 = inlined_call_operand.vmem [shape: bf16[144,64], index: 11, kind: input, shape index: {}]   ;;  %s6238_s12 = inlined_call_operand.vmem [shape: bf16[192,16], index: 12, kind: input, shape index: {}]   ;;  %s6239_s13 = inlined_call_operand.vmem [shape: bf16[336,64], index: 13, kind: input, shape index: {}]   ;;  %s6240_s14 = inlined_call_operand.vmem [shape: f32[8,128], index: 14, kind: input, shape index: {}]   ;;  %s6241_s15 = inlined_call_operand.vmem [shape: bf16[96,512], index: 15, kind: input, shape index: {}]   ;;  %s6242_s16 = inlined_call_operand.vmem [shape: f32[2,512], index: 16, kind: input, shape index: {}]   ;;  %s6243_s17 = inlined_call_operand.vmem [shape: bf16[512,128], index: 17, kind: input, shape index: {}]   ;;  %s6244_s18 = inlined_call_operand.vmem [shape: f32[2,8,128], index: 18, kind: output, shape index: {}]  }
   0x1   :  { %6259 = sst [smem:[#allocation2_spill]] %s6226_s0 }
   0x2   :  { %6260 = sst [smem:[#allocation3_spill]] %s6227_s1 }
   0x3   :  { %6261 = sst [smem:[#allocation4_spill]] %s6228_s2 }
   0x4   :  { %6262 = sst [smem:[#allocation5_spill]] %s6230_s4 }
   0x5   :  { %6263 = sst [smem:[#allocation6_spill]] %s6231_s5 }
   0x6 LB: > { %s5215_s28 = sadd.s32 4294967295, %s5097_s27   ;;  %p4042_p0 = scmp.ge.s32.totalorder %s5097_s27, 1  ;;  %s5097_s27 = sphi %s5209_s27, %s28_s27  }
   0x7   : > { %p533_p1 = scmp.lt.s32.totalorder %s5097_s27, 3 }
   0x9   : > { %p534_p2 = pnand %p4042_p0, %p533_p1 }
   0xa   : > { %p596_p3 = scmp.lt.s32.totalorder (!%p534_p2), %s5215_s28, 1  ;;  %vm620_vm0 = vcmask (!%p534_p2), 261120   ;;  %s6264_s1 = sld [smem:[#allocation2_spill]] (!%p534_p2)  ;;  %v635_v15 = vlaneseq (!%p534_p2)  ;;  %v5260_v20 = vld [vmem:[%s6229_s3] sm:$0xff] (!%p534_p2)  ;;  %vm664_vm1 = vcmask (!%p534_p2), 523264   ;;  %vm666_vm2 = vcmask (!%p534_p2), 785408  }
   0xb   : > { %537 = sbr.rel (%p534_p2) target bundleno = 8207 (0x200f), region = 92  ;;  %s6265_s5 = sld [smem:[#allocation6_spill]] (!%p534_p2)  ;;  %v692_v45 = vld [vmem:[%s6232_s6 + $0x10] sm:$0xff] (!%p534_p2)  ;;  %v690_v46 = vld [vmem:[%s6232_s6] sm:$0xff] (!%p534_p2)  ;;  %v693_v48 = vld [vmem:[%s6232_s6 + $0x18] sm:$0xff] (!%p534_p2)  ;;  %vm805_vm3 = vcmask (!%p534_p2), 64512  }
   0xc   : > { %v5249_v17 = vshrl.u32 (!%p534_p2), %v635_v15, 7  ;;  %s6254_s0 = smov (!%p534_p2), 96   ;;  %s6257_s19 = smov (!%p534_p2), 32   ;;  %v691_v51 = vld [vmem:[%s6232_s6 + $0x8] sm:$0xff] (!%p534_p2)  ;;  %vm5105_vm4 = vmmov (!%p534_p2), 0   ;;  %vm987_vm5 = vcmask (!%p534_p2), 130048  }
   0xd   : > { %s6266_s4 = sld [smem:[#allocation5_spill]] (!%p534_p2)  ;;  %s6267_s23 = sld [smem:[#allocation3_spill]] (!%p534_p2)  ;;  %vm989_vm6 = vcmask (!%p534_p2), 195584   ;;  %vm2806_vm7 = vcmask (!%p534_p2), 1043456   ;;  %vm2759_vm8 = vcmask (!%p534_p2), 326656   ;;  %vm2762_vm9 = vcmask (!%p534_p2), 392192  }
   0xe   : > { %v5255_v19 = vsub.s32 (!%p534_p2), 0, %v5249_v17  ;;  %v5263_v21 = vsub.s32 (!%p534_p2), 1, %v5249_v17  ;;  %s6252_s25 = smov (!%p534_p2), 112   ;;  %s6246_s26 = smov (!%p534_p2), 16   ;;  %vm2765_vm10 = vcmask (!%p534_p2), 457728   ;;  %vm2802_vm11 = vcmask (!%p534_p2), 588800  }
   0xf   : > { %s6272_s22 = sld [smem:[#allocation4_spill]] (!%p534_p2)  ;;  %s6275_s2 = smov (!%p534_p2), 96   ;;  %vm3101_vm12 = vcmask (!%p534_p2), 654336   ;;  %vm3104_vm13 = vcmask (!%p534_p2), 916480   ;;  %vm3325_vm14 = vcmask (!%p534_p2), 519168  }
  0x10   : > { %v638_v22 = vrot.slane (!%p534_p2), %v5260_v20, %v5255_v19  ;;  %v643_v26 = vrot.slane (!%p534_p2), %v5260_v20, %v5263_v21 }
  0x11   : > { %v4864_v7 = vld [vmem:[%s6265_s5] sm:$0xff] (!%p534_p2)   ;;  %v4865_v8 = vld [vmem:[%s6265_s5 + $0x8] sm:$0xff] (!%p534_p2)   ;;  %v4866_v9 = vld [vmem:[%s6265_s5 + $0x10] sm:$0xff] (!%p534_p2)  }
  0x12   : > { %s5221_s29 = scalar_select %p596_p3, %s5215_s28, 1  ;;  %4500 = vmatprep.subr.bf16.mxu0 %v4864_v7  ;;  %v4867_v10 = vld [vmem:[%s6265_s5 + $0x18] sm:$0xff]   ;;  %v4868_v11 = vld [vmem:[%s6265_s5 + $0x20] sm:$0xff]   ;;  %v4869_v12 = vld [vmem:[%s6265_s5 + $0x28] sm:$0xff]  }
  0x13   : > { %4501 = vmatpush3.bf16.msra.mxu0 %v4864_v7  ;;  %v4870_v18 = vld [vmem:[%s6265_s5 + $0x30] sm:$0xff]   ;;  %v4871_v23 = vld [vmem:[%s6265_s5 + $0x38] sm:$0xff]   ;;  %v5283_v30 = vld [vmem:[%s6266_s4] sm:$0xff] }
  0x14   : > { %s6245_s30 = sshll.u32 %s5221_s29, 3  ;;  %4502 = vmatprep.subr.bf16.mxu0 %v4865_v8  ;;  %v5290_v33 = vld [vmem:[%s6266_s4 + $0x8] sm:$0xff]  ;;  %v5295_v34 = vld [vmem:[%s6266_s4 + $0x10] sm:$0xff]  ;;  %v5300_v35 = vld [vmem:[%s6266_s4 + $0x18] sm:$0xff]  ;;  %s4301_s21 = sshll.u32 %s5221_s29, 5 }
  0x15   : > { %s599_s20 = scalar_lea.vmem %s6264_s1, %s6245_s30  ;;  %s6255_s1 = smov 64  }
  0x16   : > { %v619_v0 = vld [vmem:[%s599_s20] sm:$0xff]  ;;  %s5102_s20 = smov 120   ;;  %s604_s24 = scalar_lea.vmem %s6267_s23, %s4301_s21 }
  0x17   : > { %v621_v1 = vsel %vm620_vm0, %v619_v0, 0.0  ;;  %4503 = vmatpush3.bf16.msra.mxu0 %v4865_v8  ;;  %v5340_v7 = vld [vmem:[%s604_s24 + $0x10] sm:$0xff]  ;;  %s6250_s23 = smov 24   ;;  %s6271_s30 = smov 16  }
  0x18   : > { %622 = vadd.xlane.f32.xlu0 %v621_v1  ;;  %4504 = vmatprep.subr.bf16.mxu0 %v4866_v9  ;;  %s6273_s21 = smov 32   ;;  %s5110_s4 = smov 48  }
  0x1b   : > { %4505 = vmatpush3.bf16.msra.mxu0 %v4866_v9  ;;  %v5342_v9 = vld [vmem:[%s604_s24 + $0x8] sm:$0xff] }
  0x1c   : > { %4506 = vmatprep.subr.bf16.mxu0 %v4867_v10 }
  0x1f   : > { %4507 = vmatpush3.bf16.msra.mxu0 %v4867_v10 }
  0x20   : > { %4508 = vmatprep.subr.bf16.mxu0 %v4868_v11 }
  0x23   : > { %4509 = vmatpush3.bf16.msra.mxu0 %v4868_v11 }
  0x24   : > { %4510 = vmatprep.subr.bf16.mxu0 %v4869_v12 }
  0x27   : > { %4511 = vmatpush3.bf16.msra.mxu0 %v4869_v12 }
  0x28   : > { %4512 = vmatprep.subr.bf16.mxu0 %v4870_v18 }
  0x2b   : > { %4513 = vmatpush3.bf16.msra.mxu0 %v4870_v18 }
  0x2c   : > { %4514 = vmatprep.subr.bf16.mxu0 %v4871_v23 }
  0x2f   : > { %4515 = vmatpush3.bf16.msra.mxu0 %v4871_v23 }
  0xa5   : > { %v623_v2 = vpop.xlane.xlu0 %622 }
  0xa6   : > { %v625_v3 = vmul.f32 0.03125, %v623_v2 }
  0xa8   : > { %v626_v4 = vsub.f32 %v619_v0, %v625_v3 }
  0xaa   : > { %v627_v5 = vmul.f32 %v626_v4, %v626_v4 }
  0xac   : > { %v628_v6 = vsel %vm620_vm0, %v627_v5, 0.0  ;;  %v5338_v5 = vld [vmem:[%s604_s24] sm:$0xff] }
  0xad   : > { %629 = vadd.xlane.f32.xlu0 %v628_v6 }
 0x13a   : > { %v630_v13 = vpop.xlane.xlu0 %629 }
 0x13b   : > { %v631_v14 = vmul.f32 0.03125, %v630_v13 }
 0x13d   : > { %v632_v16 = vadd.f32 1e-12, %v631_v14 }
 0x13f   : > { %5043 = vrsqrt.f32 %v632_v16  ;;  %v5348_v16 = vld [vmem:[%s604_s24 + $0x18] sm:$0xff]  ;;  %s6248_s24 = smov 8  }
 0x149   : > { %v5044_v24 = vpop.eup %5043 }
 0x14a   : > { %v634_v25 = vmul.f32 %v5044_v24, %v626_v4 }
 0x14c   : > { %v639_v27 = vmul.f32 %v638_v22, %v634_v25 }
 0x14e   : > { %v5272_v28 = vadd.f32 %v643_v26, %v639_v27 }
 0x150   : > { %660 = vrot.lane.b32.xlu0 %v5272_v28, %s6254_s0  ;;  %654 = vrot.lane.b32.xlu1 %v5272_v28, %s6257_s19 }
 0x154   : > { %657 = vrot.lane.b32.xlu1 %v5272_v28, %s6255_s1 }
 0x1c2   : > { %v655_v29 = vpop.permute.xlu1 %654  ;;  %v661_v36 = vpop.permute.xlu0 %660 }
 0x1c3   : > { %v663_v31 = vsel %vm620_vm0, %v5272_v28, %v655_v29 }
 0x1c6   : > { %v658_v32 = vpop.permute.xlu1 %657 }
 0x1c7   : > { %v665_v37 = vsel %vm664_vm1, %v663_v31, %v658_v32 }
 0x1c8   : > { %v667_v38 = vsel %vm666_vm2, %v665_v37, %v661_v36 }
 0x1c9   : > { %v668_v39 = vmul.f32 %v667_v38, %v5283_v30  ;;  %v669_v40 = vmul.f32 %v667_v38, %v5290_v33  ;;  %v670_v41 = vmul.f32 %v667_v38, %v5295_v34  ;;  %v671_v42 = vmul.f32 %v667_v38, %v5300_v35 }
 0x1cb   : > { %v672_v43 = vpack.c.bf16 %v669_v40, %v668_v39  ;;  %v673_v44 = vpack.c.bf16 %v671_v42, %v670_v41 }
 0x1cd   : > { %4516 = vmatprep.mubr.bf16.mxu0 %v672_v43 }
 0x1ce   : > { %4517 = vmatmul.mubr.bf16.vlgmr.msra.gmra.mrb[0].mxu0 %v673_v44 }
 0x2a1   : > { %v4518_v47 = vpop.f32.mrb[0].mxu0 }
 0x2a2   : > { %v785_v49 = vadd.f32 %v4518_v47, %v692_v45  ;;  %v776_v50 = vpop.f32.mrb[1].mxu0 }
 0x2a3   : > { %v777_v52 = vadd.f32 %v776_v50, %v690_v46  ;;  %v4519_v53 = vpop.f32.mrb[2].mxu0 }
 0x2a4   : > { %v788_v54 = vadd.f32 %v4519_v53, %v693_v48  ;;  %v779_v55 = vpop.f32.mrb[3].mxu0  ;;  %v793_v57 = vmul.f32 0.35355338, %v785_v49 }
 0x2a5   : > { %v780_v56 = vadd.f32 %v779_v55, %v691_v51  ;;  %v791_v60 = vmul.f32 0.35355338, %v777_v52 }
 0x2a6   : > { %v794_v58 = vmul.f32 0.35355338, %v788_v54  ;;  %v5320_v59 = vpack.c.bf16 %v788_v54, %v785_v49 }
 0x2a7   : > { %v792_v61 = vmul.f32 0.35355338, %v780_v56  ;;  %v5322_v62 = vpack.c.bf16 %v780_v56, %v777_v52 }
 0x2a8   : > { %v796_v63 = vpack.c.bf16 %v794_v58, %v793_v57 }
 0x2a9   : > { %801 = vrot.lane.b32.xlu1 %v5322_v62, %s5102_s20  ;;  %v795_v0 = vpack.c.bf16 %v792_v61, %v791_v60 }
 0x2ab   : > { %4524 = vmatprep.mubr.msk.bf16.mxu1 %vm805_vm3, %v795_v0 }
 0x2ad   : > { %803 = vrot.lane.b32.xlu1 %v5320_v59, %s5102_s20 }
 0x31b   : > { %v802_v1 = vpop.permute.xlu1 %801 }
 0x31c   : > { %4792 = vmatprep.subr.msk.bf16.mxu1 %vm805_vm3, %v802_v1  ;;  %v813_v2 = vsel %vm805_vm3, %v802_v1, 0 }
 0x31d   : > { %4521 = vmatpush3.bf16.xpose.msra.mxu1 %v813_v2  ;;  %v4872_v2 = vld [vmem:[%s6233_s7] sm:$0xff]  }
 0x31f   : > { %v804_v3 = vpop.permute.xlu1 %803 }
 0x320   : > { %4793 = vmatprep.subr.msk.bf16.mxu1 %vm805_vm3, %v804_v3  ;;  %v816_v4 = vsel %vm805_vm3, %v804_v3, 0  ;;  %v5104_v3 = vmov 0.0  }
 0x325   : > { %4523 = vmatpush3.bf16.xpose.msra.mxu1 %v816_v4  ;;  %v4873_v4 = vld [vmem:[%s6233_s7 + $0x8] sm:$0xff]  }
 0x326   : > { %4536 = vmatprep.subr.bf16.mxu1 %v5104_v3 }
 0x32c   : > { %4525 = vmatmul.mubr.msk.bf16.vlgmr.msra.gmra.mrb[0].mxu1 %vm805_vm3, %v796_v63 }
 0x32d   : > { %4537 = vmatpush3.bf16.msra.mxu1 %v4872_v2  ;;  %4540 = vmatprep.mubr.msk.bf16.mxu1 %vm5105_vm4, %v5104_v3 }
 0x32e   : > { %4538 = vmatprep.subr.bf16.mxu1 %v5104_v3 }
 0x331   : > { %4539 = vmatpush3.bf16.msra.mxu1 %v4873_v4 }
 0x332   : > { %4552 = vmatprep.subr.bf16.mxu1 %v5104_v3 }
 0x3ff   : > { %v4526_v6 = vpop.f32.mrb[0].mxu1 }
 0x400   : > { %v852_v8 = vpop.f32.mrb[1].mxu1  ;;  %v861_v13 = vadd.f32 %v4526_v6, %v5340_v7 }
 0x401   : > { %v853_v10 = vadd.f32 %v852_v8, %v5338_v5  ;;  %v4527_v11 = vpop.f32.mrb[2].mxu1 }
 0x402   : > { %v855_v12 = vpop.f32.mrb[3].mxu1  ;;  %v864_v22 = vadd.f32 %v4527_v11, %v5348_v16  ;;  %v873_v23 = vsel %vm620_vm0, %v861_v13, -inf }
 0x403   : > { %v856_v14 = vadd.f32 %v855_v12, %v5342_v9  ;;  %v867_v15 = vsel %vm620_vm0, %v853_v10, -inf }
 0x404   : > { %868 = vmax.xlane.f32.xlu1 %v867_v15  ;;  %v876_v24 = vsel %vm620_vm0, %v864_v22, -inf }
 0x405   : > { %v870_v18 = vsel %vm620_vm0, %v856_v14, -inf }
 0x406   : > { %871 = vmax.xlane.f32.xlu0 %v870_v18 }
 0x408   : > { %874 = vmax.xlane.f32.xlu1 %v873_v23 }
 0x40c   : > { %877 = vmax.xlane.f32.xlu1 %v876_v24  ;;  %v5388_v24 = vsub.s32 2, %v5249_v17 }
 0x491   : > { %v869_v25 = vpop.xlane.xlu1 %868 }
 0x492   : > { %v879_v26 = vsub.f32 %v853_v10, %v869_v25  ;;  %v999_v25 = vrot.slane %v5260_v20, %v5388_v24 }
 0x493   : > { %v872_v27 = vpop.xlane.xlu0 %871 }
 0x494   : > { %v883_v32 = vmul.f32 1.442695, %v879_v26  ;;  %v880_v36 = vsub.f32 %v856_v14, %v872_v27 }
 0x495   : > { %v875_v29 = vpop.xlane.xlu1 %874 }
 0x496   : > { %v881_v31 = vsub.f32 %v861_v13, %v875_v29  ;;  %v885_v40 = vmul.f32 1.442695, %v880_v36 }
 0x498   : > { %v887_v37 = vmul.f32 1.442695, %v881_v31 }
 0x499   : > { %v878_v38 = vpop.xlane.xlu1 %877 }
 0x49a   : > { %5045 = vpow2.f32 %v887_v37  ;;  %v882_v39 = vsub.f32 %v864_v22, %v878_v38 }
 0x49b   : > { %5047 = vpow2.f32 %v883_v32 }
 0x49c   : > { %v889_v41 = vmul.f32 1.442695, %v882_v39 }
 0x49e   : > { %5049 = vpow2.f32 %v889_v41 }
 0x49f   : > { %5051 = vpow2.f32 %v885_v40 }
 0x4a4   : > { %v5046_v42 = vpop.eup %5045 }
 0x4a5   : > { %v897_v43 = vsel %vm620_vm0, %v5046_v42, 0.0  ;;  %v5048_v44 = vpop.eup %5047 }
 0x4a6   : > { %898 = vadd.xlane.f32.xlu1 %v897_v43  ;;  %v891_v46 = vsel %vm620_vm0, %v5048_v44, 0.0  ;;  %v4874_v43 = vld [vmem:[%s6234_s8] sm:$0xff]  }
 0x4a8   : > { %v5050_v45 = vpop.eup %5049 }
 0x4a9   : > { %v900_v47 = vsel %vm620_vm0, %v5050_v45, 0.0  ;;  %v5052_v48 = vpop.eup %5051 }
 0x4aa   : > { %892 = vadd.xlane.f32.xlu1 %v891_v46  ;;  %901 = vadd.xlane.f32.xlu0 %v900_v47  ;;  %v894_v49 = vsel %vm620_vm0, %v5052_v48, 0.0  ;;  %v5403_v47 = vsub.s32 3, %v5249_v17 }
 0x4ae   : > { %895 = vadd.xlane.f32.xlu0 %v894_v49  ;;  %v1072_v49 = vrot.slane %v5260_v20, %v5403_v47 }
 0x4bb   : > { %913 = vrot.lane.b32.xlu1 %v5322_v62, %s6252_s25 }
 0x4c4   : > { %915 = vrot.lane.b32.xlu0 %v5320_v59, %s6252_s25  ;;  %s6270_s25 = smov 8  }
 0x533   : > { %v899_v50 = vpop.xlane.xlu1 %898 }
 0x537   : > { %v902_v51 = vpop.xlane.xlu0 %901  ;;  %v893_v52 = vpop.xlane.xlu1 %892 }
 0x538   : > { %5053 = vrcp.f32 %v902_v51 }
 0x539   : > { %5055 = vrcp.f32 %v893_v52 }
 0x53a   : > { %5057 = vrcp.f32 %v899_v50 }
 0x53b   : > { %v896_v53 = vpop.xlane.xlu0 %895  ;;  %v914_v54 = vpop.permute.xlu1 %913 }
 0x53c   : > { %5059 = vrcp.f32 %v896_v53  ;;  %4528 = vmatprep.subr.bf16.mxu0 %v914_v54 }
 0x53d   : > { %4529 = vmatpush3.bf16.msra.mxu0 %v914_v54 }
 0x53f   : > { %v916_v55 = vpop.permute.xlu0 %915 }
 0x540   : > { %4530 = vmatprep.subr.bf16.mxu0 %v916_v55 }
 0x541   : > { %4531 = vmatpush3.bf16.msra.mxu0 %v916_v55 }
 0x542   : > { %v5054_v56 = vpop.eup %5053  ;;  %4544 = vmatprep.subr.bf16.mxu0 %v5104_v3 }
 0x543   : > { %v5056_v57 = vpop.eup %5055  ;;  %v910_v61 = vmul.f32 %v5054_v56, %v5050_v45  ;;  %v4876_v56 = vld [vmem:[%s6235_s9] sm:$0xff]  }
 0x544   : > { %v5058_v58 = vpop.eup %5057  ;;  %v907_v59 = vmul.f32 %v5056_v57, %v5048_v44  ;;  %v4875_v44 = vld [vmem:[%s6234_s8 + $0x8] sm:$0xff]  }
 0x545   : > { %v909_v63 = vmul.f32 %v5058_v58, %v5046_v42  ;;  %v4877_v57 = vld [vmem:[%s6235_s9 + $0x8] sm:$0xff]   ;;  %v4878_v58 = vld [vmem:[%s6235_s9 + $0x10] sm:$0xff]  }
 0x546   : > { %v5060_v60 = vpop.eup %5059 }
 0x547   : > { %v908_v62 = vmul.f32 %v5060_v60, %v5052_v48  ;;  %v912_v1 = vpack.c.bf16 %v910_v61, %v909_v63  ;;  %v5406_v48 = vsub.s32 4, %v5249_v17  ;;  %v4879_v60 = vld [vmem:[%s6235_s9 + $0x18] sm:$0xff]   ;;  %v4880_v61 = vld [vmem:[%s6235_s9 + $0x20] sm:$0xff]  }
 0x548   : > { %v4883_v63 = vld [vmem:[%s6235_s9 + $0x38] sm:$0xff]  }
 0x549   : > { %v911_v0 = vpack.c.bf16 %v908_v62, %v907_v59  ;;  %v1077_v52 = vrot.slane %v5260_v20, %v5406_v48  ;;  %v4881_v59 = vld [vmem:[%s6235_s9 + $0x28] sm:$0xff]   ;;  %v4882_v62 = vld [vmem:[%s6235_s9 + $0x30] sm:$0xff]  }
 0x54b   : > { %4532 = vmatprep.mubr.msk.bf16.mxu0 %vm620_vm0, %v911_v0  ;;  %v5445_v0 = vsub.s32 5, %v5249_v17 }
 0x54c   : > { %4533 = vmatmul.mubr.msk.bf16.vlgmr.msra.gmra.mrb[4].mxu0 %vm620_vm0, %v912_v1 }
 0x54d   : > { %4548 = vmatprep.mubr.msk.bf16.mxu0 %vm5105_vm4, %v5104_v3  ;;  %4545 = vmatpush3.bf16.msra.mxu0 %v4874_v43  ;;  %v1087_v1 = vrot.slane %v5260_v20, %v5445_v0 }
 0x54e   : > { %4546 = vmatprep.subr.bf16.mxu0 %v5104_v3 }
 0x551   : > { %4547 = vmatpush3.bf16.msra.mxu0 %v4875_v44 }
 0x61f   : > { %v4534_v6 = vpop.f32.mrb[4].mxu0 }
 0x620   : > { %v959_v8 = vpop.f32.mrb[5].mxu0 }
 0x621   : > { %v4535_v10 = vpop.f32.mrb[6].mxu0 }
 0x622   : > { %983 = vrot.lane.b32.xlu0 %v4535_v10, %s6250_s23  ;;  %v962_v11 = vpop.f32.mrb[7].mxu0  ;;  %s6269_s23 = smov 24  }
 0x623   : > { %975 = vrot.lane.b32.xlu1 %v962_v11, %s6248_s24 }
 0x627   : > { %979 = vrot.lane.b32.xlu1 %v4534_v6, %s6246_s26 }
 0x694   : > { %v984_v15 = vpop.permute.xlu0 %983 }
 0x695   : > { %v976_v12 = vpop.permute.xlu1 %975 }
 0x696   : > { %v986_v13 = vsel %vm805_vm3, %v959_v8, %v976_v12 }
 0x699   : > { %v980_v14 = vpop.permute.xlu1 %979 }
 0x69a   : > { %v988_v18 = vsel %vm987_vm5, %v986_v13, %v980_v14 }
 0x69b   : > { %v990_v22 = vsel %vm989_vm6, %v988_v18, %v984_v15 }
 0x69c   : > { %v991_v23 = vpack.c.bf16 %v990_v22, %v990_v22 }
 0x69e   : > { %4541 = vmatmul.mubr.msk.bf16.vlgmr.msra.gmra.mrb[4].mxu1 %vm620_vm0, %v991_v23 }
 0x69f   : > { %4568 = vmatprep.mubr.msk.bf16.mxu1 %vm5105_vm4, %v5104_v3  ;;  %4553 = vmatpush3.bf16.msra.mxu1 %v4876_v56  ;;  %v4890_v56 = vld [vmem:[%s6265_s5 + $0x70] sm:$0xff]  }
 0x6a0   : > { %4554 = vmatprep.subr.bf16.mxu1 %v5104_v3 }
 0x6a3   : > { %4555 = vmatpush3.bf16.msra.mxu1 %v4877_v57  ;;  %v1277_v57 = vsub.s32 7, %v5249_v17 }
 0x6a4   : > { %4556 = vmatprep.subr.bf16.mxu1 %v5104_v3 }
 0x6a7   : > { %4557 = vmatpush3.bf16.msra.mxu1 %v4878_v58  ;;  %v5481_v58 = vld [vmem:[%s6229_s3 + $0x8] sm:$0xff] }
 0x6a8   : > { %4558 = vmatprep.subr.bf16.mxu1 %v5104_v3 }
 0x6ab   : > { %4559 = vmatpush3.bf16.msra.mxu1 %v4879_v60  ;;  %v1278_v60 = vrot.slane %v5260_v20, %v1277_v57 }
 0x6ac   : > { %4560 = vmatprep.subr.bf16.mxu1 %v5104_v3 }
 0x6af   : > { %4561 = vmatpush3.bf16.msra.mxu1 %v4880_v61  ;;  %v4891_v61 = vld [vmem:[%s6265_s5 + $0x78] sm:$0xff]  }
 0x6b0   : > { %4562 = vmatprep.subr.bf16.mxu1 %v5104_v3 }
 0x6b3   : > { %4563 = vmatpush3.bf16.msra.mxu1 %v4881_v59 }
 0x6b4   : > { %4564 = vmatprep.subr.bf16.mxu1 %v5104_v3 }
 0x6b7   : > { %4565 = vmatpush3.bf16.msra.mxu1 %v4882_v62 }
 0x6b8   : > { %4566 = vmatprep.subr.bf16.mxu1 %v5104_v3 }
 0x6bb   : > { %4567 = vmatpush3.bf16.msra.mxu1 %v4883_v63  ;;  %v1283_v63 = vrot.slane %v5481_v58, %v5255_v19 }
 0x771   : > { %v1049_v26 = vpop.f32.mrb[4].mxu1 }
 0x772   : > { %v1050_v27 = vadd.f32 %v1049_v26, %v999_v25  ;;  %v4542_v29 = vpop.f32.mrb[5].mxu1 }
 0x773   : > { %v1052_v31 = vpop.f32.mrb[6].mxu1 }
 0x774   : > { %v4543_v32 = vpop.f32.mrb[7].mxu1  ;;  %v1055_v36 = vadd.f32 %v1050_v27, %v5272_v28  ;;  %v5450_v27 = vsub.s32 6, %v5249_v17  ;;  %v5015_v17 = vld [vmem:[%s6243_s17 + $0x48] sm:$0xff]  }
 0x776   : > { %v1056_v37 = vsel %vm620_vm0, %v1055_v36, 0.0  ;;  %v1172_v29 = vrot.slane %v5260_v20, %v5450_v27 }
 0x777   : > { %1057 = vadd.xlane.f32.xlu1 %v1056_v37 }
 0x804   : > { %v1058_v38 = vpop.xlane.xlu1 %1057 }
 0x805   : > { %v1059_v39 = vmul.f32 0.03125, %v1058_v38 }
 0x807   : > { %v1060_v40 = vsub.f32 %v1055_v36, %v1059_v39 }
 0x809   : > { %v1061_v41 = vmul.f32 %v1060_v40, %v1060_v40 }
 0x80b   : > { %v1062_v42 = vsel %vm620_vm0, %v1061_v41, 0.0 }
 0x80c   : > { %1063 = vadd.xlane.f32.xlu0 %v1062_v42 }
 0x899   : > { %v1064_v28 = vpop.xlane.xlu0 %1063 }
 0x89a   : > { %v1065_v45 = vmul.f32 0.03125, %v1064_v28 }
 0x89c   : > { %v1066_v46 = vadd.f32 1e-12, %v1065_v45  ;;  %v4884_v45 = vld [vmem:[%s6265_s5 + $0x40] sm:$0xff]  }
 0x89d   : > { %4572 = vmatprep.subr.bf16.mxu0 %v4884_v45 }
 0x89e   : > { %5061 = vrsqrt.f32 %v1066_v46  ;;  %v4885_v46 = vld [vmem:[%s6265_s5 + $0x48] sm:$0xff]  }
 0x8a8   : > { %v5062_v50 = vpop.eup %5061 }
 0x8a9   : > { %v1068_v51 = vmul.f32 %v5062_v50, %v1060_v40  ;;  %v4887_v50 = vld [vmem:[%s6265_s5 + $0x58] sm:$0xff]  }
 0x8ab   : > { %v1073_v53 = vmul.f32 %v1072_v49, %v1068_v51  ;;  %v4886_v49 = vld [vmem:[%s6265_s5 + $0x50] sm:$0xff]   ;;  %v4888_v51 = vld [vmem:[%s6265_s5 + $0x60] sm:$0xff]  }
 0x8ad   : > { %v1078_v54 = vadd.f32 %v1077_v52, %v1073_v53  ;;  %v4889_v52 = vld [vmem:[%s6265_s5 + $0x68] sm:$0xff]  }
 0x8af   : > { %v1079_v55 = vpack.c.bf16 %v1078_v54, %v1078_v54 }
 0x8b1   : > { %4549 = vmatmul.mubr.msk.bf16.vlgmr.msra.gmra.mrb[8].mxu0 %vm620_vm0, %v1079_v55 }
 0x8b2   : > { %4573 = vmatpush3.bf16.msra.mxu0 %v4884_v45 }
 0x8b3   : > { %4574 = vmatprep.subr.bf16.mxu0 %v4885_v46 }
 0x8b6   : > { %4575 = vmatpush3.bf16.msra.mxu0 %v4885_v46 }
 0x8b7   : > { %4576 = vmatprep.subr.bf16.mxu0 %v4886_v49 }
 0x8ba   : > { %4577 = vmatpush3.bf16.msra.mxu0 %v4886_v49 }
 0x8bb   : > { %4578 = vmatprep.subr.bf16.mxu0 %v4887_v50 }
 0x8be   : > { %4579 = vmatpush3.bf16.msra.mxu0 %v4887_v50 }
 0x8bf   : > { %4580 = vmatprep.subr.bf16.mxu0 %v4888_v51 }
 0x8c2   : > { %4581 = vmatpush3.bf16.msra.mxu0 %v4888_v51 }
 0x8c3   : > { %4582 = vmatprep.subr.bf16.mxu0 %v4889_v52 }
 0x8c6   : > { %4583 = vmatpush3.bf16.msra.mxu0 %v4889_v52 }
 0x8c7   : > { %4584 = vmatprep.subr.bf16.mxu0 %v4890_v56 }
 0x8ca   : > { %4585 = vmatpush3.bf16.msra.mxu0 %v4890_v56 }
 0x8cb   : > { %4586 = vmatprep.subr.bf16.mxu0 %v4891_v61 }
 0x8ce   : > { %4587 = vmatpush3.bf16.msra.mxu0 %v4891_v61 }
 0x984   : > { %v1137_v2 = vpop.f32.mrb[8].mxu0 }
 0x985   : > { %v1138_v4 = vadd.f32 %v1137_v2, %v1087_v1  ;;  %v4550_v6 = vpop.f32.mrb[9].mxu0 }
 0x986   : > { %v1140_v8 = vpop.f32.mrb[10].mxu0 }
 0x987   : > { %v1143_v10 = vmul.f32 %v1138_v4, %v1138_v4  ;;  %v4551_v11 = vpop.f32.mrb[11].mxu0 }
 0x989   : > { %v1144_v12 = vmul.f32 %v1143_v10, %v1138_v4 }
 0x98b   : > { %v1145_v13 = vmul.f32 0.044715, %v1144_v12 }
 0x98d   : > { %v1146_v14 = vadd.f32 %v1145_v13, %v1138_v4 }
 0x98f   : > { %v1147_v15 = vmul.f32 0.7978846, %v1146_v14 }
 0x991   : > { %5063 = vtanh.f32 %v1147_v15 }
 0x99b   : > { %v5064_v18 = vpop.eup %5063 }
 0x99c   : > { %v1149_v22 = vadd.f32 1.0, %v5064_v18 }
 0x99e   : > { %v1150_v23 = vmul.f32 0.5, %v1149_v22 }
 0x9a0   : > { %v1151_v25 = vmul.f32 %v1150_v23, %v1138_v4  ;;  %v4094_v23 = vld [vmem:[%s6232_s6 + $0x30] sm:$0xff] }
 0x9a2   : > { %v1152_v26 = vpack.c.bf16 %v1151_v25, %v1151_v25  ;;  %v4092_v25 = vld [vmem:[%s6232_s6 + $0x20] sm:$0xff] }
 0x9a4   : > { %4569 = vmatmul.mubr.bf16.vlgmr.msra.gmra.mrb[8].mxu1 %v1152_v26 }
 0xa77   : > { %v1255_v31 = vpop.f32.mrb[8].mxu1 }
 0xa78   : > { %v1256_v32 = vadd.f32 %v1255_v31, %v1172_v29  ;;  %v4570_v36 = vpop.f32.mrb[9].mxu1 }
 0xa79   : > { %v1258_v37 = vpop.f32.mrb[10].mxu1 }
 0xa7a   : > { %v4571_v38 = vpop.f32.mrb[11].mxu1  ;;  %v1261_v39 = vadd.f32 %v1256_v32, %v1078_v54 }
 0xa7c   : > { %v1262_v40 = vsel %vm620_vm0, %v1261_v39, 0.0 }
 0xa7d   : > { %1263 = vadd.xlane.f32.xlu0 %v1262_v40 }
 0xb0a   : > { %v1264_v41 = vpop.xlane.xlu0 %1263 }
 0xb0b   : > { %v1265_v42 = vmul.f32 0.03125, %v1264_v41 }
 0xb0d   : > { %v1266_v43 = vsub.f32 %v1261_v39, %v1265_v42 }
 0xb0f   : > { %v1267_v44 = vmul.f32 %v1266_v43, %v1266_v43 }
 0xb11   : > { %v1268_v28 = vsel %vm620_vm0, %v1267_v44, 0.0 }
 0xb12   : > { %1269 = vadd.xlane.f32.xlu1 %v1268_v28 }
 0xb9f   : > { %v1270_v53 = vpop.xlane.xlu1 %1269 }
 0xba0   : > { %v1271_v54 = vmul.f32 0.03125, %v1270_v53 }
 0xba2   : > { %v1272_v55 = vadd.f32 1e-12, %v1271_v54 }
 0xba4   : > { %5065 = vrsqrt.f32 %v1272_v55 }
 0xbae   : > { %v5066_v59 = vpop.eup %5065 }
 0xbaf   : > { %v1274_v62 = vmul.f32 %v5066_v59, %v1266_v43 }
 0xbb1   : > { %v1279_v1 = vmul.f32 %v1278_v60, %v1274_v62 }
 0xbb3   : > { %v5491_v2 = vadd.f32 %v1283_v63, %v1279_v1 }
 0xbb5   : > { %1289 = vrot.lane.b32.xlu1 %v5491_v2, %s6255_s1  ;;  %1286 = vrot.lane.b32.xlu0 %v5491_v2, %s6257_s19  ;;  %s4046_s1 = sshll.u32 %s5215_s28, 3 }
 0xbb6   : > { %p606_p4 = scmp.lt.s32.totalorder %s4046_s1, 15 }
 0xbb8   : > { %s6278_s1 = smov (!%p606_p4, %s4046_s1), 15 }
 0xbb9   : > { %1292 = vrot.lane.b32.xlu1 %v5491_v2, %s6254_s0  ;;  %s4302_s19 = sshll.u32 %s6278_s1, 3  ;;  %s5111_s0 = smov 56  }
 0xbba   : > { %s5589_s5 = scalar_lea.vmem %s6272_s22, %s4302_s19  ;;  %s6274_s19 = smov 64  }
 0xc27   : > { %v1290_v20 = vpop.permute.xlu1 %1289  ;;  %v1287_v4 = vpop.permute.xlu0 %1286 }
 0xc28   : > { %v1295_v6 = vsel %vm620_vm0, %v5491_v2, %v1287_v4 }
 0xc29   : > { %v1296_v10 = vsel %vm664_vm1, %v1295_v6, %v1290_v20 }
 0xc2b   : > { %v1293_v8 = vpop.permute.xlu1 %1292 }
 0xc2c   : > { %v1297_v11 = vsel %vm666_vm2, %v1296_v10, %v1293_v8 }
 0xc2d   : > { %v1298_v12 = vmul.f32 %v1297_v11, %v5283_v30  ;;  %v1299_v13 = vmul.f32 %v1297_v11, %v5290_v33  ;;  %v1300_v14 = vmul.f32 %v1297_v11, %v5295_v34  ;;  %v1301_v15 = vmul.f32 %v1297_v11, %v5300_v35  ;;  %v4095_v30 = vld [vmem:[%s6232_s6 + $0x38] sm:$0xff]  ;;  %v4093_v35 = vld [vmem:[%s6232_s6 + $0x28] sm:$0xff] }
 0xc2f   : > { %v1302_v18 = vpack.c.bf16 %v1299_v13, %v1298_v12  ;;  %v1303_v22 = vpack.c.bf16 %v1301_v15, %v1300_v14 }
 0xc31   : > { %4588 = vmatprep.mubr.bf16.mxu0 %v1302_v18 }
 0xc32   : > { %4589 = vmatmul.mubr.bf16.vlgmr.msra.gmra.mrb[12].mxu0 %v1303_v22 }
 0xd05   : > { %v4590_v26 = vpop.f32.mrb[12].mxu0 }
 0xd06   : > { %v1417_v33 = vadd.f32 %v4590_v26, %v4094_v23  ;;  %v1408_v34 = vpop.f32.mrb[13].mxu0 }
 0xd07   : > { %v1409_v29 = vadd.f32 %v4092_v25, %v1408_v34  ;;  %v4591_v31 = vpop.f32.mrb[14].mxu0 }
 0xd08   : > { %v1420_v32 = vadd.f32 %v4591_v31, %v4095_v30  ;;  %v1411_v36 = vpop.f32.mrb[15].mxu0  ;;  %v1425_v38 = vmul.f32 0.35355338, %v1417_v33 }
 0xd09   : > { %v1412_v37 = vadd.f32 %v4093_v35, %v1411_v36  ;;  %v1423_v41 = vmul.f32 0.35355338, %v1409_v29 }
 0xd0a   : > { %v1426_v39 = vmul.f32 0.35355338, %v1420_v32  ;;  %v5519_v40 = vpack.c.bf16 %v1420_v32, %v1417_v33 }
 0xd0b   : > { %v1424_v42 = vmul.f32 0.35355338, %v1412_v37  ;;  %v1429_v43 = vpack.c.bf16 %v1412_v37, %v1409_v29 }
 0xd0c   : > { %v1428_v44 = vpack.c.bf16 %v1426_v39, %v1425_v38  ;;  %1435 = vrot.lane.b32.xlu1 %v5519_v40, %s5102_s20 }
 0xd0d   : > { %v1427_v28 = vpack.c.bf16 %v1424_v42, %v1423_v41  ;;  %1433 = vrot.lane.b32.xlu0 %v1429_v43, %s5102_s20  ;;  %s6268_s20 = smov 112  }
 0xd0f   : > { %4596 = vmatprep.mubr.msk.bf16.mxu1 %vm805_vm3, %v1427_v28 }
 0xd7e   : > { %v1436_v49 = vpop.permute.xlu1 %1435 }
 0xd7f   : > { %v1434_v45 = vpop.permute.xlu0 %1433  ;;  %v1447_v50 = vsel %vm805_vm3, %v1436_v49, 0 }
 0xd80   : > { %v1444_v46 = vsel %vm805_vm3, %v1434_v45, 0  ;;  %4794 = vmatprep.subr.msk.bf16.mxu1 %vm805_vm3, %v1434_v45  ;;  %v4892_v45 = vld [vmem:[%s6233_s7 + $0x10] sm:$0xff]  }
 0xd81   : > { %4593 = vmatpush3.bf16.xpose.msra.mxu1 %v1444_v46  ;;  %v4893_v46 = vld [vmem:[%s6233_s7 + $0x18] sm:$0xff]  }
 0xd82   : > { %4795 = vmatprep.subr.msk.bf16.mxu1 %vm805_vm3, %v1436_v49 }
 0xd89   : > { %4595 = vmatpush3.bf16.xpose.msra.mxu1 %v1447_v50 }
 0xd8a   : > { %4616 = vmatprep.subr.bf16.mxu1 %v5104_v3 }
 0xd90   : > { %4597 = vmatmul.mubr.msk.bf16.vlgmr.msra.gmra.mrb[12].mxu1 %vm805_vm3, %v1428_v44 }
 0xd91   : > { %4620 = vmatprep.mubr.msk.bf16.mxu1 %vm5105_vm4, %v5104_v3 }
 0xe63   : > { %v4598_v51 = vpop.f32.mrb[12].mxu1 }
 0xe64   : > { %v1483_v52 = vpop.f32.mrb[13].mxu1  ;;  %v1492_v56 = vadd.f32 %v4598_v51, %v5340_v7 }
 0xe65   : > { %v1484_v53 = vadd.f32 %v1483_v52, %v5338_v5  ;;  %v4599_v54 = vpop.f32.mrb[14].mxu1 }
 0xe66   : > { %v1486_v55 = vpop.f32.mrb[15].mxu1  ;;  %v1495_v62 = vadd.f32 %v4599_v54, %v5348_v16  ;;  %v1504_v63 = vsel %vm620_vm0, %v1492_v56, -inf }
 0xe67   : > { %v1487_v60 = vadd.f32 %v1486_v55, %v5342_v9  ;;  %v1498_v61 = vsel %vm620_vm0, %v1484_v53, -inf }
 0xe68   : > { %1499 = vmax.xlane.f32.xlu0 %v1498_v61  ;;  %v1507_v1 = vsel %vm620_vm0, %v1495_v62, -inf }
 0xe69   : > { %v1501_v59 = vsel %vm620_vm0, %v1487_v60, -inf }
 0xe6a   : > { %1502 = vmax.xlane.f32.xlu1 %v1501_v59 }
 0xe6c   : > { %1505 = vmax.xlane.f32.xlu0 %v1504_v63 }
 0xe70   : > { %1508 = vmax.xlane.f32.xlu0 %v1507_v1 }
 0xef5   : > { %v1500_v5 = vpop.xlane.xlu0 %1499 }
 0xef6   : > { %v1510_v20 = vsub.f32 %v1484_v53, %v1500_v5 }
 0xef7   : > { %v1503_v4 = vpop.xlane.xlu1 %1502 }
 0xef8   : > { %v1514_v9 = vmul.f32 1.442695, %v1510_v20  ;;  %v1511_v8 = vsub.f32 %v1487_v60, %v1503_v4 }
 0xef9   : > { %v1506_v7 = vpop.xlane.xlu0 %1505 }
 0xefa   : > { %v1512_v6 = vsub.f32 %v1492_v56, %v1506_v7  ;;  %v1516_v13 = vmul.f32 1.442695, %v1511_v8 }
 0xefc   : > { %v1518_v10 = vmul.f32 1.442695, %v1512_v6 }
 0xefd   : > { %v1509_v11 = vpop.xlane.xlu0 %1508 }
 0xefe   : > { %5067 = vpow2.f32 %v1518_v10  ;;  %v1513_v12 = vsub.f32 %v1495_v62, %v1509_v11  ;;  %v1629_v62 = vrot.slane %v5481_v58, %v5263_v21 }
 0xeff   : > { %5069 = vpow2.f32 %v1514_v9 }
 0xf00   : > { %v1520_v16 = vmul.f32 1.442695, %v1513_v12 }
 0xf02   : > { %5071 = vpow2.f32 %v1520_v16  ;;  %v4896_v16 = vld [vmem:[%s6236_s10 + $0x40] sm:$0xff]  }
 0xf03   : > { %5073 = vpow2.f32 %v1516_v13  ;;  %v4894_v13 = vld [vmem:[%s6234_s8 + $0x10] sm:$0xff]  }
 0xf04   : > { %4617 = vmatpush3.bf16.msra.mxu1 %v4894_v13 }
 0xf05   : > { %4618 = vmatprep.subr.bf16.mxu1 %v5104_v3 }
 0xf08   : > { %v5068_v14 = vpop.eup %5067 }
 0xf09   : > { %v1528_v15 = vsel %vm620_vm0, %v5068_v14, 0.0  ;;  %v5070_v18 = vpop.eup %5069 }
 0xf0a   : > { %1529 = vadd.xlane.f32.xlu1 %v1528_v15  ;;  %v1522_v23 = vsel %vm620_vm0, %v5070_v18, 0.0 }
 0xf0c   : > { %v5072_v22 = vpop.eup %5071 }
 0xf0d   : > { %v1531_v25 = vsel %vm620_vm0, %v5072_v22, 0.0  ;;  %v5074_v26 = vpop.eup %5073 }
 0xf0e   : > { %1523 = vadd.xlane.f32.xlu1 %v1522_v23  ;;  %1532 = vadd.xlane.f32.xlu0 %v1531_v25  ;;  %v1525_v30 = vsel %vm620_vm0, %v5074_v26, 0.0 }
 0xf12   : > { %1526 = vadd.xlane.f32.xlu0 %v1525_v30 }
 0xf1f   : > { %1544 = vrot.lane.b32.xlu1 %v1429_v43, %s6268_s20 }
 0xf28   : > { %1546 = vrot.lane.b32.xlu0 %v5519_v40, %s6268_s20 }
 0xf97   : > { %v1530_v33 = vpop.xlane.xlu1 %1529 }
 0xf9b   : > { %v1524_v34 = vpop.xlane.xlu1 %1523  ;;  %v1533_v35 = vpop.xlane.xlu0 %1532 }
 0xf9c   : > { %5075 = vrcp.f32 %v1533_v35  ;;  %v4914_v35 = vld [vmem:[%s5589_s5 + $0x4] ss:$8 sps:$4 sm:$0xff]  }
 0xf9d   : > { %5077 = vrcp.f32 %v1524_v34  ;;  %v4897_v34 = vld [vmem:[%s6236_s10] sm:$0xff]  }
 0xf9e   : > { %5079 = vrcp.f32 %v1530_v33 }
 0xf9f   : > { %v1545_v29 = vpop.permute.xlu1 %1544  ;;  %v1527_v31 = vpop.xlane.xlu0 %1526 }
 0xfa0   : > { %5081 = vrcp.f32 %v1527_v31  ;;  %4600 = vmatprep.subr.bf16.mxu0 %v1545_v29  ;;  %v4898_v31 = vld [vmem:[%s6236_s10 + $0x48] sm:$0xff]  }
 0xfa1   : > { %4601 = vmatpush3.bf16.msra.mxu0 %v1545_v29 }
 0xfa3   : > { %v1547_v32 = vpop.permute.xlu0 %1546 }
 0xfa4   : > { %4602 = vmatprep.subr.bf16.mxu0 %v1547_v32 }
 0xfa5   : > { %4603 = vmatpush3.bf16.msra.mxu0 %v1547_v32  ;;  %v4899_v32 = vld [vmem:[%s6236_s10 + $0x8] sm:$0xff]  }
 0xfa6   : > { %4608 = vmatprep.subr.bf16.mxu0 %v5104_v3  ;;  %v5076_v36 = vpop.eup %5075 }
 0xfa7   : > { %v5078_v37 = vpop.eup %5077  ;;  %v1541_v40 = vmul.f32 %v5076_v36, %v5072_v22  ;;  %v1702_v22 = vrot.slane %v5481_v58, %v5388_v24  ;;  %v4900_v36 = vld [vmem:[%s6236_s10 + $0x50] sm:$0xff]  }
 0xfa8   : > { %v5080_v38 = vpop.eup %5079  ;;  %v1538_v41 = vmul.f32 %v5078_v37, %v5070_v18  ;;  %v4901_v37 = vld [vmem:[%s6236_s10 + $0x10] sm:$0xff]  }
 0xfa9   : > { %v1540_v43 = vmul.f32 %v5080_v38, %v5068_v14  ;;  %v4902_v38 = vld [vmem:[%s6236_s10 + $0x58] sm:$0xff]  }
 0xfaa   : > { %v5082_v39 = vpop.eup %5081 }
 0xfab   : > { %v1539_v42 = vmul.f32 %v5082_v39, %v5074_v26  ;;  %v1543_v28 = vpack.c.bf16 %v1541_v40, %v1540_v43  ;;  %v1707_v26 = vrot.slane %v5481_v58, %v5403_v47  ;;  %v4903_v39 = vld [vmem:[%s6236_s10 + $0x18] sm:$0xff]   ;;  %v4904_v40 = vld [vmem:[%s6236_s10 + $0x60] sm:$0xff]   ;;  %v4907_v43 = vld [vmem:[%s6236_s10 + $0x28] sm:$0xff]  }
 0xfad   : > { %v1542_v44 = vpack.c.bf16 %v1539_v42, %v1538_v41  ;;  %v4905_v41 = vld [vmem:[%s6236_s10 + $0x20] sm:$0xff]   ;;  %v4906_v42 = vld [vmem:[%s6236_s10 + $0x68] sm:$0xff]  }
 0xfaf   : > { %4604 = vmatprep.mubr.msk.bf16.mxu0 %vm620_vm0, %v1542_v44  ;;  %v4908_v44 = vld [vmem:[%s6236_s10 + $0x70] sm:$0xff]  }
 0xfb0   : > { %4605 = vmatmul.mubr.msk.bf16.vlgmr.msra.gmra.mrb[16].mxu0 %vm620_vm0, %v1543_v28  ;;  %v4909_v28 = vld [vmem:[%s6236_s10 + $0x30] sm:$0xff]  }
 0xfb1   : > { %4612 = vmatprep.mubr.msk.bf16.mxu0 %vm5105_vm4, %v5104_v3  ;;  %4609 = vmatpush3.bf16.msra.mxu0 %v4892_v45  ;;  %v4910_v45 = vld [vmem:[%s6236_s10 + $0x78] sm:$0xff]  }
 0xfb2   : > { %4610 = vmatprep.subr.bf16.mxu0 %v5104_v3 }
 0xfb5   : > { %4611 = vmatpush3.bf16.msra.mxu0 %v4893_v46  ;;  %v4911_v46 = vld [vmem:[%s6236_s10 + $0x38] sm:$0xff]  }
 0xfb6   : > { %4624 = vmatprep.subr.bf16.mxu0 %v5104_v3 }
0x1083   : > { %v4606_v49 = vpop.f32.mrb[16].mxu0 }
0x1084   : > { %v1590_v50 = vpop.f32.mrb[17].mxu0 }
0x1085   : > { %v4607_v51 = vpop.f32.mrb[18].mxu0 }
0x1086   : > { %1614 = vrot.lane.b32.xlu0 %v4607_v51, %s6269_s23  ;;  %v1593_v52 = vpop.f32.mrb[19].mxu0  ;;  %v4917_v51 = vld [vmem:[%s5589_s5 + $0x10] ss:$8 sps:$4 sm:$0xff]  }
0x1087   : > { %1606 = vrot.lane.b32.xlu1 %v1593_v52, %s6270_s25  ;;  %v4918_v52 = vld [vmem:[%s5589_s5 + $0x24] ss:$8 sps:$4 sm:$0xff]  }
0x108b   : > { %1610 = vrot.lane.b32.xlu1 %v4606_v49, %s6271_s30  ;;  %v4912_v49 = vld [vmem:[%s5589_s5] ss:$8 sps:$4 sm:$0xff]  }
0x10f8   : > { %v1615_v56 = vpop.permute.xlu0 %1614 }
0x10f9   : > { %v1607_v53 = vpop.permute.xlu1 %1606 }
0x10fa   : > { %v1617_v54 = vsel %vm805_vm3, %v1590_v50, %v1607_v53  ;;  %v4915_v50 = vld [vmem:[%s5589_s5 + $0x14] ss:$8 sps:$4 sm:$0xff]   ;;  %v4920_v53 = vld [vmem:[%s5589_s5 + $0x20] ss:$8 sps:$4 sm:$0xff]  }
0x10fd   : > { %v1611_v55 = vpop.permute.xlu1 %1610 }
0x10fe   : > { %v1618_v60 = vsel %vm987_vm5, %v1617_v54, %v1611_v55  ;;  %v4921_v54 = vld [vmem:[%s5589_s5 + $0x34] ss:$8 sps:$4 sm:$0xff]   ;;  %v4923_v55 = vld [vmem:[%s5589_s5 + $0x30] ss:$8 sps:$4 sm:$0xff]   ;;  %s5113_s5 = smov 80  }
0x10ff   : > { %v1619_v61 = vsel %vm989_vm6, %v1618_v60, %v1615_v56  ;;  %v4924_v56 = vld [vmem:[%s6235_s9 + $0x40] sm:$0xff]   ;;  %v4925_v60 = vld [vmem:[%s6235_s9 + $0x48] sm:$0xff]  }
0x1100   : > { %v1620_v59 = vpack.c.bf16 %v1619_v61, %v1619_v61  ;;  %v4926_v61 = vld [vmem:[%s6235_s9 + $0x50] sm:$0xff]  }
0x1102   : > { %4613 = vmatmul.mubr.msk.bf16.vlgmr.msra.gmra.mrb[20].mxu0 %vm620_vm0, %v1620_v59  ;;  %v4927_v59 = vld [vmem:[%s6235_s9 + $0x58] sm:$0xff]  }
0x1103   : > { %4640 = vmatprep.mubr.msk.bf16.mxu0 %vm5105_vm4, %v5104_v3  ;;  %4625 = vmatpush3.bf16.msra.mxu0 %v4924_v56 }
0x1104   : > { %4626 = vmatprep.subr.bf16.mxu0 %v5104_v3 }
0x1107   : > { %4627 = vmatpush3.bf16.msra.mxu0 %v4925_v60 }
0x1108   : > { %4628 = vmatprep.subr.bf16.mxu0 %v5104_v3 }
0x110b   : > { %4629 = vmatpush3.bf16.msra.mxu0 %v4926_v61 }
0x110c   : > { %4630 = vmatprep.subr.bf16.mxu0 %v5104_v3 }
0x110f   : > { %4631 = vmatpush3.bf16.msra.mxu0 %v4927_v59 }
0x1110   : > { %4632 = vmatprep.subr.bf16.mxu0 %v5104_v3 }
0x11d5   : > { %v1679_v63 = vpop.f32.mrb[20].mxu0 }
0x11d6   : > { %v1680_v1 = vadd.f32 %v1679_v63, %v1629_v62  ;;  %v4614_v5 = vpop.f32.mrb[21].mxu0  ;;  %v4928_v62 = vld [vmem:[%s6235_s9 + $0x60] sm:$0xff]   ;;  %v4929_v63 = vld [vmem:[%s6235_s9 + $0x68] sm:$0xff]  }
0x11d7   : > { %v1682_v20 = vpop.f32.mrb[22].mxu0  ;;  %4633 = vmatpush3.bf16.msra.mxu0 %v4928_v62  ;;  %v4931_v5 = vld [vmem:[%s6235_s9 + $0x78] sm:$0xff]  }
0x11d8   : > { %v4615_v4 = vpop.f32.mrb[23].mxu0  ;;  %v1685_v7 = vadd.f32 %v1680_v1, %v5491_v2  ;;  %v4895_v2 = vld [vmem:[%s6234_s8 + $0x18] sm:$0xff]   ;;  %4634 = vmatprep.subr.bf16.mxu0 %v5104_v3  ;;  %v4930_v1 = vld [vmem:[%s6235_s9 + $0x70] sm:$0xff]   ;;  %v1718_v20 = vrot.slane %v5481_v58, %v5406_v48 }
0x11d9   : > { %4619 = vmatpush3.bf16.msra.mxu1 %v4895_v2 }
0x11da   : > { %v1686_v6 = vsel %vm620_vm0, %v1685_v7, 0.0  ;;  %4369 = vmatprep.subr.bf16.mxu1 %v4896_v16 }
0x11db   : > { %1687 = vadd.xlane.f32.xlu1 %v1686_v6  ;;  %4635 = vmatpush3.bf16.msra.mxu0 %v4929_v63 }
0x11dc   : > { %4636 = vmatprep.subr.bf16.mxu0 %v5104_v3 }
0x11df   : > { %4637 = vmatpush3.bf16.msra.mxu0 %v4930_v1 }
0x11e0   : > { %4638 = vmatprep.subr.bf16.mxu0 %v5104_v3 }
0x11e3   : > { %4639 = vmatpush3.bf16.msra.mxu0 %v4931_v5 }
0x11e4   : > { %4644 = vmatprep.subr.bf16.mxu0 %v5104_v3 }
0x1268   : > { %v1688_v9 = vpop.xlane.xlu1 %1687 }
0x1269   : > { %v1689_v8 = vmul.f32 0.03125, %v1688_v9 }
0x126b   : > { %v1690_v10 = vsub.f32 %v1685_v7, %v1689_v8 }
0x126d   : > { %v1691_v11 = vmul.f32 %v1690_v10, %v1690_v10 }
0x126f   : > { %v1692_v12 = vsel %vm620_vm0, %v1691_v11, 0.0 }
0x1270   : > { %1693 = vadd.xlane.f32.xlu0 %v1692_v12 }
0x12fd   : > { %v1694_v14 = vpop.xlane.xlu0 %1693 }
0x12fe   : > { %v1695_v15 = vmul.f32 0.03125, %v1694_v14 }
0x1300   : > { %v1696_v18 = vadd.f32 1e-12, %v1695_v15 }
0x1302   : > { %5083 = vrsqrt.f32 %v1696_v18 }
0x130c   : > { %v5084_v23 = vpop.eup %5083 }
0x130d   : > { %v1698_v25 = vmul.f32 %v5084_v23, %v1690_v10 }
0x130f   : > { %v1703_v30 = vmul.f32 %v1702_v22, %v1698_v25  ;;  %v5693_v22 = vld [vmem:[%s6240_s14] sm:$0xff] }
0x1310   : > { %v2027_v25 = vrot.slane %v5693_v22, %v5255_v19 }
0x1311   : > { %v5595_v33 = vadd.f32 %v1707_v26, %v1703_v30 }
0x1313   : > { %v1709_v29 = vpack.c.bf16 %v5595_v33, %v5595_v33 }
0x1315   : > { %4621 = vmatmul.mubr.msk.bf16.vlgmr.msra.gmra.mrb[16].mxu1 %vm620_vm0, %v1709_v29 }
0x1316   : > { %4370 = vmatpush3.bf16.msra.mxu1 %v4897_v34  ;;  %2196 = vmatprep.mubr.bf16.mxu1 %v4914_v35 }
0x1317   : > { %4371 = vmatprep.subr.bf16.mxu1 %v4898_v31 }
0x131a   : > { %4372 = vmatpush3.bf16.msra.mxu1 %v4899_v32 }
0x131b   : > { %4373 = vmatprep.subr.bf16.mxu1 %v4900_v36 }
0x131e   : > { %4374 = vmatpush3.bf16.msra.mxu1 %v4901_v37 }
0x131f   : > { %4375 = vmatprep.subr.bf16.mxu1 %v4902_v38 }
0x1322   : > { %4376 = vmatpush3.bf16.msra.mxu1 %v4903_v39 }
0x1323   : > { %4377 = vmatprep.subr.bf16.mxu1 %v4904_v40 }
0x1326   : > { %4378 = vmatpush3.bf16.msra.mxu1 %v4905_v41 }
0x1327   : > { %4379 = vmatprep.subr.bf16.mxu1 %v4906_v42 }
0x132a   : > { %4380 = vmatpush3.bf16.msra.mxu1 %v4907_v43 }
0x132b   : > { %4381 = vmatprep.subr.bf16.mxu1 %v4908_v44 }
0x132e   : > { %4382 = vmatpush3.bf16.msra.mxu1 %v4909_v28 }
0x132f   : > { %4383 = vmatprep.subr.bf16.mxu1 %v4910_v45 }
0x1332   : > { %4384 = vmatpush3.bf16.msra.mxu1 %v4911_v46 }
0x1333   : > { %4688 = vmatprep.subr.bf16.mxu1 %v5104_v3 }
0x1335   : > { %2197 = vmatmul.mubr.bf16.vlgmr.msra.gmra.mrb[20].mxu1 %v4912_v49 }
0x1336   : > { %2204 = vmatprep.mubr.bf16.mxu1 %v4915_v50 }
0x133d   : > { %2205 = vmatmul.mubr.bf16.gmra.mrb[24].mxu1 %v4917_v51 }
0x133e   : > { %2212 = vmatprep.mubr.bf16.mxu1 %v4918_v52 }
0x1345   : > { %2213 = vmatmul.mubr.bf16.gmra.mrb[28].mxu1 %v4920_v53 }
0x1346   : > { %2220 = vmatprep.mubr.bf16.mxu1 %v4921_v54 }
0x134d   : > { %2221 = vmatmul.mubr.bf16.gmra.mrb[32].mxu1 %v4923_v55 }
0x134e   : > { %4690 = vmatprep.mubr.msk.bf16.mxu1 %vm5105_vm4, %v5104_v3 }
0x13e8   : > { %v1768_v4 = vpop.f32.mrb[16].mxu1 }
0x13e9   : > { %v1769_v7 = vadd.f32 %v1768_v4, %v1718_v20  ;;  %v4622_v6 = vpop.f32.mrb[17].mxu1 }
0x13ea   : > { %v1771_v9 = vpop.f32.mrb[18].mxu1 }
0x13eb   : > { %v1774_v8 = vmul.f32 %v1769_v7, %v1769_v7  ;;  %v4623_v10 = vpop.f32.mrb[19].mxu1 }
0x13ed   : > { %v1775_v11 = vmul.f32 %v1774_v8, %v1769_v7 }
0x13ef   : > { %v1776_v12 = vmul.f32 0.044715, %v1775_v11 }
0x13f1   : > { %v1777_v13 = vadd.f32 %v1776_v12, %v1769_v7 }
0x13f3   : > { %v1778_v2 = vmul.f32 0.7978846, %v1777_v13  ;;  %v4932_v13 = vld [vmem:[%s6237_s11] sm:$0xff]  }
0x13f5   : > { %5085 = vtanh.f32 %v1778_v2  ;;  %v4933_v2 = vld [vmem:[%s6237_s11 + $0x8] sm:$0xff]  }
0x13ff   : > { %v5086_v16 = vpop.eup %5085 }
0x1400   : > { %v1780_v14 = vadd.f32 1.0, %v5086_v16  ;;  %v4934_v16 = vld [vmem:[%s6237_s11 + $0x10] sm:$0xff]  }
0x1402   : > { %v1781_v15 = vmul.f32 0.5, %v1780_v14  ;;  %v4935_v14 = vld [vmem:[%s6237_s11 + $0x18] sm:$0xff]  }
0x1404   : > { %v1782_v18 = vmul.f32 %v1781_v15, %v1769_v7  ;;  %v4936_v15 = vld [vmem:[%s6237_s11 + $0x20] sm:$0xff]  }
0x1406   : > { %v1783_v58 = vpack.c.bf16 %v1782_v18, %v1782_v18  ;;  %v4937_v18 = vld [vmem:[%s6237_s11 + $0x28] sm:$0xff]  }
0x1408   : > { %v4385_v23 = vpop.f32.mrb[20].mxu1  ;;  %4641 = vmatmul.mubr.bf16.vlgmr.msra.gmra.mrb[24].mxu0 %v1783_v58  ;;  %v4938_v58 = vld [vmem:[%s6237_s11 + $0x30] sm:$0xff]  }
0x1409   : > { %v4386_v26 = vpop.f32.mrb[21].mxu1  ;;  %4652 = vmatprep.mubr.msk.bf16.mxu0 %vm5105_vm4, %v5104_v3 }
0x140a   : > { %v4387_v30 = vadd.f32 %v4386_v26, %v4385_v23  ;;  %v4388_v34 = vpop.f32.mrb[22].mxu1  ;;  %v4939_v23 = vld [vmem:[%s6237_s11 + $0x38] sm:$0xff]   ;;  %v4941_v26 = vld [vmem:[%s6239_s13] sm:$0xff]  }
0x140b   : > { %v4389_v35 = vpop.f32.mrb[23].mxu1  ;;  %4689 = vmatpush3.bf16.msra.mxu1 %v4941_v26 }
0x140c   : > { %v2199_v29 = vadd.f32 %v4387_v30, %v2027_v25  ;;  %v4390_v31 = vadd.f32 %v4389_v35, %v4388_v34  ;;  %4694 = vmatprep.subr.bf16.mxu1 %v5104_v3 }
0x140e   : > { %v2202_v32 = vadd.f32 %v4390_v31, %v2027_v25  ;;  %v2229_v36 = vmax.f32 %v2199_v29, 0.0 }
0x1410   : > { %v2230_v37 = vmax.f32 %v2202_v32, 0.0  ;;  %v4391_v38 = vpop.f32.mrb[24].mxu1 }
0x1411   : > { %v4392_v39 = vpop.f32.mrb[25].mxu1 }
0x1412   : > { %v2255_v40 = vpack.c.bf16 %v2230_v37, %v2229_v36  ;;  %v4393_v41 = vadd.f32 %v4392_v39, %v4391_v38  ;;  %v4394_v42 = vpop.f32.mrb[26].mxu1 }
0x1413   : > { %v4395_v43 = vpop.f32.mrb[27].mxu1 }
0x1414   : > { %v2207_v44 = vadd.f32 %v4393_v41, %v2027_v25  ;;  %v4396_v28 = vadd.f32 %v4395_v43, %v4394_v42  ;;  %4645 = vmatpush3.bf16.msra.mxu0 %v2255_v40 }
0x1415   : > { %4646 = vmatprep.subr.bf16.mxu0 %v5104_v3 }
0x1416   : > { %v2210_v45 = vadd.f32 %v4396_v28, %v2027_v25  ;;  %v2231_v46 = vmax.f32 %v2207_v44, 0.0 }
0x1418   : > { %v2232_v49 = vmax.f32 %v2210_v45, 0.0  ;;  %v4397_v50 = vpop.f32.mrb[28].mxu1 }
0x1419   : > { %v4398_v51 = vpop.f32.mrb[29].mxu1 }
0x141a   : > { %v2256_v52 = vpack.c.bf16 %v2232_v49, %v2231_v46  ;;  %v4399_v53 = vadd.f32 %v4398_v51, %v4397_v50  ;;  %v4400_v54 = vpop.f32.mrb[30].mxu1 }
0x141b   : > { %v4401_v55 = vpop.f32.mrb[31].mxu1 }
0x141c   : > { %v2215_v56 = vadd.f32 %v4399_v53, %v2027_v25  ;;  %v4402_v60 = vadd.f32 %v4401_v55, %v4400_v54  ;;  %4647 = vmatpush3.bf16.msra.mxu0 %v2256_v52 }
0x141d   : > { %4648 = vmatprep.subr.bf16.mxu0 %v5104_v3 }
0x141e   : > { %v2218_v61 = vadd.f32 %v4402_v60, %v2027_v25  ;;  %v2233_v59 = vmax.f32 %v2215_v56, 0.0 }
0x1420   : > { %v2234_v62 = vmax.f32 %v2218_v61, 0.0  ;;  %v4403_v63 = vpop.f32.mrb[32].mxu1 }
0x1421   : > { %v4404_v1 = vpop.f32.mrb[33].mxu1 }
0x1422   : > { %v2257_v5 = vpack.c.bf16 %v2234_v62, %v2233_v59  ;;  %v4405_v20 = vadd.f32 %v4404_v1, %v4403_v63  ;;  %v4406_v4 = vpop.f32.mrb[34].mxu1 }
0x1423   : > { %v4407_v7 = vpop.f32.mrb[35].mxu1 }
0x1424   : > { %v2223_v6 = vadd.f32 %v4405_v20, %v2027_v25  ;;  %v4408_v9 = vadd.f32 %v4407_v7, %v4406_v4  ;;  %4649 = vmatpush3.bf16.msra.mxu0 %v2257_v5 }
0x1425   : > { %4650 = vmatprep.subr.bf16.mxu0 %v5104_v3 }
0x1426   : > { %v2226_v8 = vadd.f32 %v4408_v9, %v2027_v25  ;;  %v2235_v10 = vmax.f32 %v2223_v6, 0.0  ;;  %v4940_v25 = vld [vmem:[%s6237_s11 + $0x40] sm:$0xff]  }
0x1428   : > { %v2236_v11 = vmax.f32 %v2226_v8, 0.0 }
0x142a   : > { %v2258_v12 = vpack.c.bf16 %v2236_v11, %v2235_v10 }
0x142c   : > { %4651 = vmatpush3.bf16.msra.mxu0 %v2258_v12 }
0x142d   : > { %4732 = vmatprep.subr.bf16.mxu0 %v5104_v3 }
0x142f   : > { %4653 = vmatmul.mubr.msk.bf16.vlgmr.msra.gmra.mrb[28].mxu0 %vm664_vm1, %v4932_v13 }
0x1430   : > { %4656 = vmatprep.mubr.msk.bf16.mxu0 %vm5105_vm4, %v5104_v3 }
0x1437   : > { %4657 = vmatmul.mubr.msk.bf16.gmra.mrb[32].mxu0 %vm664_vm1, %v4933_v2 }
0x1438   : > { %4660 = vmatprep.mubr.msk.bf16.mxu0 %vm5105_vm4, %v5104_v3 }
0x143f   : > { %4661 = vmatmul.mubr.msk.bf16.gmra.mrb[36].mxu0 %vm664_vm1, %v4934_v16 }
0x1440   : > { %4664 = vmatprep.mubr.msk.bf16.mxu0 %vm5105_vm4, %v5104_v3 }
0x1447   : > { %4665 = vmatmul.mubr.msk.bf16.gmra.mrb[40].mxu0 %vm664_vm1, %v4935_v14 }
0x1448   : > { %4668 = vmatprep.mubr.msk.bf16.mxu0 %vm5105_vm4, %v5104_v3 }
0x144f   : > { %4669 = vmatmul.mubr.msk.bf16.gmra.mrb[44].mxu0 %vm664_vm1, %v4936_v15 }
0x1450   : > { %4672 = vmatprep.mubr.msk.bf16.mxu0 %vm5105_vm4, %v5104_v3 }
0x1457   : > { %4673 = vmatmul.mubr.msk.bf16.gmra.mrb[48].mxu0 %vm664_vm1, %v4937_v18 }
0x1458   : > { %4676 = vmatprep.mubr.msk.bf16.mxu0 %vm5105_vm4, %v5104_v3 }
0x145f   : > { %4677 = vmatmul.mubr.msk.bf16.gmra.mrb[52].mxu0 %vm664_vm1, %v4938_v58 }
0x1460   : > { %4680 = vmatprep.mubr.msk.bf16.mxu0 %vm5105_vm4, %v5104_v3 }
0x1467   : > { %4681 = vmatmul.mubr.msk.bf16.gmra.mrb[56].mxu0 %vm664_vm1, %v4939_v23 }
0x1468   : > { %4684 = vmatprep.mubr.msk.bf16.mxu0 %vm5105_vm4, %v5104_v3 }
0x146f   : > { %4685 = vmatmul.mubr.msk.bf16.gmra.mrb[60].mxu0 %vm664_vm1, %v4940_v25 }
0x1470   : > { %4742 = vmatprep.mubr.msk.bf16.mxu0 %vm5105_vm4, %v5104_v3 }
0x14db   : > { %v5761_v30 = vpop.f32.mrb[24].mxu0 }
0x14dc   : > { %v4642_v34 = vpop.f32.mrb[25].mxu0 }
0x14dd   : > { %v1890_v35 = vpop.f32.mrb[26].mxu0 }
0x14de   : > { %v4643_v29 = vpop.f32.mrb[27].mxu0 }
0x1502   : > { %v2365_v31 = vpop.f32.mrb[28].mxu0 }
0x1503   : > { %v4654_v32 = vpop.f32.mrb[29].mxu0 }
0x1504   : > { %v2368_v36 = vpop.f32.mrb[30].mxu0 }
0x1505   : > { %v4655_v37 = vpop.f32.mrb[31].mxu0 }
0x1506   : > { %v2456_v37 = vrot.slane %v5693_v22, %v5263_v21 }
0x150a   : > { %v2373_v38 = vpop.f32.mrb[32].mxu0 }
0x150b   : > { %v2436_v39 = vmax.f32 %v2365_v31, %v2373_v38  ;;  %v4658_v40 = vpop.f32.mrb[33].mxu0 }
0x150c   : > { %v2376_v41 = vpop.f32.mrb[34].mxu0 }
0x150d   : > { %v2437_v42 = vmax.f32 %v2368_v36, %v2376_v41  ;;  %v4659_v43 = vpop.f32.mrb[35].mxu0 }
0x1512   : > { %v2381_v44 = vpop.f32.mrb[36].mxu0 }
0x1513   : > { %v2438_v28 = vmax.f32 %v2436_v39, %v2381_v44  ;;  %v4662_v45 = vpop.f32.mrb[37].mxu0 }
0x1514   : > { %v2384_v46 = vpop.f32.mrb[38].mxu0 }
0x1515   : > { %v2439_v49 = vmax.f32 %v2437_v42, %v2384_v46  ;;  %v4663_v50 = vpop.f32.mrb[39].mxu0  ;;  %v4942_v46 = vld [vmem:[%s6238_s12] sm:$0xff]  }
0x1516   : > { %v4944_v50 = vld [vmem:[%s6238_s12 + $0x10] sm:$0xff]  }
0x151a   : > { %v2389_v51 = vpop.f32.mrb[40].mxu0 }
0x151b   : > { %v2440_v52 = vmax.f32 %v2438_v28, %v2389_v51  ;;  %v4666_v53 = vpop.f32.mrb[41].mxu0  ;;  %v4945_v51 = vld [vmem:[%s6238_s12 + $0x18] sm:$0xff]  }
0x151c   : > { %v2392_v54 = vpop.f32.mrb[42].mxu0  ;;  %v4947_v53 = vld [vmem:[%s6238_s12 + $0x28] sm:$0xff]  }
0x151d   : > { %v2441_v55 = vmax.f32 %v2439_v49, %v2392_v54  ;;  %v4667_v56 = vpop.f32.mrb[43].mxu0  ;;  %v4943_v49 = vld [vmem:[%s6238_s12 + $0x8] sm:$0xff]   ;;  %v4948_v54 = vld [vmem:[%s6238_s12 + $0x30] sm:$0xff]  }
0x151e   : > { %v4950_v56 = vld [vmem:[%s6238_s12 + $0x40] sm:$0xff]  }
0x1522   : > { %v2397_v60 = vpop.f32.mrb[44].mxu0 }
0x1523   : > { %v2442_v61 = vmax.f32 %v2440_v52, %v2397_v60  ;;  %v4670_v59 = vpop.f32.mrb[45].mxu0  ;;  %v4946_v52 = vld [vmem:[%s6238_s12 + $0x20] sm:$0xff]   ;;  %v4951_v60 = vld [vmem:[%s6239_s13 + $0x8] sm:$0xff]  }
0x1524   : > { %v2400_v62 = vpop.f32.mrb[46].mxu0  ;;  %4733 = vmatpush3.bf16.msra.mxu0 %v4951_v60 }
0x1525   : > { %v2443_v63 = vmax.f32 %v2441_v55, %v2400_v62  ;;  %v4671_v1 = vpop.f32.mrb[47].mxu0  ;;  %v4949_v55 = vld [vmem:[%s6238_s12 + $0x38] sm:$0xff]   ;;  %4734 = vmatprep.subr.bf16.mxu0 %v5104_v3 }
0x152a   : > { %v2405_v5 = vpop.f32.mrb[48].mxu0 }
0x152b   : > { %v2444_v20 = vmax.f32 %v2442_v61, %v2405_v5  ;;  %v4674_v4 = vpop.f32.mrb[49].mxu0 }
0x152c   : > { %v2408_v7 = vpop.f32.mrb[50].mxu0  ;;  %v4952_v4 = vld [vmem:[%s6239_s13 + $0x10] sm:$0xff]  }
0x152d   : > { %v2445_v6 = vmax.f32 %v2443_v63, %v2408_v7  ;;  %v4675_v9 = vpop.f32.mrb[51].mxu0  ;;  %4735 = vmatpush3.bf16.msra.mxu0 %v4952_v4 }
0x152e   : > { %4736 = vmatprep.subr.bf16.mxu0 %v5104_v3 }
0x1532   : > { %v2413_v8 = vpop.f32.mrb[52].mxu0 }
0x1533   : > { %v2446_v10 = vmax.f32 %v2444_v20, %v2413_v8  ;;  %v4678_v11 = vpop.f32.mrb[53].mxu0 }
0x1534   : > { %v2416_v12 = vpop.f32.mrb[54].mxu0  ;;  %v4953_v11 = vld [vmem:[%s6239_s13 + $0x18] sm:$0xff]  }
0x1535   : > { %v2447_v13 = vmax.f32 %v2445_v6, %v2416_v12  ;;  %v4679_v2 = vpop.f32.mrb[55].mxu0  ;;  %4737 = vmatpush3.bf16.msra.mxu0 %v4953_v11 }
0x1536   : > { %4738 = vmatprep.subr.bf16.mxu0 %v5104_v3 }
0x153a   : > { %v2421_v16 = vpop.f32.mrb[56].mxu0 }
0x153b   : > { %v2448_v14 = vmax.f32 %v2446_v10, %v2421_v16  ;;  %v4682_v15 = vpop.f32.mrb[57].mxu0 }
0x153c   : > { %v2424_v18 = vpop.f32.mrb[58].mxu0 }
0x153d   : > { %v2449_v58 = vmax.f32 %v2447_v13, %v2424_v18  ;;  %v4683_v23 = vpop.f32.mrb[59].mxu0 }
0x1542   : > { %v2429_v25 = vpop.f32.mrb[60].mxu0 }
0x1543   : > { %v5763_v26 = vmax.f32 %v2448_v14, %v2429_v25  ;;  %v4686_v34 = vpop.f32.mrb[61].mxu0 }
0x1544   : > { %v2432_v35 = vpop.f32.mrb[62].mxu0  ;;  %v4954_v34 = vld [vmem:[%s6239_s13 + $0x20] sm:$0xff]  }
0x1545   : > { %v5765_v29 = vmax.f32 %v2449_v58, %v2432_v35  ;;  %v4687_v31 = vpop.f32.mrb[63].mxu0  ;;  %4739 = vmatpush3.bf16.msra.mxu0 %v4954_v34 }
0x1546   : > { %4740 = vmatprep.subr.bf16.mxu0 %v5104_v3 }
0x1547   : > { %v4859_v32 = vpack.i.bf16 %v5765_v29, %v5763_v26  ;;  %v2452_v36 = vpack.c.bf16 %v5765_v29, %v5763_v26 }
0x1549   : > { %4691 = vmatmul.mubr.msk.bf16.vlgmr.msra.gmra.mrb[36].mxu1 %vm987_vm5, %v2452_v36 }
0x154a   : > { %4696 = vmatprep.mubr.msk.bf16.mxu1 %vm5105_vm4, %v5104_v3 }
0x161c   : > { %v2500_v38 = vpop.f32.mrb[36].mxu1 }
0x161d   : > { %v2501_v39 = vadd.f32 %v2500_v38, %v2456_v37  ;;  %v4692_v40 = vpop.f32.mrb[37].mxu1 }
0x161e   : > { %v2503_v41 = vpop.f32.mrb[38].mxu1 }
0x161f   : > { %v2504_v42 = vadd.f32 %v2503_v41, %v2456_v37  ;;  %v4693_v43 = vpop.f32.mrb[39].mxu1  ;;  %v2507_v44 = vmax.f32 %v2501_v39, 0.0 }
0x1621   : > { %v2508_v28 = vmax.f32 %v2504_v42, 0.0 }
0x1623   : > { %v2509_v45 = vpack.c.bf16 %v2508_v28, %v2507_v44 }
0x1625   : > { %4695 = vmatpush3.bf16.msra.mxu1 %v2509_v45  ;;  %v4955_v45 = vld [vmem:[%s6239_s13 + $0x28] ss:$0 sps:$4 sm:$0xff]  }
0x1628   : > { %4697 = vmatmul.mubr.msk.bf16.vlgmr.msra.gmra.mrb[40].mxu1 %vm987_vm5, %v4942_v46  ;;  %v2808_v46 = vsel %vm2806_vm7, %v4955_v45, 0 }
0x1629   : > { %4700 = vmatprep.mubr.msk.bf16.mxu1 %vm5105_vm4, %v5104_v3  ;;  %4741 = vmatpush3.bf16.msra.mxu0 %v2808_v46 }
0x162a   : > { %4746 = vmatprep.subr.bf16.mxu0 %v5104_v3 }
0x1630   : > { %4701 = vmatmul.mubr.msk.bf16.gmra.mrb[44].mxu1 %vm987_vm5, %v4943_v49 }
0x1631   : > { %4704 = vmatprep.mubr.msk.bf16.mxu1 %vm5105_vm4, %v5104_v3 }
0x1638   : > { %4705 = vmatmul.mubr.msk.bf16.gmra.mrb[48].mxu1 %vm987_vm5, %v4944_v50 }
0x1639   : > { %4708 = vmatprep.mubr.msk.bf16.mxu1 %vm5105_vm4, %v5104_v3 }
0x1640   : > { %4709 = vmatmul.mubr.msk.bf16.gmra.mrb[52].mxu1 %vm987_vm5, %v4945_v51 }
0x1641   : > { %4712 = vmatprep.mubr.msk.bf16.mxu1 %vm5105_vm4, %v5104_v3 }
0x1648   : > { %4713 = vmatmul.mubr.msk.bf16.gmra.mrb[56].mxu1 %vm987_vm5, %v4946_v52 }
0x1649   : > { %4716 = vmatprep.mubr.msk.bf16.mxu1 %vm5105_vm4, %v5104_v3 }
0x1650   : > { %4717 = vmatmul.mubr.msk.bf16.gmra.mrb[60].mxu1 %vm987_vm5, %v4947_v53 }
0x1651   : > { %4720 = vmatprep.mubr.msk.bf16.mxu1 %vm5105_vm4, %v5104_v3 }
0x1658   : > { %4721 = vmatmul.mubr.msk.bf16.gmra.mrb[64].mxu1 %vm987_vm5, %v4948_v54 }
0x1659   : > { %4724 = vmatprep.mubr.msk.bf16.mxu1 %vm5105_vm4, %v5104_v3 }
0x1660   : > { %4725 = vmatmul.mubr.msk.bf16.gmra.mrb[68].mxu1 %vm987_vm5, %v4949_v55 }
0x1661   : > { %4728 = vmatprep.mubr.msk.bf16.mxu1 %vm5105_vm4, %v5104_v3 }
0x1668   : > { %4729 = vmatmul.mubr.msk.bf16.gmra.mrb[72].mxu1 %vm987_vm5, %v4950_v56 }
0x16fb   : > { %v5832_v61 = vpop.f32.mrb[40].mxu1 }
0x16fc   : > { %v4698_v59 = vpop.f32.mrb[41].mxu1 }
0x16fd   : > { %v5834_v62 = vpop.f32.mrb[42].mxu1 }
0x16fe   : > { %v4699_v63 = vpop.f32.mrb[43].mxu1 }
0x1703   : > { %v2624_v1 = vpop.f32.mrb[44].mxu1 }
0x1704   : > { %v4702_v5 = vpop.f32.mrb[45].mxu1 }
0x1705   : > { %v2627_v20 = vpop.f32.mrb[46].mxu1 }
0x1706   : > { %v4819_v7 = vpack.i.bf16 %v2627_v20, %v2624_v1  ;;  %v4703_v6 = vpop.f32.mrb[47].mxu1 }
0x1708   : > { %4820 = vrot.lane.b32.xlu0 %v4819_v7, %s6270_s25 }
0x170b   : > { %v2632_v9 = vpop.f32.mrb[48].mxu1 }
0x170c   : > { %v4706_v8 = vpop.f32.mrb[49].mxu1 }
0x170d   : > { %v2635_v10 = vpop.f32.mrb[50].mxu1 }
0x170e   : > { %v4824_v12 = vpack.i.bf16 %v2635_v10, %v2632_v9  ;;  %v4707_v13 = vpop.f32.mrb[51].mxu1 }
0x1710   : > { %4825 = vrot.lane.b32.xlu1 %v4824_v12, %s6271_s30 }
0x1713   : > { %v2640_v2 = vpop.f32.mrb[52].mxu1 }
0x1714   : > { %v4710_v16 = vpop.f32.mrb[53].mxu1 }
0x1715   : > { %v2643_v14 = vpop.f32.mrb[54].mxu1 }
0x1716   : > { %v4829_v15 = vpack.i.bf16 %v2643_v14, %v2640_v2  ;;  %v4711_v18 = vpop.f32.mrb[55].mxu1 }
0x1718   : > { %4830 = vrot.lane.b32.xlu1 %v4829_v15, %s6269_s23  ;;  %s5109_s23 = smov 40  }
0x171b   : > { %v2648_v58 = vpop.f32.mrb[56].mxu1 }
0x171c   : > { %v4714_v23 = vpop.f32.mrb[57].mxu1 }
0x171d   : > { %v2651_v25 = vpop.f32.mrb[58].mxu1 }
0x171e   : > { %v4834_v35 = vpack.i.bf16 %v2651_v25, %v2648_v58  ;;  %v4715_v31 = vpop.f32.mrb[59].mxu1 }
0x1720   : > { %4835 = vrot.lane.b32.xlu0 %v4834_v35, %s6273_s21 }
0x1723   : > { %v2656_v36 = vpop.f32.mrb[60].mxu1 }
0x1724   : > { %v4718_v37 = vpop.f32.mrb[61].mxu1 }
0x1725   : > { %v2659_v38 = vpop.f32.mrb[62].mxu1 }
0x1726   : > { %v4839_v39 = vpack.i.bf16 %v2659_v38, %v2656_v36  ;;  %v4719_v40 = vpop.f32.mrb[63].mxu1 }
0x1728   : > { %4840 = vrot.lane.b32.xlu1 %v4839_v39, %s5109_s23 }
0x172b   : > { %v2664_v41 = vpop.f32.mrb[64].mxu1 }
0x172c   : > { %v4722_v42 = vpop.f32.mrb[65].mxu1 }
0x172d   : > { %v2667_v43 = vpop.f32.mrb[66].mxu1 }
0x172e   : > { %v4844_v44 = vpack.i.bf16 %v2667_v43, %v2664_v41  ;;  %v4723_v28 = vpop.f32.mrb[67].mxu1 }
0x1730   : > { %4845 = vrot.lane.b32.xlu0 %v4844_v44, %s5110_s4 }
0x1733   : > { %v2672_v49 = vpop.f32.mrb[68].mxu1 }
0x1734   : > { %v4726_v50 = vpop.f32.mrb[69].mxu1 }
0x1735   : > { %v2675_v51 = vpop.f32.mrb[70].mxu1  ;;  %v4957_v50 = vld [vmem:[%s6239_s13 + $0x34] ss:$0 sps:$4 sm:$0xff]  }
0x1736   : > { %v4849_v52 = vpack.i.bf16 %v2675_v51, %v2672_v49  ;;  %v4727_v53 = vpop.f32.mrb[71].mxu1  ;;  %v4956_v49 = vld [vmem:[%s6239_s13 + $0x2c] sm:$0xff]   ;;  %v2881_v51 = vsel %vm2806_vm7, %v4957_v50, 0 }
0x1738   : > { %4850 = vrot.lane.b32.xlu1 %v4849_v52, %s5111_s0  ;;  %v2774_v52 = vrot.slane %v5693_v22, %v5388_v24 }
0x173b   : > { %v2680_v54 = vpop.f32.mrb[72].mxu1 }
0x173c   : > { %4860 = vrot.lane.b32.xlu1 %v4859_v32, %s6270_s25  ;;  %v4730_v55 = vpop.f32.mrb[73].mxu1  ;;  %s6276_s25 = sshll.u32 %s5221_s29, 3 }
0x173d   : > { %v2683_v56 = vpop.f32.mrb[74].mxu1 }
0x173e   : > { %v4854_v60 = vpack.i.bf16 %v2683_v56, %v2680_v54  ;;  %v4731_v59 = vpop.f32.mrb[75].mxu1 }
0x1740   : > { %4855 = vrot.lane.b32.xlu0 %v4854_v60, %s6274_s19 }
0x177a   : > { %v4821_v1 = vpop.permute.xlu0 %4820 }
0x177b   : > { %v4823_v7 = vunpack.i.h.bf16 %v4821_v1  ;;  %v4822_v6 = vunpack.i.l.bf16 %v4821_v1 }
0x177d   : > { %v2752_v13 = vsel %vm805_vm3, %v5834_v62, %v4823_v7  ;;  %v2751_v2 = vsel %vm805_vm3, %v5832_v61, %v4822_v6 }
0x1782   : > { %v4826_v63 = vpop.permute.xlu1 %4825 }
0x1783   : > { %v4828_v9 = vunpack.i.h.bf16 %v4826_v63  ;;  %v4827_v8 = vunpack.i.l.bf16 %v4826_v63 }
0x1785   : > { %v2754_v15 = vsel %vm987_vm5, %v2752_v13, %v4828_v9  ;;  %v2753_v18 = vsel %vm987_vm5, %v2751_v2, %v4827_v8  ;;  %v4958_v8 = vld [vmem:[%s6239_s13 + $0x38] sm:$0xff]  }
0x178a   : > { %v4831_v5 = vpop.permute.xlu1 %4830 }
0x178b   : > { %v4833_v10 = vunpack.i.h.bf16 %v4831_v5  ;;  %v4832_v11 = vunpack.i.l.bf16 %v4831_v5 }
0x178d   : > { %v2756_v25 = vsel %vm989_vm6, %v2754_v15, %v4833_v10  ;;  %v2755_v34 = vsel %vm989_vm6, %v2753_v18, %v4832_v11  ;;  %v4959_v10 = vld [vmem:[%s6239_s13 + $0x40] sm:$0xff]   ;;  %v2867_v11 = vrot.slane %v5693_v22, %v5403_v47  ;;  %v2930_v18 = vrot.slane %v5693_v22, %v5406_v48 }
0x1792   : > { %v4836_v20 = vpop.permute.xlu0 %4835 }
0x1793   : > { %v4838_v26 = vunpack.i.h.bf16 %v4836_v20  ;;  %v4837_v29 = vunpack.i.l.bf16 %v4836_v20 }
0x1795   : > { %v2758_v36 = vsel %vm620_vm0, %v2756_v25, %v4838_v26  ;;  %v2757_v62 = vsel %vm620_vm0, %v2755_v34, %v4837_v29 }
0x179a   : > { %v4841_v4 = vpop.permute.xlu1 %4840 }
0x179b   : > { %v4843_v16 = vunpack.i.h.bf16 %v4841_v4  ;;  %v4842_v14 = vunpack.i.l.bf16 %v4841_v4 }
0x179d   : > { %v2761_v61 = vsel %vm2759_vm8, %v2758_v36, %v4843_v16  ;;  %v2760_v37 = vsel %vm2759_vm8, %v2757_v62, %v4842_v14 }
0x17a2   : > { %v4846_v12 = vpop.permute.xlu0 %4845 }
0x17a3   : > { %v4848_v58 = vunpack.i.h.bf16 %v4846_v12  ;;  %v4847_v23 = vunpack.i.l.bf16 %v4846_v12 }
0x17a5   : > { %v2764_v39 = vsel %vm2762_vm9, %v2761_v61, %v4848_v58  ;;  %v2763_v40 = vsel %vm2762_vm9, %v2760_v37, %v4847_v23  ;;  %v4960_v61 = vld [vmem:[%s6238_s12 + $0x48] sm:$0xff]   ;;  %v4961_v37 = vld [vmem:[%s6238_s12 + $0x50] sm:$0xff]  }
0x17aa   : > { %v4851_v32 = vpop.permute.xlu1 %4850 }
0x17ab   : > { %v4853_v35 = vunpack.i.h.bf16 %v4851_v32  ;;  %v4852_v31 = vunpack.i.l.bf16 %v4851_v32 }
0x17ad   : > { %v2767_v43 = vsel %vm2765_vm10, %v2764_v39, %v4853_v35  ;;  %v2766_v44 = vsel %vm2765_vm10, %v2763_v40, %v4852_v31  ;;  %v4963_v39 = vld [vmem:[%s6239_s13 + $0x48] sm:$0xff]   ;;  %v5112_v40 = vmov 0  }
0x17ae   : > { %v4861_v56 = vpop.permute.xlu1 %4860  ;;  %3169 = vmatprep.subr.bf16.mxu1 %v5112_v40 }
0x17af   : > { %v4863_v5 = vunpack.i.h.bf16 %v4861_v56  ;;  %v4862_v20 = vunpack.i.l.bf16 %v4861_v56  ;;  %3170 = vmatpush1.bf16.msra.mxu1 %v4963_v39 }
0x17b0   : > { %3171 = vmatprep.subr.bf16.mxu1 %v5112_v40 }
0x17b2   : > { %v4856_v38 = vpop.permute.xlu0 %4855 }
0x17b3   : > { %v4858_v41 = vunpack.i.h.bf16 %v4856_v38  ;;  %v4857_v42 = vunpack.i.l.bf16 %v4856_v38  ;;  %v4962_v38 = vld [vmem:[%s6238_s12 + $0x58] ss:$0 sps:$4 sm:$0xff]  }
0x17b5   : > { %v2769_v28 = vsel %vm664_vm1, %v2767_v43, %v4858_v41  ;;  %v2768_v45 = vsel %vm664_vm1, %v2766_v44, %v4857_v42  ;;  %v4964_v41 = vld [vmem:[%s6239_s13 + $0x50] sm:$0xff]   ;;  %v4965_v42 = vld [vmem:[%s6239_s13 + $0x58] sm:$0xff]   ;;  %v4966_v43 = vld [vmem:[%s6239_s13 + $0x60] sm:$0xff]  }
0x17b6   : > { %v2770_v46 = vpack.c.bf16 %v2769_v28, %v2768_v45  ;;  %3172 = vmatpush1.bf16.msra.mxu1 %v4964_v41  ;;  %v4967_v44 = vld [vmem:[%s6239_s13 + $0x68] sm:$0xff]   ;;  %v4968_v28 = vld [vmem:[%s6239_s13 + $0x70] sm:$0xff]   ;;  %v4969_v45 = vld [vmem:[%s6239_s13 + $0x78] sm:$0xff]  }
0x17b7   : > { %3173 = vmatprep.subr.bf16.mxu1 %v5112_v40 }
0x17b8   : > { %4743 = vmatmul.mubr.msk.bf16.vlgmr.msra.gmra.mrb[64].mxu0 %vm2802_vm11, %v2770_v46  ;;  %v4970_v46 = vld [vmem:[%s6239_s13 + $0x80] sm:$0xff]  }
0x17b9   : > { %4750 = vmatprep.mubr.msk.bf16.mxu0 %vm5105_vm4, %v5104_v3  ;;  %4747 = vmatpush3.bf16.msra.mxu0 %v4956_v49  ;;  %v4971_v49 = vld [vmem:[%s6239_s13 + $0x88] sm:$0xff]  }
0x17ba   : > { %4748 = vmatprep.subr.bf16.mxu0 %v5104_v3  ;;  %3174 = vmatpush1.bf16.msra.mxu1 %v4965_v42 }
0x17bb   : > { %3175 = vmatprep.subr.bf16.mxu1 %v5112_v40 }
0x17bd   : > { %4749 = vmatpush3.bf16.msra.mxu0 %v2881_v51 }
0x17be   : > { %4754 = vmatprep.subr.bf16.mxu0 %v5104_v3  ;;  %3176 = vmatpush1.bf16.msra.mxu1 %v4966_v43 }
0x17bf   : > { %3177 = vmatprep.subr.bf16.mxu1 %v5112_v40 }
0x17c2   : > { %3178 = vmatpush1.bf16.msra.mxu1 %v4967_v44 }
0x17c3   : > { %3179 = vmatprep.subr.bf16.mxu1 %v5112_v40 }
0x17c6   : > { %3180 = vmatpush1.bf16.msra.mxu1 %v4968_v28 }
0x17c7   : > { %3181 = vmatprep.subr.bf16.mxu1 %v5112_v40 }
0x17ca   : > { %3182 = vmatpush1.bf16.msra.mxu1 %v4969_v45 }
0x17cb   : > { %3183 = vmatprep.subr.bf16.mxu1 %v5112_v40 }
0x17ce   : > { %3184 = vmatpush1.bf16.msra.mxu1 %v4970_v46 }
0x17cf   : > { %3185 = vmatprep.subr.bf16.mxu1 %v5112_v40 }
0x17d2   : > { %3186 = vmatpush1.bf16.msra.mxu1 %v4971_v49 }
0x17d3   : > { %4776 = vmatprep.subr.bf16.mxu1 %v5104_v3 }
0x188b   : > { %v2844_v53 = vpop.f32.mrb[64].mxu0 }
0x188c   : > { %v2845_v54 = vadd.f32 %v2844_v53, %v2774_v52  ;;  %v4744_v55 = vpop.f32.mrb[65].mxu0 }
0x188d   : > { %v2847_v60 = vpop.f32.mrb[66].mxu0 }
0x188e   : > { %v2851_v59 = vmax.f32 %v2845_v54, 0.0  ;;  %v2848_v63 = vadd.f32 %v2847_v60, %v2774_v52  ;;  %v4745_v1 = vpop.f32.mrb[67].mxu0 }
0x1890   : > { %v2852_v4 = vmax.f32 %v2848_v63, 0.0  ;;  %v2861_v7 = vsel %vm805_vm3, %v2851_v59, %v4862_v20 }
0x1892   : > { %v2862_v6 = vsel %vm805_vm3, %v2852_v4, %v4863_v5 }
0x1893   : > { %v2863_v9 = vpack.c.bf16 %v2862_v6, %v2861_v7 }
0x1895   : > { %4751 = vmatmul.mubr.msk.bf16.vlgmr.msra.gmra.mrb[68].mxu0 %vm989_vm6, %v2863_v9 }
0x1896   : > { %4758 = vmatprep.mubr.msk.bf16.mxu0 %vm5105_vm4, %v5104_v3  ;;  %4755 = vmatpush3.bf16.msra.mxu0 %v4958_v8  ;;  %v5979_v8 = vld [vmem:[%s6229_s3 + $0x8] sm:$0xff] }
0x1897   : > { %4756 = vmatprep.subr.bf16.mxu0 %v5104_v3 }
0x189a   : > { %4757 = vmatpush3.bf16.msra.mxu0 %v4959_v10  ;;  %v1804_v10 = vrot.slane %v5979_v8, %v5445_v0 }
0x189b   : > { %4762 = vmatprep.subr.bf16.mxu0 %v5104_v3 }
0x1968   : > { %v2917_v12 = vpop.f32.mrb[68].mxu0 }
0x1969   : > { %v2918_v26 = vadd.f32 %v2917_v12, %v2867_v11  ;;  %v4752_v29 = vpop.f32.mrb[69].mxu0 }
0x196a   : > { %v2920_v32 = vpop.f32.mrb[70].mxu0 }
0x196b   : > { %v2921_v13 = vadd.f32 %v2920_v32, %v2867_v11  ;;  %v4753_v2 = vpop.f32.mrb[71].mxu0  ;;  %v2924_v16 = vmax.f32 %v2918_v26, 0.0  ;;  %v1888_v11 = vadd.f32 %v5761_v30, %v1804_v10  ;;  %v4993_v10 = vld [vmem:[%s6241_s15 + $0x60] ss:$16 sps:$4 sm:$0xff]  }
0x196d   : > { %v2925_v14 = vmax.f32 %v2921_v13, 0.0  ;;  %v1893_v12 = vadd.f32 %v1888_v11, %v5595_v33  ;;  %v4996_v11 = vld [vmem:[%s6241_s15 + $0x68] ss:$16 sps:$4 sm:$0xff]  }
0x196f   : > { %v5907_v15 = vpack.c.bf16 %v2925_v14, %v2924_v16  ;;  %v1894_v26 = vsel %vm620_vm0, %v1893_v12, 0.0 }
0x1971   : > { %4759 = vmatmul.mubr.msk.bf16.vlgmr.msra.gmra.mrb[72].mxu0 %vm620_vm0, %v5907_v15 }
0x1972   : > { %4764 = vmatprep.mubr.msk.bf16.mxu0 %vm5105_vm4, %v5104_v3 }
0x1a44   : > { %v2980_v47 = vpop.f32.mrb[72].mxu0 }
0x1a45   : > { %v2981_v58 = vadd.f32 %v2980_v47, %v2930_v18  ;;  %v4760_v23 = vpop.f32.mrb[73].mxu0 }
0x1a46   : > { %v2983_v25 = vpop.f32.mrb[74].mxu0 }
0x1a47   : > { %v2984_v34 = vadd.f32 %v2983_v25, %v2930_v18  ;;  %v4761_v35 = vpop.f32.mrb[75].mxu0  ;;  %v2987_v31 = vmax.f32 %v2981_v58, 0.0 }
0x1a49   : > { %v2988_v36 = vmax.f32 %v2984_v34, 0.0 }
0x1a4b   : > { %v2989_v62 = vpack.c.bf16 %v2988_v36, %v2987_v31  ;;  %v1983_v31 = vld [vmem:[%s6238_s12 + $0x5c] sm:$0xf]  ;;  %v4972_v36 = vld [vmem:[%s6239_s13 + $0x90] sm:$0xff]  }
0x1a4d   : > { %4763 = vmatpush3.bf16.msra.mxu0 %v2989_v62  ;;  %v4974_v62 = vld [vmem:[%s6239_s13 + $0xa0] sm:$0xff]  }
0x1a50   : > { %4765 = vmatmul.mubr.msk.bf16.vlgmr.msra.gmra.mrb[76].mxu0 %vm987_vm5, %v4960_v61 }
0x1a51   : > { %4768 = vmatprep.mubr.msk.bf16.mxu0 %vm5105_vm4, %v5104_v3 }
0x1a58   : > { %4769 = vmatmul.mubr.msk.bf16.gmra.mrb[80].mxu0 %vm987_vm5, %v4961_v37 }
0x1a59   : > { %4772 = vmatprep.mubr.msk.bf16.mxu0 %vm5105_vm4, %v5104_v3 }
0x1a60   : > { %4773 = vmatmul.mubr.msk.bf16.gmra.mrb[84].mxu0 %vm987_vm5, %v4962_v38 }
0x1a61   : > { %3562 = vmatprep.mubr.bf16.mxu0 %v5112_v40 }
0x1b23   : > { %v3046_v50 = vpop.f32.mrb[76].mxu0 }
0x1b24   : > { %v3069_v51 = vrot.slane %v3046_v50, 4  ;;  %v4766_v52 = vpop.f32.mrb[77].mxu0 }
0x1b25   : > { %v3049_v53 = vpop.f32.mrb[78].mxu0 }
0x1b26   : > { %3070 = vrot.lane.b32.xlu0 %v3069_v51, %s6271_s30  ;;  %3074 = vrot.lane.b32.xlu1 %v3049_v53, %s6273_s21  ;;  %v4767_v54 = vpop.f32.mrb[79].mxu0  ;;  %v3077_v55 = vrot.slane %v3049_v53, 4 }
0x1b2a   : > { %3078 = vrot.lane.b32.xlu0 %v3077_v55, %s5110_s4 }
0x1b2b   : > { %v3054_v56 = vpop.f32.mrb[80].mxu0 }
0x1b2c   : > { %v3085_v60 = vrot.slane %v3054_v56, 4  ;;  %3082 = vrot.lane.b32.xlu1 %v3054_v56, %s6274_s19  ;;  %v4770_v59 = vpop.f32.mrb[81].mxu0  ;;  %v4975_v56 = vld [vmem:[%s6241_s15] ss:$16 sps:$4 sm:$0xff]  }
0x1b2d   : > { %v3057_v63 = vpop.f32.mrb[82].mxu0  ;;  %v4986_v59 = vld [vmem:[%s6241_s15 + $0x2c] ss:$16 sps:$4 sm:$0xff]  }
0x1b2e   : > { %3086 = vrot.lane.b32.xlu0 %v3085_v60, %s5113_s5  ;;  %v4771_v1 = vpop.f32.mrb[83].mxu0  ;;  %v3093_v5 = vrot.slane %v3057_v63, 4  ;;  %v4977_v60 = vld [vmem:[%s6241_s15 + $0x4] ss:$16 sps:$4 sm:$0xff]   ;;  %s615_s5 = scalar_lea.vmem %s6244_s18, %s6276_s25 }
0x1b2f   : > { %3530 = vmatprep.subr.bf16.mxu0 %v4977_v60  ;;  %v4984_v1 = vld [vmem:[%s6241_s15 + $0x28] ss:$16 sps:$4 sm:$0xff]  }
0x1b30   : > { %3090 = vrot.lane.b32.xlu1 %v3057_v63, %s6275_s2  ;;  %3531 = vmatpush1.bf16.msra.mxu0 %v4975_v56  ;;  %v4981_v63 = vld [vmem:[%s6241_s15 + $0x20] ss:$16 sps:$4 sm:$0xff]   ;;  %v5018_v60 = vld [vmem:[%s6243_s17 + $0x88] sm:$0xff]  }
0x1b32   : > { %3094 = vrot.lane.b32.xlu0 %v3093_v5, %s6268_s20  ;;  %v4989_v5 = vld [vmem:[%s6241_s15 + $0x44] ss:$16 sps:$4 sm:$0xff]  }
0x1b33   : > { %v3062_v20 = vpop.f32.mrb[84].mxu0 }
0x1b34   : > { %v3107_v4 = vpack.c.bf16 %v3062_v20, %v3062_v20  ;;  %v4774_v7 = vpop.f32.mrb[85].mxu0  ;;  %v4992_v20 = vld [vmem:[%s6241_s15 + $0x4c] ss:$16 sps:$4 sm:$0xff]  }
0x1b35   : > { %v3065_v6 = vpop.f32.mrb[86].mxu0  ;;  %v4990_v7 = vld [vmem:[%s6241_s15 + $0x48] ss:$16 sps:$4 sm:$0xff]  }
0x1b36   : > { %4235 = vmatprep.mubr.msk.bf16.mxu1 %vm987_vm5, %v3107_v4  ;;  %v4775_v9 = vpop.f32.mrb[87].mxu0  ;;  %v4987_v4 = vld [vmem:[%s6241_s15 + $0x40] ss:$16 sps:$4 sm:$0xff]   ;;  %v4995_v6 = vld [vmem:[%s6241_s15 + $0x64] ss:$16 sps:$4 sm:$0xff]  }
0x1b37   : > { %v4998_v9 = vld [vmem:[%s6241_s15 + $0x6c] ss:$16 sps:$4 sm:$0xff]  }
0x1b51   : > { %1895 = vadd.xlane.f32.xlu0 %v1894_v26  ;;  %v5004_v26 = vld [vmem:[%s6241_s15 + $0x8c] ss:$16 sps:$4 sm:$0xff]  }
0x1b98   : > { %v3071_v29 = vpop.permute.xlu0 %3070  ;;  %v3075_v13 = vpop.permute.xlu1 %3074 }
0x1b99   : > { %v3097_v32 = vsel %vm987_vm5, %v3046_v50, %v3071_v29  ;;  %v3111_v50 = vrot.slane %v5693_v22, %v5445_v0  ;;  %v4978_v0 = vld [vmem:[%s6241_s15 + $0x8] ss:$16 sps:$4 sm:$0xff]   ;;  %v4980_v22 = vld [vmem:[%s6241_s15 + $0xc] ss:$16 sps:$4 sm:$0xff]   ;;  %v4999_v29 = vld [vmem:[%s6241_s15 + $0x80] ss:$16 sps:$4 sm:$0xff]  }
0x1b9a   : > { %v3098_v2 = vsel %vm620_vm0, %v3097_v32, %v3075_v13  ;;  %v5002_v32 = vld [vmem:[%s6241_s15 + $0x88] ss:$16 sps:$4 sm:$0xff]   ;;  %v5007_v13 = vld [vmem:[%s6241_s15 + $0xa4] ss:$16 sps:$4 sm:$0xff]  }
0x1b9c   : > { %v3079_v16 = vpop.permute.xlu0 %3078 }
0x1b9d   : > { %v3099_v14 = vsel %vm2762_vm9, %v3098_v2, %v3079_v16  ;;  %v5010_v2 = vld [vmem:[%s6241_s15 + $0xac] ss:$16 sps:$4 sm:$0xff]   ;;  %v5005_v16 = vld [vmem:[%s6241_s15 + $0xa0] ss:$16 sps:$4 sm:$0xff]  }
0x1b9e   : > { %v3083_v18 = vpop.permute.xlu1 %3082 }
0x1b9f   : > { %v3100_v47 = vsel %vm664_vm1, %v3099_v14, %v3083_v18  ;;  %v5008_v14 = vld [vmem:[%s6241_s15 + $0xa8] ss:$16 sps:$4 sm:$0xff]   ;;  %v5090_v18 = vld [vmem:[%s6240_s14] sm:$0xff] }
0x1ba0   : > { %v3087_v58 = vpop.permute.xlu0 %3086 }
0x1ba1   : > { %v3102_v30 = vsel %vm3101_vm12, %v3100_v47, %v3087_v58  ;;  %v3262_v47 = vrot.slane %v5090_v18, %v5450_v27  ;;  %v5041_v18 = vld [vmem:[%s6243_s17 + $0x38] sm:$0xff]  }
0x1ba2   : > { %v3091_v23 = vpop.permute.xlu1 %3090 }
0x1ba3   : > { %v3103_v33 = vsel %vm666_vm2, %v3102_v30, %v3091_v23 }
0x1ba4   : > { %v3095_v25 = vpop.permute.xlu0 %3094 }
0x1ba5   : > { %v3105_v34 = vsel %vm3104_vm13, %v3103_v33, %v3095_v25 }
0x1ba6   : > { %v3106_v35 = vpack.c.bf16 %v3105_v34, %v3105_v34 }
0x1ba8   : > { %3202 = vmatmul.mubr.bf16.vlgmr.msra.gmra.mrb[76].mxu1 %v3106_v35 }
0x1ba9   : > { %4777 = vmatpush3.bf16.msra.mxu1 %v5907_v15  ;;  %4778 = vmatprep.mubr.msk.bf16.mxu1 %vm5105_vm4, %v5104_v3  ;;  %v4973_v15 = vld [vmem:[%s6239_s13 + $0x98] sm:$0xff]  }
0x1baa   : > { %4782 = vmatprep.subr.bf16.mxu1 %v5104_v3 }
0x1bb0   : > { %4779 = vmatmul.mubr.msk.bf16.vlgmr.msra.gmra.mrb[80].mxu1 %vm987_vm5, %v1983_v31 }
0x1bb1   : > { %4788 = vmatprep.mubr.msk.bf16.mxu1 %vm5105_vm4, %v5104_v3  ;;  %4783 = vmatpush3.bf16.msra.mxu1 %v4972_v36 }
0x1bb2   : > { %4784 = vmatprep.subr.bf16.mxu1 %v5104_v3 }
0x1bb5   : > { %4785 = vmatpush3.bf16.msra.mxu1 %v4973_v15 }
0x1bb6   : > { %4786 = vmatprep.subr.bf16.mxu1 %v5104_v3 }
0x1bb9   : > { %4787 = vmatpush3.bf16.msra.mxu1 %v4974_v62  ;;  %v5011_v62 = vld [vmem:[%s6243_s17 + $0x40] sm:$0xff]  }
0x1bba   : > { %3571 = vmatprep.subr.bf16.mxu1 %v4980_v22  ;;  %v5020_v22 = vld [vmem:[%s6243_s17 + $0xd0] sm:$0xff]  }
0x1bde   : > { %v1896_v28 = vpop.xlane.xlu0 %1895 }
0x1bdf   : > { %v1897_v45 = vmul.f32 0.03125, %v1896_v28 }
0x1be1   : > { %v6013_v46 = vsub.f32 %v1893_v12, %v1897_v45  ;;  %v5001_v12 = vld [vmem:[%s6241_s15 + $0x84] ss:$16 sps:$4 sm:$0xff]  }
0x1be3   : > { %v1899_v3 = vmul.f32 %v6013_v46, %v6013_v46 }
0x1be5   : > { %v1900_v49 = vsel %vm620_vm0, %v1899_v3, 0.0  ;;  %v1910_v3 = vrot.slane %v5979_v8, %v5450_v27 }
0x1c7b   : > { %v3203_v61 = vpop.f32.mrb[76].mxu1 }
0x1c7c   : > { %v3205_v37 = vpop.f32.mrb[77].mxu1  ;;  %v3204_v51 = vadd.f32 %v3203_v61, %v3111_v50  ;;  %v5012_v61 = vld [vmem:[%s6243_s17 + $0xc0] sm:$0xff]   ;;  %v1915_v50 = vrot.slane %v5979_v8, %v1277_v57  ;;  %v5016_v57 = vld [vmem:[%s6243_s17 + $0xc8] sm:$0xff]  }
0x1c7d   : > { %v3206_v38 = vpop.f32.mrb[78].mxu1  ;;  %v5017_v8 = vld [vmem:[%s6243_s17 + $0x8] sm:$0xff]  }
0x1c7e   : > { %v3207_v39 = vpop.f32.mrb[79].mxu1  ;;  %v3209_v52 = vmax.f32 %v3204_v51, 0.0 }
0x1c83   : > { %v3247_v41 = vpop.f32.mrb[80].mxu1 }
0x1c84   : > { %3254 = vrot.lane.b32.xlu1 %v3247_v41, %s6271_s30  ;;  %v4780_v42 = vpop.f32.mrb[81].mxu1 }
0x1c85   : > { %v3250_v43 = vpop.f32.mrb[82].mxu1 }
0x1c86   : > { %v4781_v44 = vpop.f32.mrb[83].mxu1 }
0x1ca8   : > { %1901 = vadd.xlane.f32.xlu1 %v1900_v49 }
0x1cf6   : > { %v3255_v53 = vpop.permute.xlu1 %3254 }
0x1cf7   : > { %v3257_v54 = vsel %vm987_vm5, %v3209_v52, %v3255_v53 }
0x1cf8   : > { %v3258_v55 = vpack.c.bf16 %v3257_v54, %v3257_v54 }
0x1cfa   : > { %4789 = vmatmul.mubr.msk.bf16.vlgmr.msra.gmra.mrb[84].mxu1 %vm2762_vm9, %v3258_v55  ;;  %v5013_v55 = vld [vmem:[%s6243_s17] sm:$0xff]  }
0x1cfb   : > { %3603 = vmatprep.mubr.bf16.mxu1 %v5112_v40  ;;  %v4983_v40 = vld [vmem:[%s6241_s15 + $0x24] ss:$16 sps:$4 sm:$0xff]   ;;  %3572 = vmatpush1.bf16.msra.mxu1 %v4978_v0 }
0x1cfc   : > { %3532 = vmatprep.subr.bf16.mxu0 %v4983_v40  ;;  %3573 = vmatprep.subr.bf16.mxu1 %v4986_v59  ;;  %v5019_v0 = vld [vmem:[%s6243_s17 + $0x50] sm:$0xff]  }
0x1cfd   : > { %3533 = vmatpush1.bf16.msra.mxu0 %v4981_v63  ;;  %v5021_v40 = vld [vmem:[%s6243_s17 + $0x10] sm:$0xff]   ;;  %v5023_v63 = vld [vmem:[%s6243_s17 + $0x58] sm:$0xff]  }
0x1cfe   : > { %3534 = vmatprep.subr.bf16.mxu0 %v4989_v5  ;;  %v5022_v59 = vld [vmem:[%s6243_s17 + $0x90] sm:$0xff]   ;;  %v5025_v5 = vld [vmem:[%s6243_s17 + $0x18] sm:$0xff]  }
0x1cff   : > { %3574 = vmatpush1.bf16.msra.mxu1 %v4984_v1  ;;  %v5024_v1 = vld [vmem:[%s6243_s17 + $0xd8] sm:$0xff]  }
0x1d00   : > { %3575 = vmatprep.subr.bf16.mxu1 %v4992_v20  ;;  %v5026_v20 = vld [vmem:[%s6243_s17 + $0x98] sm:$0xff]  }
0x1d01   : > { %3535 = vmatpush1.bf16.msra.mxu0 %v4987_v4  ;;  %v5027_v4 = vld [vmem:[%s6243_s17 + $0x60] sm:$0xff]  }
0x1d02   : > { %3536 = vmatprep.subr.bf16.mxu0 %v4995_v6  ;;  %v5029_v6 = vld [vmem:[%s6243_s17 + $0x20] sm:$0xff]  }
0x1d03   : > { %3576 = vmatpush1.bf16.msra.mxu1 %v4990_v7  ;;  %v5028_v7 = vld [vmem:[%s6243_s17 + $0xe0] sm:$0xff]  }
0x1d04   : > { %3577 = vmatprep.subr.bf16.mxu1 %v4998_v9  ;;  %v5030_v9 = vld [vmem:[%s6243_s17 + $0xa0] sm:$0xff]  }
0x1d05   : > { %3537 = vmatpush1.bf16.msra.mxu0 %v4993_v10  ;;  %v5031_v10 = vld [vmem:[%s6243_s17 + $0x68] sm:$0xff]  }
0x1d06   : > { %3538 = vmatprep.subr.bf16.mxu0 %v5001_v12  ;;  %v5033_v12 = vld [vmem:[%s6243_s17 + $0x28] sm:$0xff]  }
0x1d07   : > { %3578 = vmatpush1.bf16.msra.mxu1 %v4996_v11  ;;  %v5032_v11 = vld [vmem:[%s6243_s17 + $0xe8] sm:$0xff]  }
0x1d08   : > { %3579 = vmatprep.subr.bf16.mxu1 %v5004_v26  ;;  %v5034_v26 = vld [vmem:[%s6243_s17 + $0xa8] sm:$0xff]  }
0x1d09   : > { %3539 = vmatpush1.bf16.msra.mxu0 %v4999_v29  ;;  %v5035_v29 = vld [vmem:[%s6243_s17 + $0x70] sm:$0xff]  }
0x1d0a   : > { %3540 = vmatprep.subr.bf16.mxu0 %v5007_v13  ;;  %v5037_v13 = vld [vmem:[%s6243_s17 + $0x30] sm:$0xff]  }
0x1d0b   : > { %3580 = vmatpush1.bf16.msra.mxu1 %v5002_v32  ;;  %v5036_v32 = vld [vmem:[%s6243_s17 + $0xf0] sm:$0xff]  }
0x1d0c   : > { %3581 = vmatprep.subr.bf16.mxu1 %v5010_v2  ;;  %v5038_v2 = vld [vmem:[%s6243_s17 + $0xb0] sm:$0xff]  }
0x1d0d   : > { %3541 = vmatpush1.bf16.msra.mxu0 %v5005_v16  ;;  %v5039_v16 = vld [vmem:[%s6243_s17 + $0x78] sm:$0xff]  }
0x1d0e   : > { %4456 = vmatprep.subr.bf16.mxu0 %v5011_v62 }
0x1d0f   : > { %3582 = vmatpush1.bf16.msra.mxu1 %v5008_v14  ;;  %v5040_v14 = vld [vmem:[%s6243_s17 + $0xf8] sm:$0xff]  }
0x1d10   : > { %4478 = vmatprep.subr.bf16.mxu1 %v5012_v61 }
0x1d35   : > { %v1902_v42 = vpop.xlane.xlu1 %1901 }
0x1d36   : > { %v1903_v43 = vmul.f32 0.03125, %v1902_v42 }
0x1d38   : > { %v1904_v44 = vadd.f32 1e-12, %v1903_v43 }
0x1d3a   : > { %5087 = vrsqrt.f32 %v1904_v44 }
0x1d44   : > { %v5088_v28 = vpop.eup %5087 }
0x1d45   : > { %v1906_v45 = vmul.f32 %v5088_v28, %v6013_v46  ;;  %v5014_v46 = vld [vmem:[%s6243_s17 + $0x80] sm:$0xff]  }
0x1d47   : > { %v1911_v49 = vmul.f32 %v1910_v3, %v1906_v45 }
0x1d49   : > { %v1916_v51 = vadd.f32 %v1915_v50, %v1911_v49 }
0x1d4b   : > { %v3338_v52 = vrot.slane %v1916_v51, %v5255_v19 }
0x1dcd   : > { %v3318_v58 = vpop.f32.mrb[84].mxu1 }
0x1dce   : > { %v3319_v30 = vadd.f32 %v3318_v58, %v3262_v47  ;;  %v4790_v23 = vpop.f32.mrb[85].mxu1  ;;  %v5042_v47 = vld [vmem:[%s6243_s17 + $0xb8] sm:$0xff]   ;;  %v3345_v58 = vld [vmem:[%s6242_s16] sm:$0xff] }
0x1dcf   : > { %v3321_v33 = vpop.f32.mrb[86].mxu1  ;;  %v3382_v23 = vrot.slane %v3345_v58, %v5406_v48 }
0x1dd0   : > { %v3324_v25 = vmax.f32 %v3319_v30, 0.0  ;;  %v4791_v34 = vpop.f32.mrb[87].mxu1  ;;  %v3374_v30 = vrot.slane %v3345_v58, %v5255_v19  ;;  %v3378_v33 = vrot.slane %v3345_v58, %v5388_v24 }
0x1dd2   : > { %v3326_v35 = vsel %vm3325_vm14, %v3324_v25, 0.0  ;;  %v3386_v25 = vrot.slane %v3345_v58, %v5450_v27  ;;  %v3394_v34 = vrot.slane %v3374_v30, %v5255_v19 }
0x1dd3   : > { %v3327_v31 = vrot.slane %v3326_v35, 4 }
0x1dd5   : > { %v3328_v36 = vadd.f32 %v3327_v31, %v3326_v35  ;;  %v3402_v35 = vrot.slane %v3382_v23, %v5255_v19  ;;  %v3398_v31 = vrot.slane %v3378_v33, %v5255_v19 }
0x1dd7   : > { %v3329_v15 = vrot.slane %v3328_v36, 2 }
0x1dd9   : > { %v3330_v37 = vadd.f32 %v3329_v15, %v3328_v36  ;;  %v3406_v36 = vrot.slane %v3386_v25, %v5255_v19 }
0x1ddb   : > { %v3331_v38 = vrot.slane %v3330_v37, 1 }
0x1ddd   : > { %v3332_v39 = vadd.f32 %v3331_v38, %v3330_v37 }
0x1ddf   : > { %v3334_v41 = vmul.f32 0.25, %v3332_v39 }
0x1de1   : > { %3340 = vrot.lane.b32.xlu0 %v3334_v41, %s6273_s21 }
0x1e53   : > { %v3341_v53 = vpop.permute.xlu0 %3340 }
0x1e54   : > { %v3343_v54 = vsel %vm620_vm0, %v3338_v52, %v3341_v53 }
0x1e55   : > { %v3344_v56 = vpack.c.bf16 %v3343_v54, %v3343_v54  ;;  %v3687_v54 = vrot.slane %v3345_v58, %v5263_v21 }
0x1e57   : > { %4265 = vmatmul.mubr.msk.bf16.vlgmr.msra.gmra.mrb[88].mxu0 %vm666_vm2, %v3344_v56  ;;  %4266 = vmatmul.mubr.msk.bf16.vlgmr.msra.gmra.mrb[88].mxu1 %vm666_vm2, %v3344_v56 }
0x1e58   : > { %4457 = vmatpush3.bf16.msra.mxu0 %v5013_v55  ;;  %4479 = vmatpush3.bf16.msra.mxu1 %v5014_v46 }
0x1e59   : > { %4458 = vmatprep.subr.bf16.mxu0 %v5015_v17  ;;  %4480 = vmatprep.subr.bf16.mxu1 %v5016_v57 }
0x1e5c   : > { %4459 = vmatpush3.bf16.msra.mxu0 %v5017_v8  ;;  %4481 = vmatpush3.bf16.msra.mxu1 %v5018_v60 }
0x1e5d   : > { %4460 = vmatprep.subr.bf16.mxu0 %v5019_v0  ;;  %4482 = vmatprep.subr.bf16.mxu1 %v5020_v22 }
0x1e60   : > { %4461 = vmatpush3.bf16.msra.mxu0 %v5021_v40  ;;  %4483 = vmatpush3.bf16.msra.mxu1 %v5022_v59 }
0x1e61   : > { %4462 = vmatprep.subr.bf16.mxu0 %v5023_v63  ;;  %4484 = vmatprep.subr.bf16.mxu1 %v5024_v1 }
0x1e64   : > { %4463 = vmatpush3.bf16.msra.mxu0 %v5025_v5  ;;  %4485 = vmatpush3.bf16.msra.mxu1 %v5026_v20 }
0x1e65   : > { %4464 = vmatprep.subr.bf16.mxu0 %v5027_v4  ;;  %4486 = vmatprep.subr.bf16.mxu1 %v5028_v7 }
0x1e68   : > { %4465 = vmatpush3.bf16.msra.mxu0 %v5029_v6  ;;  %4487 = vmatpush3.bf16.msra.mxu1 %v5030_v9 }
0x1e69   : > { %4466 = vmatprep.subr.bf16.mxu0 %v5031_v10  ;;  %4488 = vmatprep.subr.bf16.mxu1 %v5032_v11 }
0x1e6c   : > { %4467 = vmatpush3.bf16.msra.mxu0 %v5033_v12  ;;  %4489 = vmatpush3.bf16.msra.mxu1 %v5034_v26 }
0x1e6d   : > { %4468 = vmatprep.subr.bf16.mxu0 %v5035_v29  ;;  %4490 = vmatprep.subr.bf16.mxu1 %v5036_v32 }
0x1e70   : > { %4469 = vmatpush3.bf16.msra.mxu0 %v5037_v13  ;;  %4491 = vmatpush3.bf16.msra.mxu1 %v5038_v2 }
0x1e71   : > { %4470 = vmatprep.subr.bf16.mxu0 %v5039_v16  ;;  %4492 = vmatprep.subr.bf16.mxu1 %v5040_v14 }
0x1e74   : > { %4471 = vmatpush3.bf16.msra.mxu0 %v5041_v18  ;;  %4493 = vmatpush3.bf16.msra.mxu1 %v5042_v47 }
0x1f2a   : > { %v3564_v15 = vpop.f32.mrb[88].mxu0  ;;  %v3605_v62 = vpop.f32.mrb[88].mxu1 }
0x1f2b   : > { %v3565_v61 = vadd.f32 %v3564_v15, %v3394_v34  ;;  %v3606_v37 = vadd.f32 %v3605_v62, %v3402_v35  ;;  %v3566_v38 = vpop.f32.mrb[89].mxu0  ;;  %v3607_v39 = vpop.f32.mrb[89].mxu1 }
0x1f2c   : > { %v3567_v41 = vadd.f32 %v3566_v38, %v3398_v31  ;;  %v3608_v48 = vadd.f32 %v3607_v39, %v3406_v36  ;;  %v3568_v42 = vpop.f32.mrb[90].mxu0  ;;  %v3609_v24 = vpop.f32.mrb[90].mxu1 }
0x1f2d   : > { %v3612_v43 = vmax.f32 %v3565_v61, 0.0  ;;  %v3614_v27 = vmax.f32 %v3606_v37, 0.0  ;;  %v3569_v44 = vpop.f32.mrb[91].mxu0  ;;  %v3610_v28 = vpop.f32.mrb[91].mxu1 }
0x1f2e   : > { %v3613_v45 = vmax.f32 %v3567_v41, 0.0  ;;  %v3615_v3 = vmax.f32 %v3608_v48, 0.0 }
0x1f2f   : > { %v3616_v51 = vpack.c.bf16 %v3612_v43, %v3612_v43  ;;  %v3618_v19 = vpack.c.bf16 %v3614_v27, %v3614_v27 }
0x1f30   : > { %v3617_v49 = vpack.c.bf16 %v3613_v45, %v3613_v45  ;;  %v3619_v50 = vpack.c.bf16 %v3615_v3, %v3615_v3 }
0x1f32   : > { %3912 = vmatprep.mubr.bf16.mxu0 %v3617_v49  ;;  %3952 = vmatprep.mubr.bf16.mxu1 %v3619_v50 }
0x1f33   : > { %3913 = vmatmul.mubr.bf16.vlgmr.msra.gmra.mrb[92].mxu0 %v3616_v51  ;;  %3953 = vmatmul.mubr.bf16.vlgmr.msra.gmra.mrb[92].mxu1 %v3618_v19 }
0x2006   : > { %v4472_v52 = vpop.f32.mrb[92].mxu0  ;;  %v4494_v53 = vpop.f32.mrb[92].mxu1 }
0x2007   : > { %v4473_v55 = vpop.f32.mrb[93].mxu0  ;;  %v4495_v46 = vpop.f32.mrb[93].mxu1 }
0x2008   : > { %v4474_v56 = vadd.f32 %v4473_v55, %v4472_v52  ;;  %v4496_v17 = vadd.f32 %v4495_v46, %v4494_v53  ;;  %v4475_v57 = vpop.f32.mrb[94].mxu0  ;;  %v4497_v8 = vpop.f32.mrb[94].mxu1 }
0x2009   : > { %v4476_v60 = vpop.f32.mrb[95].mxu0  ;;  %v4498_v0 = vpop.f32.mrb[95].mxu1 }
0x200a   : > { %v3915_v22 = vadd.f32 %v4474_v56, %v3687_v54 }
0x200c   : > { %v3955_v40 = vadd.f32 %v4496_v17, %v3915_v22 }
0x200e   : > { %3960 = vst [vmem:[%s615_s5] sm:$0xff] %v3955_v40 }
0x200f PF: > { %s28_s27 = sadd.s32 1, %s5097_s27  }
0x2010   : > { %p25_p5 = scmp.ge.s32.totalorder %s28_s27, 4  }
0x2012   :  { %27 = sbr.rel (!%p25_p5) target bundleno = 6 (0x6), region = 133 }

</bundles_post_ra>
